<compile_context>
chip_gen: v5e
topology: v5e:2x2
jax: 0.10.0
libtpu: 0.0.40
codegen_flags: <defaults>
</compile_context>

<pallas_src>
import jax
import jax.numpy as jnp
from jax.experimental import pallas as pl
from jax.experimental.pallas import tpu as pltpu

IN_DIMS = 8919     # first_layer in_features
HID_DIMS = 64      # hidden width
EMB_DIMS = 32      # last_layer out_features (emb_dims)

TB_MAX = 256       # batch tile (multiple of 8)


def _round_up(n, m):
    return ((n + m - 1) // m) * m


def _mlp_kernel(x_ref, w1_ref, b1_ref, w2_ref, b2_ref, w3_ref, b3_ref, o_ref):
    # x_ref: (TB, IN)   w*_ref: pre-transposed (in, out)   b*_ref: (1, out)
    # o_ref: (TB, EMB_DIMS)
    h = jnp.dot(x_ref[...], w1_ref[...], preferred_element_type=jnp.float32)
    h = jnp.maximum(h + b1_ref[...], 0.0)                       # relu(first_layer)
    h = jnp.dot(h, w2_ref[...], preferred_element_type=jnp.float32)
    h = jnp.maximum(h + b2_ref[...], 0.0)                       # relu(middle_layer)
    h = jnp.dot(h, w3_ref[...], preferred_element_type=jnp.float32)
    o_ref[...] = jnp.maximum(h + b3_ref[...], 0.0).astype(o_ref.dtype)  # relu(last_layer)


def model_reports_forward(x, w1, b1, w2, b2, w3, b3):
    """Forward pass matching PyTorch ModelReports.

    x:  (B, 8919) f32
    w1: (64, 8919), b1: (64,)   -- PyTorch nn.Linear layout (out_features, in_features)
    w2: (64, 64),   b2: (64,)
    w3: (32, 64),   b3: (32,)
    returns: (B, 32) f32
    """
    B = x.shape[0]

    # Pre-transpose weights to (in, out) so the kernel computes x @ W_t + b == x @ W.T + b.
    w1_t = jnp.transpose(w1)
    w2_t = jnp.transpose(w2)
    w3_t = jnp.transpose(w3)
    b1_2d = b1.reshape(1, HID_DIMS)
    b2_2d = b2.reshape(1, HID_DIMS)
    b3_2d = b3.reshape(1, EMB_DIMS)

    # Batch tiling; pad B so the last tile is never ragged.
    tb = min(TB_MAX, _round_up(B, 8))
    b_pad = _round_up(B, tb)
    if b_pad != B:
        x = jnp.pad(x, ((0, b_pad - B), (0, 0)))
    grid = (b_pad // tb,)

    flops = 2 * b_pad * (IN_DIMS * HID_DIMS + HID_DIMS * HID_DIMS + HID_DIMS * EMB_DIMS)
    bytes_accessed = 4 * (
        b_pad * IN_DIMS + b_pad * EMB_DIMS
        + IN_DIMS * HID_DIMS + HID_DIMS * HID_DIMS + HID_DIMS * EMB_DIMS
        + 2 * HID_DIMS + EMB_DIMS
    )

    out = pl.pallas_call(
        _mlp_kernel,
        out_shape=jax.ShapeDtypeStruct((b_pad, EMB_DIMS), x.dtype),
        grid_spec=pltpu.PrefetchScalarGridSpec(
            num_scalar_prefetch=0,
            grid=grid,
            in_specs=[
                pl.BlockSpec((tb, IN_DIMS), lambda i: (i, 0)),        # x: tiled over batch
                pl.BlockSpec((IN_DIMS, HID_DIMS), lambda i: (0, 0)),  # w1_t: resident
                pl.BlockSpec((1, HID_DIMS), lambda i: (0, 0)),        # b1
                pl.BlockSpec((HID_DIMS, HID_DIMS), lambda i: (0, 0)), # w2_t
                pl.BlockSpec((1, HID_DIMS), lambda i: (0, 0)),        # b2
                pl.BlockSpec((HID_DIMS, EMB_DIMS), lambda i: (0, 0)), # w3_t
                pl.BlockSpec((1, EMB_DIMS), lambda i: (0, 0)),        # b3
            ],
            out_specs=pl.BlockSpec((tb, EMB_DIMS), lambda i: (i, 0)),
        ),
        compiler_params=pltpu.CompilerParams(
            dimension_semantics=("parallel",),        # independent batch tiles -> megacore
            vmem_limit_bytes=48 * 1024 * 1024,
        ),
        cost_estimate=pl.CostEstimate(
            flops=flops, transcendentals=0, bytes_accessed=bytes_accessed),
    )(x, w1_t, b1_2d, w2_t, b2_2d, w3_t, b3_2d)

    return out[:B]


if __name__ == "__main__":
    key = jax.random.PRNGKey(0)
    k_x, kw1, kb1, kw2, kb2, kw3, kb3 = jax.random.split(key, 7)

    # Deterministic parameter init mimicking nn.Linear defaults:
    # U(-1/sqrt(in_features), 1/sqrt(in_features)); weights in PyTorch (out, in) layout.
    def linear_init(kw, kb, out_f, in_f):
        bound = 1.0 / (in_f ** 0.5)
        w = jax.random.uniform(kw, (out_f, in_f), jnp.float32, minval=-bound, maxval=bound)
        b = jax.random.uniform(kb, (out_f,), jnp.float32, minval=-bound, maxval=bound)
        return w, b

    w1, b1 = linear_init(kw1, kb1, HID_DIMS, IN_DIMS)
    w2, b2 = linear_init(kw2, kb2, HID_DIMS, HID_DIMS)
    w3, b3 = linear_init(kw3, kb3, EMB_DIMS, HID_DIMS)

    # Small batch; IN_DIMS = 8919 is fixed by the module spec.
    B = 8
    x = jax.random.normal(k_x, (B, IN_DIMS), dtype=jnp.float32)

    out = model_reports_forward(x, w1, b1, w2, b2, w3, b3)
    out = jax.block_until_ready(out)

    # Pure-JAX reference (high-precision matmuls for a fair f32 comparison).
    hp = jax.lax.Precision.HIGHEST
    h = jnp.maximum(jnp.dot(x, w1.T, precision=hp) + b1, 0.0)
    h = jnp.maximum(jnp.dot(h, w2.T, precision=hp) + b2, 0.0)
    ref = jnp.maximum(jnp.dot(h, w3.T, precision=hp) + b3, 0.0)

    assert out.shape == (B, EMB_DIMS)
    assert jnp.allclose(out, ref, atol=2e-3, rtol=2e-3), float(jnp.max(jnp.abs(out - ref)))

    print("KERNEL_OK")
</pallas_src>

<mosaic_0001>
module attributes {stable_mosaic.version = 11 : i64} {
  func.func @_mlp_kernel(%arg0: i32, %arg1: memref<8x8919xf32, #tpu.memory_space<vmem>>, %arg2: memref<8919x64xf32, #tpu.memory_space<vmem>>, %arg3: memref<1x64xf32, #tpu.memory_space<vmem>>, %arg4: memref<64x64xf32, #tpu.memory_space<vmem>>, %arg5: memref<1x64xf32, #tpu.memory_space<vmem>>, %arg6: memref<64x32xf32, #tpu.memory_space<vmem>>, %arg7: memref<1x32xf32, #tpu.memory_space<vmem>>, %arg8: memref<8x32xf32, #tpu.memory_space<vmem>>) attributes {dimension_semantics = [#tpu.dimension_semantics<parallel>], iteration_bounds = array<i64: 1>, scalar_prefetch = 0 : i64, scratch_operands = 0 : i64, tpu.core_type = #tpu.core_type<tc>, window_params = [{transform_indices = @transform_0, window_bounds = array<i64: 8, 8919>}, {pipeline_mode = #tpu.pipeline_mode<synchronous>, transform_indices = @transform_1, window_bounds = array<i64: 8919, 64>}, {pipeline_mode = #tpu.pipeline_mode<synchronous>, transform_indices = @transform_2, window_bounds = array<i64: 1, 64>}, {pipeline_mode = #tpu.pipeline_mode<synchronous>, transform_indices = @transform_3, window_bounds = array<i64: 64, 64>}, {pipeline_mode = #tpu.pipeline_mode<synchronous>, transform_indices = @transform_4, window_bounds = array<i64: 1, 64>}, {pipeline_mode = #tpu.pipeline_mode<synchronous>, transform_indices = @transform_5, window_bounds = array<i64: 64, 32>}, {pipeline_mode = #tpu.pipeline_mode<synchronous>, transform_indices = @transform_6, window_bounds = array<i64: 1, 32>}, {transform_indices = @transform_7, window_bounds = array<i64: 8, 32>}]} {
    %c0 = arith.constant 0 : index
    %c0_0 = arith.constant 0 : index
    %0 = vector.load %arg1[%c0, %c0_0] : memref<8x8919xf32, #tpu.memory_space<vmem>>, vector<8x8919xf32>
    %c0_1 = arith.constant 0 : index
    %c0_2 = arith.constant 0 : index
    %1 = vector.load %arg2[%c0_1, %c0_2] : memref<8919x64xf32, #tpu.memory_space<vmem>>, vector<8919x64xf32>
    %cst = arith.constant dense<0.000000e+00> : vector<8x64xf32>
    %2 = tpu.matmul %0, %1, %cst {dimension_numbers = #tpu.dot_dimension_numbers<[1], [0], [0], [1], [0, 0, 1, 1], [], []>} : vector<8x8919xf32>, vector<8919x64xf32>, vector<8x64xf32> -> vector<8x64xf32>
    %c0_3 = arith.constant 0 : index
    %c0_4 = arith.constant 0 : index
    %3 = vector.load %arg3[%c0_3, %c0_4] : memref<1x64xf32, #tpu.memory_space<vmem>>, vector<1x64xf32>
    %4 = vector.broadcast %3 : vector<1x64xf32> to vector<8x64xf32>
    %5 = arith.addf %2, %4 : vector<8x64xf32>
    %cst_5 = arith.constant 0.000000e+00 : f32
    %6 = vector.broadcast %cst_5 : f32 to vector<8x64xf32>
    %7 = arith.maximumf %5, %6 : vector<8x64xf32>
    %c0_6 = arith.constant 0 : index
    %c0_7 = arith.constant 0 : index
    %8 = vector.load %arg4[%c0_6, %c0_7] : memref<64x64xf32, #tpu.memory_space<vmem>>, vector<64x64xf32>
    %cst_8 = arith.constant dense<0.000000e+00> : vector<8x64xf32>
    %9 = tpu.matmul %7, %8, %cst_8 {dimension_numbers = #tpu.dot_dimension_numbers<[1], [0], [0], [1], [0, 0, 1, 1], [], []>} : vector<8x64xf32>, vector<64x64xf32>, vector<8x64xf32> -> vector<8x64xf32>
    %c0_9 = arith.constant 0 : index
    %c0_10 = arith.constant 0 : index
    %10 = vector.load %arg5[%c0_9, %c0_10] : memref<1x64xf32, #tpu.memory_space<vmem>>, vector<1x64xf32>
    %11 = vector.broadcast %10 : vector<1x64xf32> to vector<8x64xf32>
    %12 = arith.addf %9, %11 : vector<8x64xf32>
    %cst_11 = arith.constant 0.000000e+00 : f32
    %13 = vector.broadcast %cst_11 : f32 to vector<8x64xf32>
    %14 = arith.maximumf %12, %13 : vector<8x64xf32>
    %c0_12 = arith.constant 0 : index
    %c0_13 = arith.constant 0 : index
    %15 = vector.load %arg6[%c0_12, %c0_13] : memref<64x32xf32, #tpu.memory_space<vmem>>, vector<64x32xf32>
    %cst_14 = arith.constant dense<0.000000e+00> : vector<8x32xf32>
    %16 = tpu.matmul %14, %15, %cst_14 {dimension_numbers = #tpu.dot_dimension_numbers<[1], [0], [0], [1], [0, 0, 1, 1], [], []>} : vector<8x64xf32>, vector<64x32xf32>, vector<8x32xf32> -> vector<8x32xf32>
    %c0_15 = arith.constant 0 : index
    %c0_16 = arith.constant 0 : index
    %17 = vector.load %arg7[%c0_15, %c0_16] : memref<1x32xf32, #tpu.memory_space<vmem>>, vector<1x32xf32>
    %18 = vector.broadcast %17 : vector<1x32xf32> to vector<8x32xf32>
    %19 = arith.addf %16, %18 : vector<8x32xf32>
    %cst_17 = arith.constant 0.000000e+00 : f32
    %20 = vector.broadcast %cst_17 : f32 to vector<8x32xf32>
    %21 = arith.maximumf %19, %20 : vector<8x32xf32>
    %c0_18 = arith.constant 0 : index
    %c0_19 = arith.constant 0 : index
    %22 = vector.load %arg8[%c0_18, %c0_19] : memref<8x32xf32, #tpu.memory_space<vmem>>, vector<8x32xf32>
    tpu.vector_store %arg8[%c0_18, %c0_19], %21 {strides = array<i32>} : memref<8x32xf32, #tpu.memory_space<vmem>>, vector<8x32xf32>,
    return
  }
  func.func @transform_0(%arg0: i32) -> (i32, i32) {
    %c0_i32 = arith.constant 0 : i32
    %c0_i32_0 = arith.constant 0 : i32
    return %arg0, %c0_i32 : i32, i32
  }
  func.func @transform_1(%arg0: i32) -> (i32, i32) {
    %c0_i32 = arith.constant 0 : i32
    %c0_i32_0 = arith.constant 0 : i32
    %c0_i32_1 = arith.constant 0 : i32
    return %c0_i32, %c0_i32_0 : i32, i32
  }
  func.func @transform_2(%arg0: i32) -> (i32, i32) {
    %c0_i32 = arith.constant 0 : i32
    %c0_i32_0 = arith.constant 0 : i32
    %c0_i32_1 = arith.constant 0 : i32
    return %c0_i32, %c0_i32_0 : i32, i32
  }
  func.func @transform_3(%arg0: i32) -> (i32, i32) {
    %c0_i32 = arith.constant 0 : i32
    %c0_i32_0 = arith.constant 0 : i32
    %c0_i32_1 = arith.constant 0 : i32
    return %c0_i32, %c0_i32_0 : i32, i32
  }
  func.func @transform_4(%arg0: i32) -> (i32, i32) {
    %c0_i32 = arith.constant 0 : i32
    %c0_i32_0 = arith.constant 0 : i32
    %c0_i32_1 = arith.constant 0 : i32
    return %c0_i32, %c0_i32_0 : i32, i32
  }
  func.func @transform_5(%arg0: i32) -> (i32, i32) {
    %c0_i32 = arith.constant 0 : i32
    %c0_i32_0 = arith.constant 0 : i32
    %c0_i32_1 = arith.constant 0 : i32
    return %c0_i32, %c0_i32_0 : i32, i32
  }
  func.func @transform_6(%arg0: i32) -> (i32, i32) {
    %c0_i32 = arith.constant 0 : i32
    %c0_i32_0 = arith.constant 0 : i32
    %c0_i32_1 = arith.constant 0 : i32
    return %c0_i32, %c0_i32_0 : i32, i32
  }
  func.func @transform_7(%arg0: i32) -> (i32, i32) {
    %c0_i32 = arith.constant 0 : i32
    %c0_i32_0 = arith.constant 0 : i32
    return %arg0, %c0_i32 : i32, i32
  }
}

</mosaic_0001>

<bundles_post_ra>
// kernel: tpu_custom_call.1
= control target key start
LH: loop header
LB: loop body
LE: loop exit
PB: predicated region body
PF: predicated region fallthrough
CT: control target
= control target key end

     0   :  { %s6406_s0 = inlined_call_operand.vmem [shape: f32[8,8919], index: 0, kind: input, shape index: {}]   ;;  %s6407_s1 = inlined_call_operand.vmem [shape: f32[8919,64], index: 1, kind: input, shape index: {}]   ;;  %s6408_s2 = inlined_call_operand.vmem [shape: f32[1,64], index: 2, kind: input, shape index: {}]   ;;  %s6409_s3 = inlined_call_operand.vmem [shape: f32[64,64], index: 3, kind: input, shape index: {}]   ;;  %s6410_s4 = inlined_call_operand.vmem [shape: f32[1,64], index: 4, kind: input, shape index: {}]   ;;  %s6411_s5 = inlined_call_operand.vmem [shape: f32[64,32], index: 5, kind: input, shape index: {}]   ;;  %s6412_s6 = inlined_call_operand.vmem [shape: f32[1,32], index: 6, kind: input, shape index: {}]   ;;  %s6413_s7 = inlined_call_operand.hbm [shape: f32[8,32], index: 7, kind: output, shape index: {}]  }
   0x1   :  { %v112_v0 = vld [vmem:[%s6407_s1 + $0x78] sm:$0xff]  ;;  %v111_v2 = vld [vmem:[%s6407_s1 + $0x70] sm:$0xff]  ;;  %v110_v6 = vld [vmem:[%s6407_s1 + $0x68] sm:$0xff] }
   0x2   :  { %v144_v1 = vld [vmem:[%s6407_s1 + $0x178] sm:$0xff]  ;;  %1224 = vmatpush.msra.mxu0 %v112_v0  ;;  %v143_v4 = vld [vmem:[%s6407_s1 + $0x170] sm:$0xff]  ;;  %v142_v8 = vld [vmem:[%s6407_s1 + $0x168] sm:$0xff] }
   0x3   :  { %1264 = vmatpush.msra.mxu2 %v144_v1  ;;  %v128_v3 = vld [vmem:[%s6407_s1 + $0xf8] sm:$0xff]  ;;  %v127_v7 = vld [vmem:[%s6407_s1 + $0xf0] sm:$0xff]  ;;  %v126_v10 = vld [vmem:[%s6407_s1 + $0xe8] sm:$0xff] }
   0x4   :  { %v160_v5 = vld [vmem:[%s6407_s1 + $0x1f8] sm:$0xff]  ;;  %1244 = vmatpush.msra.mxu1 %v128_v3  ;;  %1225 = vmatpush.msra.mxu0 %v111_v2  ;;  %v159_v9 = vld [vmem:[%s6407_s1 + $0x1f0] sm:$0xff]  ;;  %v109_v11 = vld [vmem:[%s6407_s1 + $0x60] sm:$0xff] }
   0x5   :  { %1284 = vmatpush.msra.mxu3 %v160_v5  ;;  %1265 = vmatpush.msra.mxu2 %v143_v4  ;;  %v141_v12 = vld [vmem:[%s6407_s1 + $0x160] sm:$0xff]  ;;  %v158_v13 = vld [vmem:[%s6407_s1 + $0x1e8] sm:$0xff]  ;;  %v108_v16 = vld [vmem:[%s6407_s1 + $0x58] sm:$0xff] }
   0x6   :  { %1245 = vmatpush.msra.mxu1 %v127_v7  ;;  %1226 = vmatpush.msra.mxu0 %v110_v6  ;;  %v125_v14 = vld [vmem:[%s6407_s1 + $0xe0] sm:$0xff]  ;;  %v140_v17 = vld [vmem:[%s6407_s1 + $0x158] sm:$0xff]  ;;  %v107_v20 = vld [vmem:[%s6407_s1 + $0x50] sm:$0xff] }
   0x7   :  { %1285 = vmatpush.msra.mxu3 %v159_v9  ;;  %1266 = vmatpush.msra.mxu2 %v142_v8  ;;  %v157_v15 = vld [vmem:[%s6407_s1 + $0x1e0] sm:$0xff]  ;;  %v124_v18 = vld [vmem:[%s6407_s1 + $0xd8] sm:$0xff]  ;;  %v139_v21 = vld [vmem:[%s6407_s1 + $0x150] sm:$0xff] }
   0x8   :  { %1246 = vmatpush.msra.mxu1 %v126_v10  ;;  %1227 = vmatpush.msra.mxu0 %v109_v11  ;;  %v156_v19 = vld [vmem:[%s6407_s1 + $0x1d8] sm:$0xff]  ;;  %v123_v22 = vld [vmem:[%s6407_s1 + $0xd0] sm:$0xff]  ;;  %v106_v24 = vld [vmem:[%s6407_s1 + $0x48] sm:$0xff] }
   0x9   :  { %1286 = vmatpush.msra.mxu3 %v158_v13  ;;  %1267 = vmatpush.msra.mxu2 %v141_v12  ;;  %v155_v23 = vld [vmem:[%s6407_s1 + $0x1d0] sm:$0xff]  ;;  %v138_v25 = vld [vmem:[%s6407_s1 + $0x148] sm:$0xff]  ;;  %v105_v28 = vld [vmem:[%s6407_s1 + $0x40] sm:$0xff] }
   0xa   :  { %1247 = vmatpush.msra.mxu1 %v125_v14  ;;  %1228 = vmatpush.msra.mxu0 %v108_v16  ;;  %v122_v26 = vld [vmem:[%s6407_s1 + $0xc8] sm:$0xff]  ;;  %v137_v29 = vld [vmem:[%s6407_s1 + $0x140] sm:$0xff]  ;;  %v104_v32 = vld [vmem:[%s6407_s1 + $0x38] sm:$0xff] }
   0xb   :  { %1287 = vmatpush.msra.mxu3 %v157_v15  ;;  %1268 = vmatpush.msra.mxu2 %v140_v17  ;;  %v154_v27 = vld [vmem:[%s6407_s1 + $0x1c8] sm:$0xff]  ;;  %v121_v30 = vld [vmem:[%s6407_s1 + $0xc0] sm:$0xff]  ;;  %v136_v33 = vld [vmem:[%s6407_s1 + $0x138] sm:$0xff] }
   0xc   :  { %1248 = vmatpush.msra.mxu1 %v124_v18  ;;  %1229 = vmatpush.msra.mxu0 %v107_v20  ;;  %v153_v31 = vld [vmem:[%s6407_s1 + $0x1c0] sm:$0xff]  ;;  %v120_v34 = vld [vmem:[%s6407_s1 + $0xb8] sm:$0xff]  ;;  %v103_v36 = vld [vmem:[%s6407_s1 + $0x30] sm:$0xff] }
   0xd   :  { %1288 = vmatpush.msra.mxu3 %v156_v19  ;;  %1269 = vmatpush.msra.mxu2 %v139_v21  ;;  %v152_v35 = vld [vmem:[%s6407_s1 + $0x1b8] sm:$0xff]  ;;  %v135_v37 = vld [vmem:[%s6407_s1 + $0x130] sm:$0xff]  ;;  %v102_v40 = vld [vmem:[%s6407_s1 + $0x28] sm:$0xff] }
   0xe   :  { %1249 = vmatpush.msra.mxu1 %v123_v22  ;;  %1230 = vmatpush.msra.mxu0 %v106_v24  ;;  %v119_v38 = vld [vmem:[%s6407_s1 + $0xb0] sm:$0xff]  ;;  %v134_v41 = vld [vmem:[%s6407_s1 + $0x128] sm:$0xff]  ;;  %v101_v44 = vld [vmem:[%s6407_s1 + $0x20] sm:$0xff] }
   0xf   :  { %1289 = vmatpush.msra.mxu3 %v155_v23  ;;  %1270 = vmatpush.msra.mxu2 %v138_v25  ;;  %v151_v39 = vld [vmem:[%s6407_s1 + $0x1b0] sm:$0xff]  ;;  %v118_v42 = vld [vmem:[%s6407_s1 + $0xa8] sm:$0xff]  ;;  %v133_v45 = vld [vmem:[%s6407_s1 + $0x120] sm:$0xff] }
  0x10   :  { %1250 = vmatpush.msra.mxu1 %v122_v26  ;;  %1231 = vmatpush.msra.mxu0 %v105_v28  ;;  %v150_v43 = vld [vmem:[%s6407_s1 + $0x1a8] sm:$0xff]  ;;  %v117_v46 = vld [vmem:[%s6407_s1 + $0xa0] sm:$0xff]  ;;  %v100_v48 = vld [vmem:[%s6407_s1 + $0x18] sm:$0xff] }
  0x11   :  { %1290 = vmatpush.msra.mxu3 %v154_v27  ;;  %1271 = vmatpush.msra.mxu2 %v137_v29  ;;  %v149_v47 = vld [vmem:[%s6407_s1 + $0x1a0] sm:$0xff]  ;;  %v132_v49 = vld [vmem:[%s6407_s1 + $0x118] sm:$0xff]  ;;  %v99_v52 = vld [vmem:[%s6407_s1 + $0x10] sm:$0xff] }
  0x12   :  { %1251 = vmatpush.msra.mxu1 %v121_v30  ;;  %1232 = vmatpush.msra.mxu0 %v104_v32  ;;  %v116_v50 = vld [vmem:[%s6407_s1 + $0x98] sm:$0xff]  ;;  %v131_v53 = vld [vmem:[%s6407_s1 + $0x110] sm:$0xff]  ;;  %v98_v56 = vld [vmem:[%s6407_s1 + $0x8] sm:$0xff] }
  0x13   :  { %1291 = vmatpush.msra.mxu3 %v153_v31  ;;  %1272 = vmatpush.msra.mxu2 %v136_v33  ;;  %v148_v51 = vld [vmem:[%s6407_s1 + $0x198] sm:$0xff]  ;;  %v115_v54 = vld [vmem:[%s6407_s1 + $0x90] sm:$0xff]  ;;  %v130_v57 = vld [vmem:[%s6407_s1 + $0x108] sm:$0xff] }
  0x14   :  { %1252 = vmatpush.msra.mxu1 %v120_v34  ;;  %1233 = vmatpush.msra.mxu0 %v103_v36  ;;  %v147_v55 = vld [vmem:[%s6407_s1 + $0x190] sm:$0xff]  ;;  %v114_v58 = vld [vmem:[%s6407_s1 + $0x88] sm:$0xff]  ;;  %v97_v60 = vld [vmem:[%s6407_s1] sm:$0xff] }
  0x15   :  { %1292 = vmatpush.msra.mxu3 %v152_v35  ;;  %1273 = vmatpush.msra.mxu2 %v135_v37  ;;  %v146_v59 = vld [vmem:[%s6407_s1 + $0x188] sm:$0xff]  ;;  %v129_v61 = vld [vmem:[%s6407_s1 + $0x100] sm:$0xff]  ;;  %v176_v62 = vld [vmem:[%s6407_s1 + $0x278] sm:$0xff] }
  0x16   :  { %1253 = vmatpush.msra.mxu1 %v119_v38  ;;  %1234 = vmatpush.msra.mxu0 %v102_v40  ;;  %v208_v63 = vld [vmem:[%s6407_s1 + $0x378] sm:$0xff]  ;;  %v113_v0 = vld [vmem:[%s6407_s1 + $0x80] sm:$0xff]  ;;  %v175_v2 = vld [vmem:[%s6407_s1 + $0x270] sm:$0xff] }
  0x17   :  { %1293 = vmatpush.msra.mxu3 %v151_v39  ;;  %1274 = vmatpush.msra.mxu2 %v134_v41  ;;  %v145_v1 = vld [vmem:[%s6407_s1 + $0x180] sm:$0xff]  ;;  %v192_v3 = vld [vmem:[%s6407_s1 + $0x2f8] sm:$0xff]  ;;  %v207_v4 = vld [vmem:[%s6407_s1 + $0x370] sm:$0xff] }
  0x18   :  { %1254 = vmatpush.msra.mxu1 %v118_v42  ;;  %1235 = vmatpush.msra.mxu0 %v101_v44  ;;  %v224_v5 = vld [vmem:[%s6407_s1 + $0x3f8] sm:$0xff]  ;;  %v174_v6 = vld [vmem:[%s6407_s1 + $0x268] sm:$0xff]  ;;  %v191_v7 = vld [vmem:[%s6407_s1 + $0x2f0] sm:$0xff] }
  0x19   :  { %1294 = vmatpush.msra.mxu3 %v150_v43  ;;  %1275 = vmatpush.msra.mxu2 %v133_v45  ;;  %v206_v8 = vld [vmem:[%s6407_s1 + $0x368] sm:$0xff]  ;;  %v223_v9 = vld [vmem:[%s6407_s1 + $0x3f0] sm:$0xff]  ;;  %v173_v10 = vld [vmem:[%s6407_s1 + $0x260] sm:$0xff] }
  0x1a   :  { %1255 = vmatpush.msra.mxu1 %v117_v46  ;;  %1236 = vmatpush.msra.mxu0 %v100_v48  ;;  %v190_v11 = vld [vmem:[%s6407_s1 + $0x2e8] sm:$0xff]  ;;  %v205_v12 = vld [vmem:[%s6407_s1 + $0x360] sm:$0xff]  ;;  %v172_v14 = vld [vmem:[%s6407_s1 + $0x258] sm:$0xff] }
  0x1b   :  { %1295 = vmatpush.msra.mxu3 %v149_v47  ;;  %1276 = vmatpush.msra.mxu2 %v132_v49  ;;  %v222_v13 = vld [vmem:[%s6407_s1 + $0x3e8] sm:$0xff]  ;;  %v189_v15 = vld [vmem:[%s6407_s1 + $0x2e0] sm:$0xff]  ;;  %v204_v16 = vld [vmem:[%s6407_s1 + $0x358] sm:$0xff] }
  0x1c   :  { %1256 = vmatpush.msra.mxu1 %v116_v50  ;;  %1237 = vmatpush.msra.mxu0 %v99_v52  ;;  %v221_v17 = vld [vmem:[%s6407_s1 + $0x3e0] sm:$0xff]  ;;  %v171_v18 = vld [vmem:[%s6407_s1 + $0x250] sm:$0xff]  ;;  %v188_v19 = vld [vmem:[%s6407_s1 + $0x2d8] sm:$0xff] }
  0x1d   :  { %1296 = vmatpush.msra.mxu3 %v148_v51  ;;  %1277 = vmatpush.msra.mxu2 %v131_v53  ;;  %v203_v20 = vld [vmem:[%s6407_s1 + $0x350] sm:$0xff]  ;;  %v220_v21 = vld [vmem:[%s6407_s1 + $0x3d8] sm:$0xff]  ;;  %v170_v22 = vld [vmem:[%s6407_s1 + $0x248] sm:$0xff] }
  0x1e   :  { %1257 = vmatpush.msra.mxu1 %v115_v54  ;;  %1238 = vmatpush.msra.mxu0 %v98_v56  ;;  %v187_v23 = vld [vmem:[%s6407_s1 + $0x2d0] sm:$0xff]  ;;  %v202_v24 = vld [vmem:[%s6407_s1 + $0x348] sm:$0xff]  ;;  %v169_v26 = vld [vmem:[%s6407_s1 + $0x240] sm:$0xff] }
  0x1f   :  { %1297 = vmatpush.msra.mxu3 %v147_v55  ;;  %1278 = vmatpush.msra.mxu2 %v130_v57  ;;  %v219_v25 = vld [vmem:[%s6407_s1 + $0x3d0] sm:$0xff]  ;;  %v186_v27 = vld [vmem:[%s6407_s1 + $0x2c8] sm:$0xff]  ;;  %v201_v28 = vld [vmem:[%s6407_s1 + $0x340] sm:$0xff] }
  0x20   :  { %1258 = vmatpush.msra.mxu1 %v114_v58  ;;  %1239 = vmatpush.msra.mxu0 %v97_v60  ;;  %v218_v29 = vld [vmem:[%s6407_s1 + $0x3c8] sm:$0xff]  ;;  %v168_v30 = vld [vmem:[%s6407_s1 + $0x238] sm:$0xff]  ;;  %v185_v31 = vld [vmem:[%s6407_s1 + $0x2c0] sm:$0xff] }
  0x21   :  { %1298 = vmatpush.msra.mxu3 %v146_v59  ;;  %1279 = vmatpush.msra.mxu2 %v129_v61  ;;  %v200_v32 = vld [vmem:[%s6407_s1 + $0x338] sm:$0xff]  ;;  %v217_v33 = vld [vmem:[%s6407_s1 + $0x3c0] sm:$0xff]  ;;  %v167_v34 = vld [vmem:[%s6407_s1 + $0x230] sm:$0xff] }
  0x22   :  { %1304 = vmatpush.msrb.mxu0 %v176_v62  ;;  %1259 = vmatpush.msra.mxu1 %v113_v0  ;;  %v184_v35 = vld [vmem:[%s6407_s1 + $0x2b8] sm:$0xff]  ;;  %v199_v36 = vld [vmem:[%s6407_s1 + $0x330] sm:$0xff]  ;;  %v166_v38 = vld [vmem:[%s6407_s1 + $0x228] sm:$0xff] }
  0x23   :  { %1344 = vmatpush.msrb.mxu2 %v208_v63  ;;  %1299 = vmatpush.msra.mxu3 %v145_v1  ;;  %v216_v37 = vld [vmem:[%s6407_s1 + $0x3b8] sm:$0xff]  ;;  %v183_v39 = vld [vmem:[%s6407_s1 + $0x2b0] sm:$0xff]  ;;  %v198_v40 = vld [vmem:[%s6407_s1 + $0x328] sm:$0xff] }
  0x24   :  { %1305 = vmatpush.msrb.mxu0 %v175_v2  ;;  %1324 = vmatpush.msrb.mxu1 %v192_v3  ;;  %v215_v41 = vld [vmem:[%s6407_s1 + $0x3b0] sm:$0xff]  ;;  %v165_v42 = vld [vmem:[%s6407_s1 + $0x220] sm:$0xff]  ;;  %v182_v43 = vld [vmem:[%s6407_s1 + $0x2a8] sm:$0xff] }
  0x25   :  { %1345 = vmatpush.msrb.mxu2 %v207_v4  ;;  %1364 = vmatpush.msrb.mxu3 %v224_v5  ;;  %v197_v44 = vld [vmem:[%s6407_s1 + $0x320] sm:$0xff]  ;;  %v214_v45 = vld [vmem:[%s6407_s1 + $0x3a8] sm:$0xff]  ;;  %v164_v46 = vld [vmem:[%s6407_s1 + $0x218] sm:$0xff] }
  0x26   :  { %1306 = vmatpush.msrb.mxu0 %v174_v6  ;;  %1325 = vmatpush.msrb.mxu1 %v191_v7  ;;  %v181_v47 = vld [vmem:[%s6407_s1 + $0x2a0] sm:$0xff]  ;;  %v196_v48 = vld [vmem:[%s6407_s1 + $0x318] sm:$0xff]  ;;  %v163_v50 = vld [vmem:[%s6407_s1 + $0x210] sm:$0xff] }
  0x27   :  { %1346 = vmatpush.msrb.mxu2 %v206_v8  ;;  %1365 = vmatpush.msrb.mxu3 %v223_v9  ;;  %v213_v49 = vld [vmem:[%s6407_s1 + $0x3a0] sm:$0xff]  ;;  %v180_v51 = vld [vmem:[%s6407_s1 + $0x298] sm:$0xff]  ;;  %v195_v52 = vld [vmem:[%s6407_s1 + $0x310] sm:$0xff] }
  0x28   :  { %1307 = vmatpush.msrb.mxu0 %v173_v10  ;;  %1326 = vmatpush.msrb.mxu1 %v190_v11  ;;  %v212_v53 = vld [vmem:[%s6407_s1 + $0x398] sm:$0xff]  ;;  %v162_v54 = vld [vmem:[%s6407_s1 + $0x208] sm:$0xff]  ;;  %v179_v55 = vld [vmem:[%s6407_s1 + $0x290] sm:$0xff] }
  0x29   :  { %1347 = vmatpush.msrb.mxu2 %v205_v12  ;;  %1366 = vmatpush.msrb.mxu3 %v222_v13  ;;  %v194_v56 = vld [vmem:[%s6407_s1 + $0x308] sm:$0xff]  ;;  %v211_v57 = vld [vmem:[%s6407_s1 + $0x390] sm:$0xff]  ;;  %v161_v59 = vld [vmem:[%s6407_s1 + $0x200] sm:$0xff] }
  0x2a   :  { %1308 = vmatpush.msrb.mxu0 %v172_v14  ;;  %1327 = vmatpush.msrb.mxu1 %v189_v15  ;;  %v29_v58 = vld [vmem:[%s6406_s0 + $0x10] sm:$0xff]  ;;  %v178_v60 = vld [vmem:[%s6407_s1 + $0x288] sm:$0xff]  ;;  %v193_v61 = vld [vmem:[%s6407_s1 + $0x300] sm:$0xff] }
  0x2b   :  { %1348 = vmatpush.msrb.mxu2 %v204_v16  ;;  %1367 = vmatpush.msrb.mxu3 %v221_v17  ;;  %v210_v62 = vld [vmem:[%s6407_s1 + $0x388] sm:$0xff]  ;;  %v27_v63 = vld [vmem:[%s6406_s0] sm:$0xff]  ;;  %v30_v0 = vld [vmem:[%s6406_s0 + $0x18] sm:$0xff] }
  0x2c   :  { %1309 = vmatpush.msrb.mxu0 %v171_v18  ;;  %1328 = vmatpush.msrb.mxu1 %v188_v19  ;;  %v240_v1 = vld [vmem:[%s6407_s1 + $0x478] sm:$0xff]  ;;  %v177_v3 = vld [vmem:[%s6407_s1 + $0x280] sm:$0xff]  ;;  %v28_v5 = vld [vmem:[%s6406_s0 + $0x8] sm:$0xff] }
  0x2d   :  { %1349 = vmatpush.msrb.mxu2 %v203_v20  ;;  %1368 = vmatpush.msrb.mxu3 %v220_v21  ;;  %v272_v2 = vld [vmem:[%s6407_s1 + $0x578] sm:$0xff]  ;;  %v209_v4 = vld [vmem:[%s6407_s1 + $0x380] sm:$0xff]  ;;  %v239_v6 = vld [vmem:[%s6407_s1 + $0x470] sm:$0xff] }
  0x2e   :  { %1310 = vmatpush.msrb.mxu0 %v170_v22  ;;  %1329 = vmatpush.msrb.mxu1 %v187_v23  ;;  %v256_v7 = vld [vmem:[%s6407_s1 + $0x4f8] sm:$0xff]  ;;  %v271_v8 = vld [vmem:[%s6407_s1 + $0x570] sm:$0xff]  ;;  %v238_v10 = vld [vmem:[%s6407_s1 + $0x468] sm:$0xff] }
  0x2f   :  { %1350 = vmatpush.msrb.mxu2 %v202_v24  ;;  %1369 = vmatpush.msrb.mxu3 %v219_v25  ;;  %v288_v9 = vld [vmem:[%s6407_s1 + $0x5f8] sm:$0xff]  ;;  %v255_v11 = vld [vmem:[%s6407_s1 + $0x4f0] sm:$0xff]  ;;  %v270_v12 = vld [vmem:[%s6407_s1 + $0x568] sm:$0xff] }
  0x30   :  { %1311 = vmatpush.msrb.mxu0 %v169_v26  ;;  %1330 = vmatpush.msrb.mxu1 %v186_v27  ;;  %v287_v13 = vld [vmem:[%s6407_s1 + $0x5f0] sm:$0xff] }
  0x31   :  { %1351 = vmatpush.msrb.mxu2 %v201_v28  ;;  %1370 = vmatpush.msrb.mxu3 %v218_v29 }
  0x32   :  { %1312 = vmatpush.msrb.mxu0 %v168_v30  ;;  %1331 = vmatpush.msrb.mxu1 %v185_v31 }
  0x33   :  { %1352 = vmatpush.msrb.mxu2 %v200_v32  ;;  %1371 = vmatpush.msrb.mxu3 %v217_v33 }
  0x34   :  { %1313 = vmatpush.msrb.mxu0 %v167_v34  ;;  %1332 = vmatpush.msrb.mxu1 %v184_v35 }
  0x35   :  { %1353 = vmatpush.msrb.mxu2 %v199_v36  ;;  %1372 = vmatpush.msrb.mxu3 %v216_v37 }
  0x36   :  { %1314 = vmatpush.msrb.mxu0 %v166_v38  ;;  %1333 = vmatpush.msrb.mxu1 %v183_v39 }
  0x37   :  { %1354 = vmatpush.msrb.mxu2 %v198_v40  ;;  %1373 = vmatpush.msrb.mxu3 %v215_v41 }
  0x38   :  { %1315 = vmatpush.msrb.mxu0 %v165_v42  ;;  %1334 = vmatpush.msrb.mxu1 %v182_v43 }
  0x39   :  { %1355 = vmatpush.msrb.mxu2 %v197_v44  ;;  %1374 = vmatpush.msrb.mxu3 %v214_v45 }
  0x3a   :  { %1316 = vmatpush.msrb.mxu0 %v164_v46  ;;  %1335 = vmatpush.msrb.mxu1 %v181_v47 }
  0x3b   :  { %1356 = vmatpush.msrb.mxu2 %v196_v48  ;;  %1375 = vmatpush.msrb.mxu3 %v213_v49 }
  0x3c   :  { %1317 = vmatpush.msrb.mxu0 %v163_v50  ;;  %1336 = vmatpush.msrb.mxu1 %v180_v51 }
  0x3d   :  { %1357 = vmatpush.msrb.mxu2 %v195_v52  ;;  %1376 = vmatpush.msrb.mxu3 %v212_v53 }
  0x3e   :  { %1318 = vmatpush.msrb.mxu0 %v162_v54  ;;  %1337 = vmatpush.msrb.mxu1 %v179_v55 }
  0x3f   :  { %1358 = vmatpush.msrb.mxu2 %v194_v56  ;;  %1377 = vmatpush.msrb.mxu3 %v211_v57 }
  0x40   :  { %1280 = vmatmul.f32.vlgmr.msra.gmra.mxu2 %v29_v58  ;;  %1319 = vmatpush.msrb.mxu0 %v161_v59 }
  0x41   :  { %1338 = vmatpush.msrb.mxu1 %v178_v60  ;;  %1359 = vmatpush.msrb.mxu2 %v193_v61 }
  0x42   :  { %1378 = vmatpush.msrb.mxu3 %v210_v62  ;;  %1240 = vmatmul.f32.vlgmr.msra.gmra.mxu0 %v27_v63 }
  0x43   :  { %1300 = vmatmul.f32.vlgmr.msra.gmra.mxu3 %v30_v0  ;;  %1384 = vmatpush.msra.mxu0 %v240_v1 }
  0x44   :  { %1424 = vmatpush.msra.mxu2 %v272_v2  ;;  %1339 = vmatpush.msrb.mxu1 %v177_v3 }
  0x45   :  { %1379 = vmatpush.msrb.mxu3 %v209_v4  ;;  %1260 = vmatmul.f32.vlgmr.msra.gmra.mxu1 %v28_v5 }
  0x46   :  { %1385 = vmatpush.msra.mxu0 %v239_v6  ;;  %1404 = vmatpush.msra.mxu1 %v256_v7 }
  0x47   :  { %12 = vsyncpa [#allocation3], 0  ;;  %1425 = vmatpush.msra.mxu2 %v271_v8  ;;  %1444 = vmatpush.msra.mxu3 %v288_v9  ;;  %v33_v14 = vld [vmem:[%s6406_s0 + $0x30] sm:$0xff]  ;;  %v237_v15 = vld [vmem:[%s6407_s1 + $0x460] sm:$0xff]  ;;  %vm1220_vm0 = vcmask 1046528   ;;  %vm1216_vm1 = vcmask 711680  }
  0x48   :  { %1386 = vmatpush.msra.mxu0 %v238_v10  ;;  %1405 = vmatpush.msra.mxu1 %v255_v11  ;;  %v254_v16 = vld [vmem:[%s6407_s1 + $0x4e8] sm:$0xff]  ;;  %v269_v17 = vld [vmem:[%s6407_s1 + $0x560] sm:$0xff]  ;;  %v34_v20 = vld [vmem:[%s6406_s0 + $0x38] sm:$0xff]  ;;  %vm2637_vm2 = vcmask 523264   ;;  %s2750_s22 = smov [#allocation2]   ;;  %vm2698_vm3 = vcmask 261120  }
  0x49   :  { %1426 = vmatpush.msra.mxu2 %v270_v12  ;;  %1445 = vmatpush.msra.mxu3 %v287_v13  ;;  %v286_v18 = vld [vmem:[%s6407_s1 + $0x5e8] sm:$0xff]  ;;  %v31_v19 = vld [vmem:[%s6406_s0 + $0x20] sm:$0xff]  ;;  %v236_v21 = vld [vmem:[%s6407_s1 + $0x458] sm:$0xff]  ;;  %s2705_s23 = sshll.u32 %s2750_s22, 4  ;;  %s2706_s23 = int_to_ptr.vmem [resolvable:$true] %s2705_s23 }
  0x4a   :  { %1360 = vmatmul.f32.vlgmr.msrb.gmra.mxu2 %v33_v14  ;;  %1387 = vmatpush.msra.mxu0 %v237_v15  ;;  %v253_v22 = vld [vmem:[%s6407_s1 + $0x4e0] sm:$0xff]  ;;  %v268_v23 = vld [vmem:[%s6407_s1 + $0x558] sm:$0xff]  ;;  %v32_v25 = vld [vmem:[%s6406_s0 + $0x28] sm:$0xff] }
  0x4b   :  { %1406 = vmatpush.msra.mxu1 %v254_v16  ;;  %1427 = vmatpush.msra.mxu2 %v269_v17  ;;  %v285_v24 = vld [vmem:[%s6407_s1 + $0x5e0] sm:$0xff]  ;;  %v235_v26 = vld [vmem:[%s6407_s1 + $0x450] sm:$0xff]  ;;  %v252_v27 = vld [vmem:[%s6407_s1 + $0x4d8] sm:$0xff] }
  0x4c   :  { %1446 = vmatpush.msra.mxu3 %v286_v18  ;;  %1320 = vmatmul.f32.vlgmr.msrb.gmra.mxu0 %v31_v19  ;;  %v267_v28 = vld [vmem:[%s6407_s1 + $0x550] sm:$0xff]  ;;  %v284_v29 = vld [vmem:[%s6407_s1 + $0x5d8] sm:$0xff]  ;;  %v234_v30 = vld [vmem:[%s6407_s1 + $0x448] sm:$0xff] }
  0x4d   :  { %1380 = vmatmul.f32.vlgmr.msrb.gmra.mxu3 %v34_v20  ;;  %1388 = vmatpush.msra.mxu0 %v236_v21  ;;  %v251_v31 = vld [vmem:[%s6407_s1 + $0x4d0] sm:$0xff]  ;;  %v266_v32 = vld [vmem:[%s6407_s1 + $0x548] sm:$0xff]  ;;  %v233_v34 = vld [vmem:[%s6407_s1 + $0x440] sm:$0xff] }
  0x4e   :  { %1407 = vmatpush.msra.mxu1 %v253_v22  ;;  %1428 = vmatpush.msra.mxu2 %v268_v23  ;;  %v283_v33 = vld [vmem:[%s6407_s1 + $0x5d0] sm:$0xff]  ;;  %v250_v35 = vld [vmem:[%s6407_s1 + $0x4c8] sm:$0xff]  ;;  %v265_v36 = vld [vmem:[%s6407_s1 + $0x540] sm:$0xff] }
  0x4f   :  { %1447 = vmatpush.msra.mxu3 %v285_v24  ;;  %1340 = vmatmul.f32.vlgmr.msrb.gmra.mxu1 %v32_v25  ;;  %v282_v37 = vld [vmem:[%s6407_s1 + $0x5c8] sm:$0xff]  ;;  %v232_v38 = vld [vmem:[%s6407_s1 + $0x438] sm:$0xff]  ;;  %v249_v39 = vld [vmem:[%s6407_s1 + $0x4c0] sm:$0xff] }
  0x50   :  { %1389 = vmatpush.msra.mxu0 %v235_v26  ;;  %1408 = vmatpush.msra.mxu1 %v252_v27  ;;  %v264_v40 = vld [vmem:[%s6407_s1 + $0x538] sm:$0xff]  ;;  %v281_v41 = vld [vmem:[%s6407_s1 + $0x5c0] sm:$0xff]  ;;  %v231_v42 = vld [vmem:[%s6407_s1 + $0x430] sm:$0xff] }
  0x51   :  { %1429 = vmatpush.msra.mxu2 %v267_v28  ;;  %1448 = vmatpush.msra.mxu3 %v284_v29  ;;  %v248_v43 = vld [vmem:[%s6407_s1 + $0x4b8] sm:$0xff]  ;;  %v263_v44 = vld [vmem:[%s6407_s1 + $0x530] sm:$0xff]  ;;  %v230_v46 = vld [vmem:[%s6407_s1 + $0x428] sm:$0xff] }
  0x52   :  { %1390 = vmatpush.msra.mxu0 %v234_v30  ;;  %1409 = vmatpush.msra.mxu1 %v251_v31  ;;  %v280_v45 = vld [vmem:[%s6407_s1 + $0x5b8] sm:$0xff]  ;;  %v247_v47 = vld [vmem:[%s6407_s1 + $0x4b0] sm:$0xff]  ;;  %v262_v48 = vld [vmem:[%s6407_s1 + $0x528] sm:$0xff] }
  0x53   :  { %1430 = vmatpush.msra.mxu2 %v266_v32  ;;  %1449 = vmatpush.msra.mxu3 %v283_v33  ;;  %v279_v49 = vld [vmem:[%s6407_s1 + $0x5b0] sm:$0xff]  ;;  %v229_v50 = vld [vmem:[%s6407_s1 + $0x420] sm:$0xff]  ;;  %v246_v51 = vld [vmem:[%s6407_s1 + $0x4a8] sm:$0xff] }
  0x54   :  { %1391 = vmatpush.msra.mxu0 %v233_v34  ;;  %1410 = vmatpush.msra.mxu1 %v250_v35  ;;  %v261_v52 = vld [vmem:[%s6407_s1 + $0x520] sm:$0xff]  ;;  %v278_v53 = vld [vmem:[%s6407_s1 + $0x5a8] sm:$0xff]  ;;  %v228_v54 = vld [vmem:[%s6407_s1 + $0x418] sm:$0xff] }
  0x55   :  { %1431 = vmatpush.msra.mxu2 %v265_v36  ;;  %1450 = vmatpush.msra.mxu3 %v282_v37  ;;  %v245_v55 = vld [vmem:[%s6407_s1 + $0x4a0] sm:$0xff]  ;;  %v260_v56 = vld [vmem:[%s6407_s1 + $0x518] sm:$0xff]  ;;  %v227_v58 = vld [vmem:[%s6407_s1 + $0x410] sm:$0xff] }
  0x56   :  { %1392 = vmatpush.msra.mxu0 %v232_v38  ;;  %1411 = vmatpush.msra.mxu1 %v249_v39  ;;  %v277_v57 = vld [vmem:[%s6407_s1 + $0x5a0] sm:$0xff]  ;;  %v244_v59 = vld [vmem:[%s6407_s1 + $0x498] sm:$0xff]  ;;  %v259_v60 = vld [vmem:[%s6407_s1 + $0x510] sm:$0xff] }
  0x57   :  { %1432 = vmatpush.msra.mxu2 %v264_v40  ;;  %1451 = vmatpush.msra.mxu3 %v281_v41  ;;  %v276_v61 = vld [vmem:[%s6407_s1 + $0x598] sm:$0xff]  ;;  %v226_v62 = vld [vmem:[%s6407_s1 + $0x408] sm:$0xff]  ;;  %v243_v63 = vld [vmem:[%s6407_s1 + $0x490] sm:$0xff] }
  0x58   :  { %1393 = vmatpush.msra.mxu0 %v231_v42  ;;  %1412 = vmatpush.msra.mxu1 %v248_v43  ;;  %v258_v0 = vld [vmem:[%s6407_s1 + $0x508] sm:$0xff]  ;;  %v275_v1 = vld [vmem:[%s6407_s1 + $0x590] sm:$0xff]  ;;  %v225_v2 = vld [vmem:[%s6407_s1 + $0x400] sm:$0xff] }
  0x59   :  { %1433 = vmatpush.msra.mxu2 %v263_v44  ;;  %1452 = vmatpush.msra.mxu3 %v280_v45  ;;  %v242_v3 = vld [vmem:[%s6407_s1 + $0x488] sm:$0xff]  ;;  %v257_v4 = vld [vmem:[%s6407_s1 + $0x500] sm:$0xff]  ;;  %v37_v7 = vld [vmem:[%s6406_s0 + $0x50] sm:$0xff] }
  0x5a   :  { %1394 = vmatpush.msra.mxu0 %v230_v46  ;;  %1413 = vmatpush.msra.mxu1 %v247_v47  ;;  %v274_v5 = vld [vmem:[%s6407_s1 + $0x588] sm:$0xff]  ;;  %v35_v6 = vld [vmem:[%s6406_s0 + $0x40] sm:$0xff]  ;;  %v304_v8 = vld [vmem:[%s6407_s1 + $0x678] sm:$0xff] }
  0x5b   :  { %1434 = vmatpush.msra.mxu2 %v262_v48  ;;  %1453 = vmatpush.msra.mxu3 %v279_v49  ;;  %v336_v9 = vld [vmem:[%s6407_s1 + $0x778] sm:$0xff]  ;;  %v241_v10 = vld [vmem:[%s6407_s1 + $0x480] sm:$0xff]  ;;  %v36_v12 = vld [vmem:[%s6406_s0 + $0x48] sm:$0xff] }
  0x5c   :  { %1395 = vmatpush.msra.mxu0 %v229_v50  ;;  %1414 = vmatpush.msra.mxu1 %v246_v51  ;;  %v273_v11 = vld [vmem:[%s6407_s1 + $0x580] sm:$0xff]  ;;  %v38_v13 = vld [vmem:[%s6406_s0 + $0x58] sm:$0xff]  ;;  %v303_v14 = vld [vmem:[%s6407_s1 + $0x670] sm:$0xff] }
  0x5d   :  { %1435 = vmatpush.msra.mxu2 %v261_v52  ;;  %1454 = vmatpush.msra.mxu3 %v278_v53  ;;  %v320_v15 = vld [vmem:[%s6407_s1 + $0x6f8] sm:$0xff]  ;;  %v335_v16 = vld [vmem:[%s6407_s1 + $0x770] sm:$0xff]  ;;  %v302_v18 = vld [vmem:[%s6407_s1 + $0x668] sm:$0xff] }
  0x5e   :  { %1396 = vmatpush.msra.mxu0 %v228_v54  ;;  %1415 = vmatpush.msra.mxu1 %v245_v55  ;;  %v352_v17 = vld [vmem:[%s6407_s1 + $0x7f8] sm:$0xff]  ;;  %v319_v19 = vld [vmem:[%s6407_s1 + $0x6f0] sm:$0xff]  ;;  %v334_v20 = vld [vmem:[%s6407_s1 + $0x768] sm:$0xff] }
  0x5f   :  { %1436 = vmatpush.msra.mxu2 %v260_v56  ;;  %1455 = vmatpush.msra.mxu3 %v277_v57  ;;  %v351_v21 = vld [vmem:[%s6407_s1 + $0x7f0] sm:$0xff]  ;;  %v301_v22 = vld [vmem:[%s6407_s1 + $0x660] sm:$0xff]  ;;  %v318_v23 = vld [vmem:[%s6407_s1 + $0x6e8] sm:$0xff] }
  0x60   :  { %1397 = vmatpush.msra.mxu0 %v227_v58  ;;  %1416 = vmatpush.msra.mxu1 %v244_v59  ;;  %v333_v24 = vld [vmem:[%s6407_s1 + $0x760] sm:$0xff]  ;;  %v350_v25 = vld [vmem:[%s6407_s1 + $0x7e8] sm:$0xff]  ;;  %v300_v26 = vld [vmem:[%s6407_s1 + $0x658] sm:$0xff] }
  0x61   :  { %1437 = vmatpush.msra.mxu2 %v259_v60  ;;  %1456 = vmatpush.msra.mxu3 %v276_v61  ;;  %v317_v27 = vld [vmem:[%s6407_s1 + $0x6e0] sm:$0xff]  ;;  %v332_v28 = vld [vmem:[%s6407_s1 + $0x758] sm:$0xff]  ;;  %v299_v30 = vld [vmem:[%s6407_s1 + $0x650] sm:$0xff] }
  0x62   :  { %1398 = vmatpush.msra.mxu0 %v226_v62  ;;  %1417 = vmatpush.msra.mxu1 %v243_v63  ;;  %v349_v29 = vld [vmem:[%s6407_s1 + $0x7e0] sm:$0xff]  ;;  %v316_v31 = vld [vmem:[%s6407_s1 + $0x6d8] sm:$0xff]  ;;  %v331_v32 = vld [vmem:[%s6407_s1 + $0x750] sm:$0xff] }
  0x63   :  { %1438 = vmatpush.msra.mxu2 %v258_v0  ;;  %1457 = vmatpush.msra.mxu3 %v275_v1  ;;  %v348_v33 = vld [vmem:[%s6407_s1 + $0x7d8] sm:$0xff]  ;;  %v298_v34 = vld [vmem:[%s6407_s1 + $0x648] sm:$0xff]  ;;  %v315_v35 = vld [vmem:[%s6407_s1 + $0x6d0] sm:$0xff] }
  0x64   :  { %1399 = vmatpush.msra.mxu0 %v225_v2  ;;  %1418 = vmatpush.msra.mxu1 %v242_v3  ;;  %v330_v36 = vld [vmem:[%s6407_s1 + $0x748] sm:$0xff]  ;;  %v347_v37 = vld [vmem:[%s6407_s1 + $0x7d0] sm:$0xff]  ;;  %v297_v38 = vld [vmem:[%s6407_s1 + $0x640] sm:$0xff] }
  0x65   :  { %1439 = vmatpush.msra.mxu2 %v257_v4  ;;  %1458 = vmatpush.msra.mxu3 %v274_v5  ;;  %v314_v39 = vld [vmem:[%s6407_s1 + $0x6c8] sm:$0xff]  ;;  %v329_v40 = vld [vmem:[%s6407_s1 + $0x740] sm:$0xff]  ;;  %v296_v42 = vld [vmem:[%s6407_s1 + $0x638] sm:$0xff] }
  0x66   :  { %1400 = vmatmul.f32.vlgmr.msra.gmra.mxu0 %v35_v6  ;;  %1440 = vmatmul.f32.vlgmr.msra.gmra.mxu2 %v37_v7  ;;  %v346_v41 = vld [vmem:[%s6407_s1 + $0x7c8] sm:$0xff]  ;;  %v313_v43 = vld [vmem:[%s6407_s1 + $0x6c0] sm:$0xff]  ;;  %v328_v44 = vld [vmem:[%s6407_s1 + $0x738] sm:$0xff] }
  0x67   :  { %1464 = vmatpush.msrb.mxu0 %v304_v8  ;;  %1504 = vmatpush.msrb.mxu2 %v336_v9  ;;  %v345_v45 = vld [vmem:[%s6407_s1 + $0x7c0] sm:$0xff]  ;;  %v295_v46 = vld [vmem:[%s6407_s1 + $0x630] sm:$0xff]  ;;  %v312_v47 = vld [vmem:[%s6407_s1 + $0x6b8] sm:$0xff] }
  0x68   :  { %1419 = vmatpush.msra.mxu1 %v241_v10  ;;  %1459 = vmatpush.msra.mxu3 %v273_v11  ;;  %v327_v48 = vld [vmem:[%s6407_s1 + $0x730] sm:$0xff]  ;;  %v344_v49 = vld [vmem:[%s6407_s1 + $0x7b8] sm:$0xff]  ;;  %v294_v50 = vld [vmem:[%s6407_s1 + $0x628] sm:$0xff] }
  0x69   :  { %1420 = vmatmul.f32.vlgmr.msra.gmra.mxu1 %v36_v12  ;;  %1460 = vmatmul.f32.vlgmr.msra.gmra.mxu3 %v38_v13  ;;  %v311_v51 = vld [vmem:[%s6407_s1 + $0x6b0] sm:$0xff]  ;;  %v326_v52 = vld [vmem:[%s6407_s1 + $0x728] sm:$0xff]  ;;  %v293_v54 = vld [vmem:[%s6407_s1 + $0x620] sm:$0xff] }
  0x6a   :  { %1465 = vmatpush.msrb.mxu0 %v303_v14  ;;  %1484 = vmatpush.msrb.mxu1 %v320_v15  ;;  %v343_v53 = vld [vmem:[%s6407_s1 + $0x7b0] sm:$0xff]  ;;  %v310_v55 = vld [vmem:[%s6407_s1 + $0x6a8] sm:$0xff]  ;;  %v325_v56 = vld [vmem:[%s6407_s1 + $0x720] sm:$0xff] }
  0x6b   :  { %1505 = vmatpush.msrb.mxu2 %v335_v16  ;;  %1524 = vmatpush.msrb.mxu3 %v352_v17  ;;  %v342_v57 = vld [vmem:[%s6407_s1 + $0x7a8] sm:$0xff]  ;;  %v292_v58 = vld [vmem:[%s6407_s1 + $0x618] sm:$0xff]  ;;  %v309_v59 = vld [vmem:[%s6407_s1 + $0x6a0] sm:$0xff] }
  0x6c   :  { %1466 = vmatpush.msrb.mxu0 %v302_v18  ;;  %1485 = vmatpush.msrb.mxu1 %v319_v19  ;;  %v324_v60 = vld [vmem:[%s6407_s1 + $0x718] sm:$0xff]  ;;  %v341_v61 = vld [vmem:[%s6407_s1 + $0x7a0] sm:$0xff]  ;;  %v291_v62 = vld [vmem:[%s6407_s1 + $0x610] sm:$0xff] }
  0x6d   :  { %1506 = vmatpush.msrb.mxu2 %v334_v20  ;;  %1525 = vmatpush.msrb.mxu3 %v351_v21  ;;  %v308_v63 = vld [vmem:[%s6407_s1 + $0x698] sm:$0xff]  ;;  %v323_v0 = vld [vmem:[%s6407_s1 + $0x710] sm:$0xff]  ;;  %v290_v2 = vld [vmem:[%s6407_s1 + $0x608] sm:$0xff] }
  0x6e   :  { %1467 = vmatpush.msrb.mxu0 %v301_v22  ;;  %1486 = vmatpush.msrb.mxu1 %v318_v23  ;;  %v340_v1 = vld [vmem:[%s6407_s1 + $0x798] sm:$0xff]  ;;  %v307_v3 = vld [vmem:[%s6407_s1 + $0x690] sm:$0xff]  ;;  %v322_v4 = vld [vmem:[%s6407_s1 + $0x708] sm:$0xff] }
  0x6f   :  { %1507 = vmatpush.msrb.mxu2 %v333_v24  ;;  %1526 = vmatpush.msrb.mxu3 %v350_v25  ;;  %v339_v5 = vld [vmem:[%s6407_s1 + $0x790] sm:$0xff]  ;;  %v289_v6 = vld [vmem:[%s6407_s1 + $0x600] sm:$0xff]  ;;  %v306_v7 = vld [vmem:[%s6407_s1 + $0x688] sm:$0xff] }
  0x70   :  { %1468 = vmatpush.msrb.mxu0 %v300_v26  ;;  %1487 = vmatpush.msrb.mxu1 %v317_v27  ;;  %v321_v8 = vld [vmem:[%s6407_s1 + $0x700] sm:$0xff]  ;;  %v338_v9 = vld [vmem:[%s6407_s1 + $0x788] sm:$0xff]  ;;  %v41_v11 = vld [vmem:[%s6406_s0 + $0x70] sm:$0xff] }
  0x71   :  { %1508 = vmatpush.msrb.mxu2 %v332_v28  ;;  %1527 = vmatpush.msrb.mxu3 %v349_v29  ;;  %v39_v10 = vld [vmem:[%s6406_s0 + $0x60] sm:$0xff]  ;;  %v368_v12 = vld [vmem:[%s6407_s1 + $0x878] sm:$0xff]  ;;  %v40_v16 = vld [vmem:[%s6406_s0 + $0x68] sm:$0xff] }
  0x72   :  { %1469 = vmatpush.msrb.mxu0 %v299_v30  ;;  %1488 = vmatpush.msrb.mxu1 %v316_v31  ;;  %v400_v13 = vld [vmem:[%s6407_s1 + $0x978] sm:$0xff]  ;;  %v305_v14 = vld [vmem:[%s6407_s1 + $0x680] sm:$0xff]  ;;  %v367_v18 = vld [vmem:[%s6407_s1 + $0x870] sm:$0xff] }
  0x73   :  { %1509 = vmatpush.msrb.mxu2 %v331_v32  ;;  %1528 = vmatpush.msrb.mxu3 %v348_v33  ;;  %v337_v15 = vld [vmem:[%s6407_s1 + $0x780] sm:$0xff]  ;;  %v42_v17 = vld [vmem:[%s6406_s0 + $0x78] sm:$0xff]  ;;  %v399_v20 = vld [vmem:[%s6407_s1 + $0x970] sm:$0xff] }
  0x74   :  { %1470 = vmatpush.msrb.mxu0 %v298_v34  ;;  %1489 = vmatpush.msrb.mxu1 %v315_v35  ;;  %v384_v19 = vld [vmem:[%s6407_s1 + $0x8f8] sm:$0xff]  ;;  %v366_v22 = vld [vmem:[%s6407_s1 + $0x868] sm:$0xff]  ;;  %v383_v23 = vld [vmem:[%s6407_s1 + $0x8f0] sm:$0xff] }
  0x75   :  { %1510 = vmatpush.msrb.mxu2 %v330_v36  ;;  %1529 = vmatpush.msrb.mxu3 %v347_v37  ;;  %v416_v21 = vld [vmem:[%s6407_s1 + $0x9f8] sm:$0xff]  ;;  %v398_v24 = vld [vmem:[%s6407_s1 + $0x968] sm:$0xff]  ;;  %v415_v25 = vld [vmem:[%s6407_s1 + $0x9f0] sm:$0xff] }
  0x76   :  { %1471 = vmatpush.msrb.mxu0 %v297_v38  ;;  %1490 = vmatpush.msrb.mxu1 %v314_v39  ;;  %v365_v26 = vld [vmem:[%s6407_s1 + $0x860] sm:$0xff]  ;;  %v382_v27 = vld [vmem:[%s6407_s1 + $0x8e8] sm:$0xff]  ;;  %v364_v30 = vld [vmem:[%s6407_s1 + $0x858] sm:$0xff] }
  0x77   :  { %1511 = vmatpush.msrb.mxu2 %v329_v40  ;;  %1530 = vmatpush.msrb.mxu3 %v346_v41  ;;  %v397_v28 = vld [vmem:[%s6407_s1 + $0x960] sm:$0xff]  ;;  %v414_v29 = vld [vmem:[%s6407_s1 + $0x9e8] sm:$0xff]  ;;  %v396_v32 = vld [vmem:[%s6407_s1 + $0x958] sm:$0xff] }
  0x78   :  { %1472 = vmatpush.msrb.mxu0 %v296_v42  ;;  %1491 = vmatpush.msrb.mxu1 %v313_v43  ;;  %v381_v31 = vld [vmem:[%s6407_s1 + $0x8e0] sm:$0xff]  ;;  %v363_v34 = vld [vmem:[%s6407_s1 + $0x850] sm:$0xff]  ;;  %v380_v35 = vld [vmem:[%s6407_s1 + $0x8d8] sm:$0xff] }
  0x79   :  { %1512 = vmatpush.msrb.mxu2 %v328_v44  ;;  %1531 = vmatpush.msrb.mxu3 %v345_v45  ;;  %v413_v33 = vld [vmem:[%s6407_s1 + $0x9e0] sm:$0xff]  ;;  %v395_v36 = vld [vmem:[%s6407_s1 + $0x950] sm:$0xff]  ;;  %v412_v37 = vld [vmem:[%s6407_s1 + $0x9d8] sm:$0xff] }
  0x7a   :  { %1473 = vmatpush.msrb.mxu0 %v295_v46  ;;  %1492 = vmatpush.msrb.mxu1 %v312_v47  ;;  %v362_v38 = vld [vmem:[%s6407_s1 + $0x848] sm:$0xff]  ;;  %v379_v39 = vld [vmem:[%s6407_s1 + $0x8d0] sm:$0xff]  ;;  %v361_v42 = vld [vmem:[%s6407_s1 + $0x840] sm:$0xff] }
  0x7b   :  { %1513 = vmatpush.msrb.mxu2 %v327_v48  ;;  %1532 = vmatpush.msrb.mxu3 %v344_v49  ;;  %v394_v40 = vld [vmem:[%s6407_s1 + $0x948] sm:$0xff]  ;;  %v411_v41 = vld [vmem:[%s6407_s1 + $0x9d0] sm:$0xff]  ;;  %v393_v44 = vld [vmem:[%s6407_s1 + $0x940] sm:$0xff] }
  0x7c   :  { %1474 = vmatpush.msrb.mxu0 %v294_v50  ;;  %1493 = vmatpush.msrb.mxu1 %v311_v51  ;;  %v378_v43 = vld [vmem:[%s6407_s1 + $0x8c8] sm:$0xff]  ;;  %v360_v46 = vld [vmem:[%s6407_s1 + $0x838] sm:$0xff]  ;;  %v377_v47 = vld [vmem:[%s6407_s1 + $0x8c0] sm:$0xff] }
  0x7d   :  { %1514 = vmatpush.msrb.mxu2 %v326_v52  ;;  %1533 = vmatpush.msrb.mxu3 %v343_v53  ;;  %v410_v45 = vld [vmem:[%s6407_s1 + $0x9c8] sm:$0xff]  ;;  %v392_v48 = vld [vmem:[%s6407_s1 + $0x938] sm:$0xff]  ;;  %v409_v49 = vld [vmem:[%s6407_s1 + $0x9c0] sm:$0xff] }
  0x7e   :  { %1475 = vmatpush.msrb.mxu0 %v293_v54  ;;  %1494 = vmatpush.msrb.mxu1 %v310_v55  ;;  %v359_v50 = vld [vmem:[%s6407_s1 + $0x830] sm:$0xff]  ;;  %v376_v51 = vld [vmem:[%s6407_s1 + $0x8b8] sm:$0xff]  ;;  %v358_v54 = vld [vmem:[%s6407_s1 + $0x828] sm:$0xff] }
  0x7f   :  { %1515 = vmatpush.msrb.mxu2 %v325_v56  ;;  %1534 = vmatpush.msrb.mxu3 %v342_v57  ;;  %v391_v52 = vld [vmem:[%s6407_s1 + $0x930] sm:$0xff]  ;;  %v408_v53 = vld [vmem:[%s6407_s1 + $0x9b8] sm:$0xff]  ;;  %v390_v56 = vld [vmem:[%s6407_s1 + $0x928] sm:$0xff] }
  0x80   :  { %1476 = vmatpush.msrb.mxu0 %v292_v58  ;;  %1495 = vmatpush.msrb.mxu1 %v309_v59  ;;  %v375_v55 = vld [vmem:[%s6407_s1 + $0x8b0] sm:$0xff]  ;;  %v357_v58 = vld [vmem:[%s6407_s1 + $0x820] sm:$0xff]  ;;  %v374_v59 = vld [vmem:[%s6407_s1 + $0x8a8] sm:$0xff] }
  0x81   :  { %1516 = vmatpush.msrb.mxu2 %v324_v60  ;;  %1535 = vmatpush.msrb.mxu3 %v341_v61  ;;  %v407_v57 = vld [vmem:[%s6407_s1 + $0x9b0] sm:$0xff]  ;;  %v389_v60 = vld [vmem:[%s6407_s1 + $0x920] sm:$0xff]  ;;  %v406_v61 = vld [vmem:[%s6407_s1 + $0x9a8] sm:$0xff] }
  0x82   :  { %1477 = vmatpush.msrb.mxu0 %v291_v62  ;;  %1496 = vmatpush.msrb.mxu1 %v308_v63  ;;  %v356_v62 = vld [vmem:[%s6407_s1 + $0x818] sm:$0xff]  ;;  %v373_v63 = vld [vmem:[%s6407_s1 + $0x8a0] sm:$0xff] }
  0x83   :  { %1517 = vmatpush.msrb.mxu2 %v323_v0  ;;  %1536 = vmatpush.msrb.mxu3 %v340_v1  ;;  %v388_v0 = vld [vmem:[%s6407_s1 + $0x918] sm:$0xff]  ;;  %v405_v1 = vld [vmem:[%s6407_s1 + $0x9a0] sm:$0xff] }
  0x84   :  { %1478 = vmatpush.msrb.mxu0 %v290_v2  ;;  %1497 = vmatpush.msrb.mxu1 %v307_v3  ;;  %v355_v2 = vld [vmem:[%s6407_s1 + $0x810] sm:$0xff]  ;;  %v372_v3 = vld [vmem:[%s6407_s1 + $0x898] sm:$0xff] }
  0x85   :  { %1518 = vmatpush.msrb.mxu2 %v322_v4  ;;  %1537 = vmatpush.msrb.mxu3 %v339_v5  ;;  %v387_v4 = vld [vmem:[%s6407_s1 + $0x910] sm:$0xff]  ;;  %v404_v5 = vld [vmem:[%s6407_s1 + $0x998] sm:$0xff] }
  0x86   :  { %1479 = vmatpush.msrb.mxu0 %v289_v6  ;;  %1498 = vmatpush.msrb.mxu1 %v306_v7  ;;  %v354_v6 = vld [vmem:[%s6407_s1 + $0x808] sm:$0xff]  ;;  %v371_v7 = vld [vmem:[%s6407_s1 + $0x890] sm:$0xff] }
  0x87   :  { %1519 = vmatpush.msrb.mxu2 %v321_v8  ;;  %1538 = vmatpush.msrb.mxu3 %v338_v9  ;;  %v386_v8 = vld [vmem:[%s6407_s1 + $0x908] sm:$0xff]  ;;  %v403_v9 = vld [vmem:[%s6407_s1 + $0x990] sm:$0xff] }
  0x88   :  { %1480 = vmatmul.f32.vlgmr.msrb.gmra.mxu0 %v39_v10  ;;  %1520 = vmatmul.f32.vlgmr.msrb.gmra.mxu2 %v41_v11  ;;  %v353_v10 = vld [vmem:[%s6407_s1 + $0x800] sm:$0xff]  ;;  %v370_v11 = vld [vmem:[%s6407_s1 + $0x888] sm:$0xff] }
  0x89   :  { %1544 = vmatpush.msra.mxu0 %v368_v12  ;;  %1584 = vmatpush.msra.mxu2 %v400_v13  ;;  %v385_v12 = vld [vmem:[%s6407_s1 + $0x900] sm:$0xff]  ;;  %v402_v13 = vld [vmem:[%s6407_s1 + $0x988] sm:$0xff] }
  0x8a   :  { %1499 = vmatpush.msrb.mxu1 %v305_v14  ;;  %1539 = vmatpush.msrb.mxu3 %v337_v15  ;;  %v43_v14 = vld [vmem:[%s6406_s0 + $0x80] sm:$0xff]  ;;  %v45_v15 = vld [vmem:[%s6406_s0 + $0x90] sm:$0xff] }
  0x8b   :  { %1500 = vmatmul.f32.vlgmr.msrb.gmra.mxu1 %v40_v16  ;;  %1540 = vmatmul.f32.vlgmr.msrb.gmra.mxu3 %v42_v17  ;;  %v432_v16 = vld [vmem:[%s6407_s1 + $0xa78] sm:$0xff] }
  0x8c   :  { %1545 = vmatpush.msra.mxu0 %v367_v18  ;;  %1564 = vmatpush.msra.mxu1 %v384_v19  ;;  %v464_v17 = vld [vmem:[%s6407_s1 + $0xb78] sm:$0xff]  ;;  %v369_v18 = vld [vmem:[%s6407_s1 + $0x880] sm:$0xff] }
  0x8d   :  { %1585 = vmatpush.msra.mxu2 %v399_v20  ;;  %1604 = vmatpush.msra.mxu3 %v416_v21  ;;  %v401_v19 = vld [vmem:[%s6407_s1 + $0x980] sm:$0xff]  ;;  %v44_v20 = vld [vmem:[%s6406_s0 + $0x88] sm:$0xff]  ;;  %v46_v21 = vld [vmem:[%s6406_s0 + $0x98] sm:$0xff] }
  0x8e   :  { %1546 = vmatpush.msra.mxu0 %v366_v22  ;;  %1565 = vmatpush.msra.mxu1 %v383_v23  ;;  %v431_v22 = vld [vmem:[%s6407_s1 + $0xa70] sm:$0xff]  ;;  %v448_v23 = vld [vmem:[%s6407_s1 + $0xaf8] sm:$0xff] }
  0x8f   :  { %1586 = vmatpush.msra.mxu2 %v398_v24  ;;  %1605 = vmatpush.msra.mxu3 %v415_v25  ;;  %v463_v24 = vld [vmem:[%s6407_s1 + $0xb70] sm:$0xff]  ;;  %v480_v25 = vld [vmem:[%s6407_s1 + $0xbf8] sm:$0xff] }
  0x90   :  { %1547 = vmatpush.msra.mxu0 %v365_v26  ;;  %1566 = vmatpush.msra.mxu1 %v382_v27  ;;  %v430_v26 = vld [vmem:[%s6407_s1 + $0xa68] sm:$0xff]  ;;  %v447_v27 = vld [vmem:[%s6407_s1 + $0xaf0] sm:$0xff] }
  0x91   :  { %1587 = vmatpush.msra.mxu2 %v397_v28  ;;  %1606 = vmatpush.msra.mxu3 %v414_v29  ;;  %v462_v28 = vld [vmem:[%s6407_s1 + $0xb68] sm:$0xff]  ;;  %v479_v29 = vld [vmem:[%s6407_s1 + $0xbf0] sm:$0xff] }
  0x92   :  { %1548 = vmatpush.msra.mxu0 %v364_v30  ;;  %1567 = vmatpush.msra.mxu1 %v381_v31  ;;  %v429_v30 = vld [vmem:[%s6407_s1 + $0xa60] sm:$0xff]  ;;  %v446_v31 = vld [vmem:[%s6407_s1 + $0xae8] sm:$0xff] }
  0x93   :  { %1588 = vmatpush.msra.mxu2 %v396_v32  ;;  %1607 = vmatpush.msra.mxu3 %v413_v33  ;;  %v461_v32 = vld [vmem:[%s6407_s1 + $0xb60] sm:$0xff]  ;;  %v478_v33 = vld [vmem:[%s6407_s1 + $0xbe8] sm:$0xff] }
  0x94   :  { %1549 = vmatpush.msra.mxu0 %v363_v34  ;;  %1568 = vmatpush.msra.mxu1 %v380_v35  ;;  %v428_v34 = vld [vmem:[%s6407_s1 + $0xa58] sm:$0xff]  ;;  %v445_v35 = vld [vmem:[%s6407_s1 + $0xae0] sm:$0xff] }
  0x95   :  { %1589 = vmatpush.msra.mxu2 %v395_v36  ;;  %1608 = vmatpush.msra.mxu3 %v412_v37  ;;  %v460_v36 = vld [vmem:[%s6407_s1 + $0xb58] sm:$0xff]  ;;  %v477_v37 = vld [vmem:[%s6407_s1 + $0xbe0] sm:$0xff] }
  0x96   :  { %1550 = vmatpush.msra.mxu0 %v362_v38  ;;  %1569 = vmatpush.msra.mxu1 %v379_v39  ;;  %v427_v38 = vld [vmem:[%s6407_s1 + $0xa50] sm:$0xff]  ;;  %v444_v39 = vld [vmem:[%s6407_s1 + $0xad8] sm:$0xff] }
  0x97   :  { %1590 = vmatpush.msra.mxu2 %v394_v40  ;;  %1609 = vmatpush.msra.mxu3 %v411_v41  ;;  %v459_v40 = vld [vmem:[%s6407_s1 + $0xb50] sm:$0xff]  ;;  %v476_v41 = vld [vmem:[%s6407_s1 + $0xbd8] sm:$0xff] }
  0x98   :  { %1551 = vmatpush.msra.mxu0 %v361_v42  ;;  %1570 = vmatpush.msra.mxu1 %v378_v43  ;;  %v426_v42 = vld [vmem:[%s6407_s1 + $0xa48] sm:$0xff]  ;;  %v443_v43 = vld [vmem:[%s6407_s1 + $0xad0] sm:$0xff] }
  0x99   :  { %1591 = vmatpush.msra.mxu2 %v393_v44  ;;  %1610 = vmatpush.msra.mxu3 %v410_v45  ;;  %v458_v44 = vld [vmem:[%s6407_s1 + $0xb48] sm:$0xff]  ;;  %v475_v45 = vld [vmem:[%s6407_s1 + $0xbd0] sm:$0xff] }
  0x9a   :  { %1552 = vmatpush.msra.mxu0 %v360_v46  ;;  %1571 = vmatpush.msra.mxu1 %v377_v47  ;;  %v425_v46 = vld [vmem:[%s6407_s1 + $0xa40] sm:$0xff]  ;;  %v442_v47 = vld [vmem:[%s6407_s1 + $0xac8] sm:$0xff] }
  0x9b   :  { %1592 = vmatpush.msra.mxu2 %v392_v48  ;;  %1611 = vmatpush.msra.mxu3 %v409_v49  ;;  %v457_v48 = vld [vmem:[%s6407_s1 + $0xb40] sm:$0xff]  ;;  %v474_v49 = vld [vmem:[%s6407_s1 + $0xbc8] sm:$0xff] }
  0x9c   :  { %1553 = vmatpush.msra.mxu0 %v359_v50  ;;  %1572 = vmatpush.msra.mxu1 %v376_v51  ;;  %v424_v50 = vld [vmem:[%s6407_s1 + $0xa38] sm:$0xff]  ;;  %v441_v51 = vld [vmem:[%s6407_s1 + $0xac0] sm:$0xff] }
  0x9d   :  { %1593 = vmatpush.msra.mxu2 %v391_v52  ;;  %1612 = vmatpush.msra.mxu3 %v408_v53  ;;  %v456_v52 = vld [vmem:[%s6407_s1 + $0xb38] sm:$0xff]  ;;  %v473_v53 = vld [vmem:[%s6407_s1 + $0xbc0] sm:$0xff] }
  0x9e   :  { %1554 = vmatpush.msra.mxu0 %v358_v54  ;;  %1573 = vmatpush.msra.mxu1 %v375_v55  ;;  %v423_v54 = vld [vmem:[%s6407_s1 + $0xa30] sm:$0xff]  ;;  %v440_v55 = vld [vmem:[%s6407_s1 + $0xab8] sm:$0xff] }
  0x9f   :  { %1594 = vmatpush.msra.mxu2 %v390_v56  ;;  %1613 = vmatpush.msra.mxu3 %v407_v57  ;;  %v455_v56 = vld [vmem:[%s6407_s1 + $0xb30] sm:$0xff]  ;;  %v472_v57 = vld [vmem:[%s6407_s1 + $0xbb8] sm:$0xff] }
  0xa0   :  { %1555 = vmatpush.msra.mxu0 %v357_v58  ;;  %1574 = vmatpush.msra.mxu1 %v374_v59  ;;  %v422_v58 = vld [vmem:[%s6407_s1 + $0xa28] sm:$0xff]  ;;  %v439_v59 = vld [vmem:[%s6407_s1 + $0xab0] sm:$0xff] }
  0xa1   :  { %1595 = vmatpush.msra.mxu2 %v389_v60  ;;  %1614 = vmatpush.msra.mxu3 %v406_v61  ;;  %v454_v60 = vld [vmem:[%s6407_s1 + $0xb28] sm:$0xff]  ;;  %v471_v61 = vld [vmem:[%s6407_s1 + $0xbb0] sm:$0xff] }
  0xa2   :  { %1556 = vmatpush.msra.mxu0 %v356_v62  ;;  %1575 = vmatpush.msra.mxu1 %v373_v63  ;;  %v421_v62 = vld [vmem:[%s6407_s1 + $0xa20] sm:$0xff]  ;;  %v438_v63 = vld [vmem:[%s6407_s1 + $0xaa8] sm:$0xff] }
  0xa3   :  { %1596 = vmatpush.msra.mxu2 %v388_v0  ;;  %1615 = vmatpush.msra.mxu3 %v405_v1  ;;  %v453_v0 = vld [vmem:[%s6407_s1 + $0xb20] sm:$0xff]  ;;  %v470_v1 = vld [vmem:[%s6407_s1 + $0xba8] sm:$0xff] }
  0xa4   :  { %1557 = vmatpush.msra.mxu0 %v355_v2  ;;  %1576 = vmatpush.msra.mxu1 %v372_v3  ;;  %v420_v2 = vld [vmem:[%s6407_s1 + $0xa18] sm:$0xff]  ;;  %v437_v3 = vld [vmem:[%s6407_s1 + $0xaa0] sm:$0xff] }
  0xa5   :  { %1597 = vmatpush.msra.mxu2 %v387_v4  ;;  %1616 = vmatpush.msra.mxu3 %v404_v5  ;;  %v452_v4 = vld [vmem:[%s6407_s1 + $0xb18] sm:$0xff]  ;;  %v469_v5 = vld [vmem:[%s6407_s1 + $0xba0] sm:$0xff] }
  0xa6   :  { %1558 = vmatpush.msra.mxu0 %v354_v6  ;;  %1577 = vmatpush.msra.mxu1 %v371_v7  ;;  %v419_v6 = vld [vmem:[%s6407_s1 + $0xa10] sm:$0xff]  ;;  %v436_v7 = vld [vmem:[%s6407_s1 + $0xa98] sm:$0xff] }
  0xa7   :  { %1598 = vmatpush.msra.mxu2 %v386_v8  ;;  %1617 = vmatpush.msra.mxu3 %v403_v9  ;;  %v451_v8 = vld [vmem:[%s6407_s1 + $0xb10] sm:$0xff]  ;;  %v468_v9 = vld [vmem:[%s6407_s1 + $0xb98] sm:$0xff] }
  0xa8   :  { %1559 = vmatpush.msra.mxu0 %v353_v10  ;;  %1578 = vmatpush.msra.mxu1 %v370_v11  ;;  %v418_v10 = vld [vmem:[%s6407_s1 + $0xa08] sm:$0xff]  ;;  %v435_v11 = vld [vmem:[%s6407_s1 + $0xa90] sm:$0xff] }
  0xa9   :  { %1599 = vmatpush.msra.mxu2 %v385_v12  ;;  %1618 = vmatpush.msra.mxu3 %v402_v13  ;;  %v450_v12 = vld [vmem:[%s6407_s1 + $0xb08] sm:$0xff]  ;;  %v467_v13 = vld [vmem:[%s6407_s1 + $0xb90] sm:$0xff] }
  0xaa   :  { %1560 = vmatmul.f32.vlgmr.msra.gmra.mxu0 %v43_v14  ;;  %1600 = vmatmul.f32.vlgmr.msra.gmra.mxu2 %v45_v15  ;;  %v417_v14 = vld [vmem:[%s6407_s1 + $0xa00] sm:$0xff]  ;;  %v434_v15 = vld [vmem:[%s6407_s1 + $0xa88] sm:$0xff] }
  0xab   :  { %1624 = vmatpush.msrb.mxu0 %v432_v16  ;;  %1664 = vmatpush.msrb.mxu2 %v464_v17  ;;  %v449_v16 = vld [vmem:[%s6407_s1 + $0xb00] sm:$0xff]  ;;  %v466_v17 = vld [vmem:[%s6407_s1 + $0xb88] sm:$0xff] }
  0xac   :  { %1579 = vmatpush.msra.mxu1 %v369_v18  ;;  %1619 = vmatpush.msra.mxu3 %v401_v19  ;;  %v47_v18 = vld [vmem:[%s6406_s0 + $0xa0] sm:$0xff]  ;;  %v49_v19 = vld [vmem:[%s6406_s0 + $0xb0] sm:$0xff] }
  0xad   :  { %1580 = vmatmul.f32.vlgmr.msra.gmra.mxu1 %v44_v20  ;;  %1620 = vmatmul.f32.vlgmr.msra.gmra.mxu3 %v46_v21  ;;  %v496_v20 = vld [vmem:[%s6407_s1 + $0xc78] sm:$0xff] }
  0xae   :  { %1625 = vmatpush.msrb.mxu0 %v431_v22  ;;  %1644 = vmatpush.msrb.mxu1 %v448_v23  ;;  %v528_v21 = vld [vmem:[%s6407_s1 + $0xd78] sm:$0xff]  ;;  %v433_v22 = vld [vmem:[%s6407_s1 + $0xa80] sm:$0xff] }
  0xaf   :  { %1665 = vmatpush.msrb.mxu2 %v463_v24  ;;  %1684 = vmatpush.msrb.mxu3 %v480_v25  ;;  %v465_v23 = vld [vmem:[%s6407_s1 + $0xb80] sm:$0xff]  ;;  %v48_v24 = vld [vmem:[%s6406_s0 + $0xa8] sm:$0xff]  ;;  %v50_v25 = vld [vmem:[%s6406_s0 + $0xb8] sm:$0xff] }
  0xb0   :  { %1626 = vmatpush.msrb.mxu0 %v430_v26  ;;  %1645 = vmatpush.msrb.mxu1 %v447_v27  ;;  %v495_v26 = vld [vmem:[%s6407_s1 + $0xc70] sm:$0xff]  ;;  %v512_v27 = vld [vmem:[%s6407_s1 + $0xcf8] sm:$0xff] }
  0xb1   :  { %1666 = vmatpush.msrb.mxu2 %v462_v28  ;;  %1685 = vmatpush.msrb.mxu3 %v479_v29  ;;  %v527_v28 = vld [vmem:[%s6407_s1 + $0xd70] sm:$0xff]  ;;  %v544_v29 = vld [vmem:[%s6407_s1 + $0xdf8] sm:$0xff] }
  0xb2   :  { %1627 = vmatpush.msrb.mxu0 %v429_v30  ;;  %1646 = vmatpush.msrb.mxu1 %v446_v31  ;;  %v494_v30 = vld [vmem:[%s6407_s1 + $0xc68] sm:$0xff]  ;;  %v511_v31 = vld [vmem:[%s6407_s1 + $0xcf0] sm:$0xff] }
  0xb3   :  { %1667 = vmatpush.msrb.mxu2 %v461_v32  ;;  %1686 = vmatpush.msrb.mxu3 %v478_v33  ;;  %v526_v32 = vld [vmem:[%s6407_s1 + $0xd68] sm:$0xff]  ;;  %v543_v33 = vld [vmem:[%s6407_s1 + $0xdf0] sm:$0xff] }
  0xb4   :  { %1628 = vmatpush.msrb.mxu0 %v428_v34  ;;  %1647 = vmatpush.msrb.mxu1 %v445_v35  ;;  %v493_v34 = vld [vmem:[%s6407_s1 + $0xc60] sm:$0xff]  ;;  %v510_v35 = vld [vmem:[%s6407_s1 + $0xce8] sm:$0xff] }
  0xb5   :  { %1668 = vmatpush.msrb.mxu2 %v460_v36  ;;  %1687 = vmatpush.msrb.mxu3 %v477_v37  ;;  %v525_v36 = vld [vmem:[%s6407_s1 + $0xd60] sm:$0xff]  ;;  %v542_v37 = vld [vmem:[%s6407_s1 + $0xde8] sm:$0xff] }
  0xb6   :  { %1629 = vmatpush.msrb.mxu0 %v427_v38  ;;  %1648 = vmatpush.msrb.mxu1 %v444_v39  ;;  %v492_v38 = vld [vmem:[%s6407_s1 + $0xc58] sm:$0xff]  ;;  %v509_v39 = vld [vmem:[%s6407_s1 + $0xce0] sm:$0xff] }
  0xb7   :  { %1669 = vmatpush.msrb.mxu2 %v459_v40  ;;  %1688 = vmatpush.msrb.mxu3 %v476_v41  ;;  %v524_v40 = vld [vmem:[%s6407_s1 + $0xd58] sm:$0xff]  ;;  %v541_v41 = vld [vmem:[%s6407_s1 + $0xde0] sm:$0xff] }
  0xb8   :  { %1630 = vmatpush.msrb.mxu0 %v426_v42  ;;  %1649 = vmatpush.msrb.mxu1 %v443_v43  ;;  %v491_v42 = vld [vmem:[%s6407_s1 + $0xc50] sm:$0xff]  ;;  %v508_v43 = vld [vmem:[%s6407_s1 + $0xcd8] sm:$0xff] }
  0xb9   :  { %1670 = vmatpush.msrb.mxu2 %v458_v44  ;;  %1689 = vmatpush.msrb.mxu3 %v475_v45  ;;  %v523_v44 = vld [vmem:[%s6407_s1 + $0xd50] sm:$0xff]  ;;  %v540_v45 = vld [vmem:[%s6407_s1 + $0xdd8] sm:$0xff] }
  0xba   :  { %1631 = vmatpush.msrb.mxu0 %v425_v46  ;;  %1650 = vmatpush.msrb.mxu1 %v442_v47  ;;  %v490_v46 = vld [vmem:[%s6407_s1 + $0xc48] sm:$0xff]  ;;  %v507_v47 = vld [vmem:[%s6407_s1 + $0xcd0] sm:$0xff] }
  0xbb   :  { %1671 = vmatpush.msrb.mxu2 %v457_v48  ;;  %1690 = vmatpush.msrb.mxu3 %v474_v49  ;;  %v522_v48 = vld [vmem:[%s6407_s1 + $0xd48] sm:$0xff]  ;;  %v539_v49 = vld [vmem:[%s6407_s1 + $0xdd0] sm:$0xff] }
  0xbc   :  { %1632 = vmatpush.msrb.mxu0 %v424_v50  ;;  %1651 = vmatpush.msrb.mxu1 %v441_v51  ;;  %v489_v50 = vld [vmem:[%s6407_s1 + $0xc40] sm:$0xff]  ;;  %v506_v51 = vld [vmem:[%s6407_s1 + $0xcc8] sm:$0xff] }
  0xbd   :  { %1672 = vmatpush.msrb.mxu2 %v456_v52  ;;  %1691 = vmatpush.msrb.mxu3 %v473_v53  ;;  %v521_v52 = vld [vmem:[%s6407_s1 + $0xd40] sm:$0xff]  ;;  %v538_v53 = vld [vmem:[%s6407_s1 + $0xdc8] sm:$0xff] }
  0xbe   :  { %1633 = vmatpush.msrb.mxu0 %v423_v54  ;;  %1652 = vmatpush.msrb.mxu1 %v440_v55  ;;  %v488_v54 = vld [vmem:[%s6407_s1 + $0xc38] sm:$0xff]  ;;  %v505_v55 = vld [vmem:[%s6407_s1 + $0xcc0] sm:$0xff] }
  0xbf   :  { %1673 = vmatpush.msrb.mxu2 %v455_v56  ;;  %1692 = vmatpush.msrb.mxu3 %v472_v57  ;;  %v520_v56 = vld [vmem:[%s6407_s1 + $0xd38] sm:$0xff]  ;;  %v537_v57 = vld [vmem:[%s6407_s1 + $0xdc0] sm:$0xff] }
  0xc0   :  { %1634 = vmatpush.msrb.mxu0 %v422_v58  ;;  %1653 = vmatpush.msrb.mxu1 %v439_v59  ;;  %v487_v58 = vld [vmem:[%s6407_s1 + $0xc30] sm:$0xff]  ;;  %v504_v59 = vld [vmem:[%s6407_s1 + $0xcb8] sm:$0xff] }
  0xc1   :  { %1674 = vmatpush.msrb.mxu2 %v454_v60  ;;  %1693 = vmatpush.msrb.mxu3 %v471_v61  ;;  %v519_v60 = vld [vmem:[%s6407_s1 + $0xd30] sm:$0xff]  ;;  %v536_v61 = vld [vmem:[%s6407_s1 + $0xdb8] sm:$0xff] }
  0xc2   :  { %1635 = vmatpush.msrb.mxu0 %v421_v62  ;;  %1654 = vmatpush.msrb.mxu1 %v438_v63  ;;  %v486_v62 = vld [vmem:[%s6407_s1 + $0xc28] sm:$0xff]  ;;  %v503_v63 = vld [vmem:[%s6407_s1 + $0xcb0] sm:$0xff] }
  0xc3   :  { %1675 = vmatpush.msrb.mxu2 %v453_v0  ;;  %1694 = vmatpush.msrb.mxu3 %v470_v1  ;;  %v518_v0 = vld [vmem:[%s6407_s1 + $0xd28] sm:$0xff]  ;;  %v535_v1 = vld [vmem:[%s6407_s1 + $0xdb0] sm:$0xff] }
  0xc4   :  { %1636 = vmatpush.msrb.mxu0 %v420_v2  ;;  %1655 = vmatpush.msrb.mxu1 %v437_v3  ;;  %v485_v2 = vld [vmem:[%s6407_s1 + $0xc20] sm:$0xff]  ;;  %v502_v3 = vld [vmem:[%s6407_s1 + $0xca8] sm:$0xff] }
  0xc5   :  { %1676 = vmatpush.msrb.mxu2 %v452_v4  ;;  %1695 = vmatpush.msrb.mxu3 %v469_v5  ;;  %v517_v4 = vld [vmem:[%s6407_s1 + $0xd20] sm:$0xff]  ;;  %v534_v5 = vld [vmem:[%s6407_s1 + $0xda8] sm:$0xff] }
  0xc6   :  { %1637 = vmatpush.msrb.mxu0 %v419_v6  ;;  %1656 = vmatpush.msrb.mxu1 %v436_v7  ;;  %v484_v6 = vld [vmem:[%s6407_s1 + $0xc18] sm:$0xff]  ;;  %v501_v7 = vld [vmem:[%s6407_s1 + $0xca0] sm:$0xff] }
  0xc7   :  { %1677 = vmatpush.msrb.mxu2 %v451_v8  ;;  %1696 = vmatpush.msrb.mxu3 %v468_v9  ;;  %v516_v8 = vld [vmem:[%s6407_s1 + $0xd18] sm:$0xff]  ;;  %v533_v9 = vld [vmem:[%s6407_s1 + $0xda0] sm:$0xff] }
  0xc8   :  { %1638 = vmatpush.msrb.mxu0 %v418_v10  ;;  %1657 = vmatpush.msrb.mxu1 %v435_v11  ;;  %v483_v10 = vld [vmem:[%s6407_s1 + $0xc10] sm:$0xff]  ;;  %v500_v11 = vld [vmem:[%s6407_s1 + $0xc98] sm:$0xff] }
  0xc9   :  { %1678 = vmatpush.msrb.mxu2 %v450_v12  ;;  %1697 = vmatpush.msrb.mxu3 %v467_v13  ;;  %v515_v12 = vld [vmem:[%s6407_s1 + $0xd10] sm:$0xff]  ;;  %v532_v13 = vld [vmem:[%s6407_s1 + $0xd98] sm:$0xff] }
  0xca   :  { %1639 = vmatpush.msrb.mxu0 %v417_v14  ;;  %1658 = vmatpush.msrb.mxu1 %v434_v15  ;;  %v482_v14 = vld [vmem:[%s6407_s1 + $0xc08] sm:$0xff]  ;;  %v499_v15 = vld [vmem:[%s6407_s1 + $0xc90] sm:$0xff] }
  0xcb   :  { %1679 = vmatpush.msrb.mxu2 %v449_v16  ;;  %1698 = vmatpush.msrb.mxu3 %v466_v17  ;;  %v514_v16 = vld [vmem:[%s6407_s1 + $0xd08] sm:$0xff]  ;;  %v531_v17 = vld [vmem:[%s6407_s1 + $0xd90] sm:$0xff] }
  0xcc   :  { %1640 = vmatmul.f32.vlgmr.msrb.gmra.mxu0 %v47_v18  ;;  %1680 = vmatmul.f32.vlgmr.msrb.gmra.mxu2 %v49_v19  ;;  %v481_v18 = vld [vmem:[%s6407_s1 + $0xc00] sm:$0xff]  ;;  %v498_v19 = vld [vmem:[%s6407_s1 + $0xc88] sm:$0xff] }
  0xcd   :  { %1704 = vmatpush.msra.mxu0 %v496_v20  ;;  %1744 = vmatpush.msra.mxu2 %v528_v21  ;;  %v513_v20 = vld [vmem:[%s6407_s1 + $0xd00] sm:$0xff]  ;;  %v530_v21 = vld [vmem:[%s6407_s1 + $0xd88] sm:$0xff] }
  0xce   :  { %1659 = vmatpush.msrb.mxu1 %v433_v22  ;;  %1699 = vmatpush.msrb.mxu3 %v465_v23  ;;  %v51_v22 = vld [vmem:[%s6406_s0 + $0xc0] sm:$0xff]  ;;  %v53_v23 = vld [vmem:[%s6406_s0 + $0xd0] sm:$0xff] }
  0xcf   :  { %1660 = vmatmul.f32.vlgmr.msrb.gmra.mxu1 %v48_v24  ;;  %1700 = vmatmul.f32.vlgmr.msrb.gmra.mxu3 %v50_v25  ;;  %v560_v24 = vld [vmem:[%s6407_s1 + $0xe78] sm:$0xff] }
  0xd0   :  { %1705 = vmatpush.msra.mxu0 %v495_v26  ;;  %1724 = vmatpush.msra.mxu1 %v512_v27  ;;  %v592_v25 = vld [vmem:[%s6407_s1 + $0xf78] sm:$0xff]  ;;  %v497_v26 = vld [vmem:[%s6407_s1 + $0xc80] sm:$0xff] }
  0xd1   :  { %1745 = vmatpush.msra.mxu2 %v527_v28  ;;  %1764 = vmatpush.msra.mxu3 %v544_v29  ;;  %v529_v27 = vld [vmem:[%s6407_s1 + $0xd80] sm:$0xff]  ;;  %v52_v28 = vld [vmem:[%s6406_s0 + $0xc8] sm:$0xff]  ;;  %v54_v29 = vld [vmem:[%s6406_s0 + $0xd8] sm:$0xff] }
  0xd2   :  { %1706 = vmatpush.msra.mxu0 %v494_v30  ;;  %1725 = vmatpush.msra.mxu1 %v511_v31  ;;  %v559_v30 = vld [vmem:[%s6407_s1 + $0xe70] sm:$0xff]  ;;  %v576_v31 = vld [vmem:[%s6407_s1 + $0xef8] sm:$0xff] }
  0xd3   :  { %1746 = vmatpush.msra.mxu2 %v526_v32  ;;  %1765 = vmatpush.msra.mxu3 %v543_v33  ;;  %v591_v32 = vld [vmem:[%s6407_s1 + $0xf70] sm:$0xff]  ;;  %v608_v33 = vld [vmem:[%s6407_s1 + $0xff8] sm:$0xff] }
  0xd4   :  { %1707 = vmatpush.msra.mxu0 %v493_v34  ;;  %1726 = vmatpush.msra.mxu1 %v510_v35  ;;  %v558_v34 = vld [vmem:[%s6407_s1 + $0xe68] sm:$0xff]  ;;  %v575_v35 = vld [vmem:[%s6407_s1 + $0xef0] sm:$0xff] }
  0xd5   :  { %1747 = vmatpush.msra.mxu2 %v525_v36  ;;  %1766 = vmatpush.msra.mxu3 %v542_v37  ;;  %v590_v36 = vld [vmem:[%s6407_s1 + $0xf68] sm:$0xff]  ;;  %v607_v37 = vld [vmem:[%s6407_s1 + $0xff0] sm:$0xff] }
  0xd6   :  { %1708 = vmatpush.msra.mxu0 %v492_v38  ;;  %1727 = vmatpush.msra.mxu1 %v509_v39  ;;  %v557_v38 = vld [vmem:[%s6407_s1 + $0xe60] sm:$0xff]  ;;  %v574_v39 = vld [vmem:[%s6407_s1 + $0xee8] sm:$0xff] }
  0xd7   :  { %1748 = vmatpush.msra.mxu2 %v524_v40  ;;  %1767 = vmatpush.msra.mxu3 %v541_v41  ;;  %v589_v40 = vld [vmem:[%s6407_s1 + $0xf60] sm:$0xff]  ;;  %v606_v41 = vld [vmem:[%s6407_s1 + $0xfe8] sm:$0xff] }
  0xd8   :  { %1709 = vmatpush.msra.mxu0 %v491_v42  ;;  %1728 = vmatpush.msra.mxu1 %v508_v43  ;;  %v556_v42 = vld [vmem:[%s6407_s1 + $0xe58] sm:$0xff]  ;;  %v573_v43 = vld [vmem:[%s6407_s1 + $0xee0] sm:$0xff] }
  0xd9   :  { %1749 = vmatpush.msra.mxu2 %v523_v44  ;;  %1768 = vmatpush.msra.mxu3 %v540_v45  ;;  %v588_v44 = vld [vmem:[%s6407_s1 + $0xf58] sm:$0xff]  ;;  %v605_v45 = vld [vmem:[%s6407_s1 + $0xfe0] sm:$0xff] }
  0xda   :  { %1710 = vmatpush.msra.mxu0 %v490_v46  ;;  %1729 = vmatpush.msra.mxu1 %v507_v47  ;;  %v555_v46 = vld [vmem:[%s6407_s1 + $0xe50] sm:$0xff]  ;;  %v572_v47 = vld [vmem:[%s6407_s1 + $0xed8] sm:$0xff] }
  0xdb   :  { %1750 = vmatpush.msra.mxu2 %v522_v48  ;;  %1769 = vmatpush.msra.mxu3 %v539_v49  ;;  %v587_v48 = vld [vmem:[%s6407_s1 + $0xf50] sm:$0xff]  ;;  %v604_v49 = vld [vmem:[%s6407_s1 + $0xfd8] sm:$0xff] }
  0xdc   :  { %1711 = vmatpush.msra.mxu0 %v489_v50  ;;  %1730 = vmatpush.msra.mxu1 %v506_v51  ;;  %v554_v50 = vld [vmem:[%s6407_s1 + $0xe48] sm:$0xff]  ;;  %v571_v51 = vld [vmem:[%s6407_s1 + $0xed0] sm:$0xff] }
  0xdd   :  { %1751 = vmatpush.msra.mxu2 %v521_v52  ;;  %1770 = vmatpush.msra.mxu3 %v538_v53  ;;  %v586_v52 = vld [vmem:[%s6407_s1 + $0xf48] sm:$0xff]  ;;  %v603_v53 = vld [vmem:[%s6407_s1 + $0xfd0] sm:$0xff] }
  0xde   :  { %1712 = vmatpush.msra.mxu0 %v488_v54  ;;  %1731 = vmatpush.msra.mxu1 %v505_v55  ;;  %v553_v54 = vld [vmem:[%s6407_s1 + $0xe40] sm:$0xff]  ;;  %v570_v55 = vld [vmem:[%s6407_s1 + $0xec8] sm:$0xff] }
  0xdf   :  { %1752 = vmatpush.msra.mxu2 %v520_v56  ;;  %1771 = vmatpush.msra.mxu3 %v537_v57  ;;  %v585_v56 = vld [vmem:[%s6407_s1 + $0xf40] sm:$0xff]  ;;  %v602_v57 = vld [vmem:[%s6407_s1 + $0xfc8] sm:$0xff] }
  0xe0   :  { %1713 = vmatpush.msra.mxu0 %v487_v58  ;;  %1732 = vmatpush.msra.mxu1 %v504_v59  ;;  %v552_v58 = vld [vmem:[%s6407_s1 + $0xe38] sm:$0xff]  ;;  %v569_v59 = vld [vmem:[%s6407_s1 + $0xec0] sm:$0xff] }
  0xe1   :  { %1753 = vmatpush.msra.mxu2 %v519_v60  ;;  %1772 = vmatpush.msra.mxu3 %v536_v61  ;;  %v584_v60 = vld [vmem:[%s6407_s1 + $0xf38] sm:$0xff]  ;;  %v601_v61 = vld [vmem:[%s6407_s1 + $0xfc0] sm:$0xff] }
  0xe2   :  { %1714 = vmatpush.msra.mxu0 %v486_v62  ;;  %1733 = vmatpush.msra.mxu1 %v503_v63  ;;  %v551_v62 = vld [vmem:[%s6407_s1 + $0xe30] sm:$0xff]  ;;  %v568_v63 = vld [vmem:[%s6407_s1 + $0xeb8] sm:$0xff] }
  0xe3   :  { %1754 = vmatpush.msra.mxu2 %v518_v0  ;;  %1773 = vmatpush.msra.mxu3 %v535_v1  ;;  %v583_v0 = vld [vmem:[%s6407_s1 + $0xf30] sm:$0xff]  ;;  %v600_v1 = vld [vmem:[%s6407_s1 + $0xfb8] sm:$0xff] }
  0xe4   :  { %1715 = vmatpush.msra.mxu0 %v485_v2  ;;  %1734 = vmatpush.msra.mxu1 %v502_v3  ;;  %v550_v2 = vld [vmem:[%s6407_s1 + $0xe28] sm:$0xff]  ;;  %v567_v3 = vld [vmem:[%s6407_s1 + $0xeb0] sm:$0xff] }
  0xe5   :  { %1755 = vmatpush.msra.mxu2 %v517_v4  ;;  %1774 = vmatpush.msra.mxu3 %v534_v5  ;;  %v582_v4 = vld [vmem:[%s6407_s1 + $0xf28] sm:$0xff]  ;;  %v599_v5 = vld [vmem:[%s6407_s1 + $0xfb0] sm:$0xff] }
  0xe6   :  { %1716 = vmatpush.msra.mxu0 %v484_v6  ;;  %1735 = vmatpush.msra.mxu1 %v501_v7  ;;  %v549_v6 = vld [vmem:[%s6407_s1 + $0xe20] sm:$0xff]  ;;  %v566_v7 = vld [vmem:[%s6407_s1 + $0xea8] sm:$0xff] }
  0xe7   :  { %1756 = vmatpush.msra.mxu2 %v516_v8  ;;  %1775 = vmatpush.msra.mxu3 %v533_v9  ;;  %v581_v8 = vld [vmem:[%s6407_s1 + $0xf20] sm:$0xff]  ;;  %v598_v9 = vld [vmem:[%s6407_s1 + $0xfa8] sm:$0xff] }
  0xe8   :  { %1717 = vmatpush.msra.mxu0 %v483_v10  ;;  %1736 = vmatpush.msra.mxu1 %v500_v11  ;;  %v548_v10 = vld [vmem:[%s6407_s1 + $0xe18] sm:$0xff]  ;;  %v565_v11 = vld [vmem:[%s6407_s1 + $0xea0] sm:$0xff] }
  0xe9   :  { %1757 = vmatpush.msra.mxu2 %v515_v12  ;;  %1776 = vmatpush.msra.mxu3 %v532_v13  ;;  %v580_v12 = vld [vmem:[%s6407_s1 + $0xf18] sm:$0xff]  ;;  %v597_v13 = vld [vmem:[%s6407_s1 + $0xfa0] sm:$0xff] }
  0xea   :  { %1718 = vmatpush.msra.mxu0 %v482_v14  ;;  %1737 = vmatpush.msra.mxu1 %v499_v15  ;;  %v547_v14 = vld [vmem:[%s6407_s1 + $0xe10] sm:$0xff]  ;;  %v564_v15 = vld [vmem:[%s6407_s1 + $0xe98] sm:$0xff] }
  0xeb   :  { %1758 = vmatpush.msra.mxu2 %v514_v16  ;;  %1777 = vmatpush.msra.mxu3 %v531_v17  ;;  %v579_v16 = vld [vmem:[%s6407_s1 + $0xf10] sm:$0xff]  ;;  %v596_v17 = vld [vmem:[%s6407_s1 + $0xf98] sm:$0xff] }
  0xec   :  { %1719 = vmatpush.msra.mxu0 %v481_v18  ;;  %1738 = vmatpush.msra.mxu1 %v498_v19  ;;  %v546_v18 = vld [vmem:[%s6407_s1 + $0xe08] sm:$0xff]  ;;  %v563_v19 = vld [vmem:[%s6407_s1 + $0xe90] sm:$0xff] }
  0xed   :  { %1759 = vmatpush.msra.mxu2 %v513_v20  ;;  %1778 = vmatpush.msra.mxu3 %v530_v21  ;;  %v578_v20 = vld [vmem:[%s6407_s1 + $0xf08] sm:$0xff]  ;;  %v595_v21 = vld [vmem:[%s6407_s1 + $0xf90] sm:$0xff] }
  0xee   :  { %1720 = vmatmul.f32.vlgmr.msra.gmra.mxu0 %v51_v22  ;;  %1760 = vmatmul.f32.vlgmr.msra.gmra.mxu2 %v53_v23  ;;  %v545_v22 = vld [vmem:[%s6407_s1 + $0xe00] sm:$0xff]  ;;  %v562_v23 = vld [vmem:[%s6407_s1 + $0xe88] sm:$0xff] }
  0xef   :  { %1784 = vmatpush.msrb.mxu0 %v560_v24  ;;  %1824 = vmatpush.msrb.mxu2 %v592_v25  ;;  %v577_v24 = vld [vmem:[%s6407_s1 + $0xf00] sm:$0xff]  ;;  %v594_v25 = vld [vmem:[%s6407_s1 + $0xf88] sm:$0xff] }
  0xf0   :  { %1739 = vmatpush.msra.mxu1 %v497_v26  ;;  %1779 = vmatpush.msra.mxu3 %v529_v27  ;;  %v55_v26 = vld [vmem:[%s6406_s0 + $0xe0] sm:$0xff]  ;;  %v57_v27 = vld [vmem:[%s6406_s0 + $0xf0] sm:$0xff] }
  0xf1   :  { %1740 = vmatmul.f32.vlgmr.msra.gmra.mxu1 %v52_v28  ;;  %1780 = vmatmul.f32.vlgmr.msra.gmra.mxu3 %v54_v29  ;;  %v624_v28 = vld [vmem:[%s6407_s1 + $0x1078] sm:$0xff] }
  0xf2   :  { %1785 = vmatpush.msrb.mxu0 %v559_v30  ;;  %1804 = vmatpush.msrb.mxu1 %v576_v31  ;;  %v656_v29 = vld [vmem:[%s6407_s1 + $0x1178] sm:$0xff]  ;;  %v561_v30 = vld [vmem:[%s6407_s1 + $0xe80] sm:$0xff] }
  0xf3   :  { %1825 = vmatpush.msrb.mxu2 %v591_v32  ;;  %1844 = vmatpush.msrb.mxu3 %v608_v33  ;;  %v593_v31 = vld [vmem:[%s6407_s1 + $0xf80] sm:$0xff]  ;;  %v56_v32 = vld [vmem:[%s6406_s0 + $0xe8] sm:$0xff]  ;;  %v58_v33 = vld [vmem:[%s6406_s0 + $0xf8] sm:$0xff] }
  0xf4   :  { %1786 = vmatpush.msrb.mxu0 %v558_v34  ;;  %1805 = vmatpush.msrb.mxu1 %v575_v35  ;;  %v623_v34 = vld [vmem:[%s6407_s1 + $0x1070] sm:$0xff]  ;;  %v640_v35 = vld [vmem:[%s6407_s1 + $0x10f8] sm:$0xff] }
  0xf5   :  { %1826 = vmatpush.msrb.mxu2 %v590_v36  ;;  %1845 = vmatpush.msrb.mxu3 %v607_v37  ;;  %v655_v36 = vld [vmem:[%s6407_s1 + $0x1170] sm:$0xff]  ;;  %v672_v37 = vld [vmem:[%s6407_s1 + $0x11f8] sm:$0xff] }
  0xf6   :  { %1787 = vmatpush.msrb.mxu0 %v557_v38  ;;  %1806 = vmatpush.msrb.mxu1 %v574_v39  ;;  %v622_v38 = vld [vmem:[%s6407_s1 + $0x1068] sm:$0xff]  ;;  %v639_v39 = vld [vmem:[%s6407_s1 + $0x10f0] sm:$0xff] }
  0xf7   :  { %1827 = vmatpush.msrb.mxu2 %v589_v40  ;;  %1846 = vmatpush.msrb.mxu3 %v606_v41  ;;  %v654_v40 = vld [vmem:[%s6407_s1 + $0x1168] sm:$0xff]  ;;  %v671_v41 = vld [vmem:[%s6407_s1 + $0x11f0] sm:$0xff] }
  0xf8   :  { %1788 = vmatpush.msrb.mxu0 %v556_v42  ;;  %1807 = vmatpush.msrb.mxu1 %v573_v43  ;;  %v621_v42 = vld [vmem:[%s6407_s1 + $0x1060] sm:$0xff]  ;;  %v638_v43 = vld [vmem:[%s6407_s1 + $0x10e8] sm:$0xff] }
  0xf9   :  { %1828 = vmatpush.msrb.mxu2 %v588_v44  ;;  %1847 = vmatpush.msrb.mxu3 %v605_v45  ;;  %v653_v44 = vld [vmem:[%s6407_s1 + $0x1160] sm:$0xff]  ;;  %v670_v45 = vld [vmem:[%s6407_s1 + $0x11e8] sm:$0xff] }
  0xfa   :  { %1789 = vmatpush.msrb.mxu0 %v555_v46  ;;  %1808 = vmatpush.msrb.mxu1 %v572_v47  ;;  %v620_v46 = vld [vmem:[%s6407_s1 + $0x1058] sm:$0xff]  ;;  %v637_v47 = vld [vmem:[%s6407_s1 + $0x10e0] sm:$0xff] }
  0xfb   :  { %1829 = vmatpush.msrb.mxu2 %v587_v48  ;;  %1848 = vmatpush.msrb.mxu3 %v604_v49  ;;  %v652_v48 = vld [vmem:[%s6407_s1 + $0x1158] sm:$0xff]  ;;  %v669_v49 = vld [vmem:[%s6407_s1 + $0x11e0] sm:$0xff] }
  0xfc   :  { %1790 = vmatpush.msrb.mxu0 %v554_v50  ;;  %1809 = vmatpush.msrb.mxu1 %v571_v51  ;;  %v619_v50 = vld [vmem:[%s6407_s1 + $0x1050] sm:$0xff]  ;;  %v636_v51 = vld [vmem:[%s6407_s1 + $0x10d8] sm:$0xff] }
  0xfd   :  { %1830 = vmatpush.msrb.mxu2 %v586_v52  ;;  %1849 = vmatpush.msrb.mxu3 %v603_v53  ;;  %v651_v52 = vld [vmem:[%s6407_s1 + $0x1150] sm:$0xff]  ;;  %v668_v53 = vld [vmem:[%s6407_s1 + $0x11d8] sm:$0xff] }
  0xfe   :  { %1791 = vmatpush.msrb.mxu0 %v553_v54  ;;  %1810 = vmatpush.msrb.mxu1 %v570_v55  ;;  %v618_v54 = vld [vmem:[%s6407_s1 + $0x1048] sm:$0xff]  ;;  %v635_v55 = vld [vmem:[%s6407_s1 + $0x10d0] sm:$0xff] }
  0xff   :  { %1831 = vmatpush.msrb.mxu2 %v585_v56  ;;  %1850 = vmatpush.msrb.mxu3 %v602_v57  ;;  %v650_v56 = vld [vmem:[%s6407_s1 + $0x1148] sm:$0xff]  ;;  %v667_v57 = vld [vmem:[%s6407_s1 + $0x11d0] sm:$0xff] }
 0x100   :  { %1792 = vmatpush.msrb.mxu0 %v552_v58  ;;  %1811 = vmatpush.msrb.mxu1 %v569_v59  ;;  %v617_v58 = vld [vmem:[%s6407_s1 + $0x1040] sm:$0xff]  ;;  %v634_v59 = vld [vmem:[%s6407_s1 + $0x10c8] sm:$0xff] }
 0x101   :  { %1832 = vmatpush.msrb.mxu2 %v584_v60  ;;  %1851 = vmatpush.msrb.mxu3 %v601_v61  ;;  %v649_v60 = vld [vmem:[%s6407_s1 + $0x1140] sm:$0xff]  ;;  %v666_v61 = vld [vmem:[%s6407_s1 + $0x11c8] sm:$0xff] }
 0x102   :  { %1793 = vmatpush.msrb.mxu0 %v551_v62  ;;  %1812 = vmatpush.msrb.mxu1 %v568_v63  ;;  %v616_v62 = vld [vmem:[%s6407_s1 + $0x1038] sm:$0xff]  ;;  %v633_v63 = vld [vmem:[%s6407_s1 + $0x10c0] sm:$0xff] }
 0x103   :  { %1833 = vmatpush.msrb.mxu2 %v583_v0  ;;  %1852 = vmatpush.msrb.mxu3 %v600_v1  ;;  %v648_v0 = vld [vmem:[%s6407_s1 + $0x1138] sm:$0xff]  ;;  %v665_v1 = vld [vmem:[%s6407_s1 + $0x11c0] sm:$0xff] }
 0x104   :  { %1794 = vmatpush.msrb.mxu0 %v550_v2  ;;  %1813 = vmatpush.msrb.mxu1 %v567_v3  ;;  %v615_v2 = vld [vmem:[%s6407_s1 + $0x1030] sm:$0xff]  ;;  %v632_v3 = vld [vmem:[%s6407_s1 + $0x10b8] sm:$0xff] }
 0x105   :  { %1834 = vmatpush.msrb.mxu2 %v582_v4  ;;  %1853 = vmatpush.msrb.mxu3 %v599_v5  ;;  %v647_v4 = vld [vmem:[%s6407_s1 + $0x1130] sm:$0xff]  ;;  %v664_v5 = vld [vmem:[%s6407_s1 + $0x11b8] sm:$0xff] }
 0x106   :  { %1795 = vmatpush.msrb.mxu0 %v549_v6  ;;  %1814 = vmatpush.msrb.mxu1 %v566_v7  ;;  %v614_v6 = vld [vmem:[%s6407_s1 + $0x1028] sm:$0xff]  ;;  %v631_v7 = vld [vmem:[%s6407_s1 + $0x10b0] sm:$0xff] }
 0x107   :  { %1835 = vmatpush.msrb.mxu2 %v581_v8  ;;  %1854 = vmatpush.msrb.mxu3 %v598_v9  ;;  %v646_v8 = vld [vmem:[%s6407_s1 + $0x1128] sm:$0xff]  ;;  %v663_v9 = vld [vmem:[%s6407_s1 + $0x11b0] sm:$0xff] }
 0x108   :  { %1796 = vmatpush.msrb.mxu0 %v548_v10  ;;  %1815 = vmatpush.msrb.mxu1 %v565_v11  ;;  %v613_v10 = vld [vmem:[%s6407_s1 + $0x1020] sm:$0xff]  ;;  %v630_v11 = vld [vmem:[%s6407_s1 + $0x10a8] sm:$0xff] }
 0x109   :  { %1836 = vmatpush.msrb.mxu2 %v580_v12  ;;  %1855 = vmatpush.msrb.mxu3 %v597_v13  ;;  %v645_v12 = vld [vmem:[%s6407_s1 + $0x1120] sm:$0xff]  ;;  %v662_v13 = vld [vmem:[%s6407_s1 + $0x11a8] sm:$0xff] }
 0x10a   :  { %1797 = vmatpush.msrb.mxu0 %v547_v14  ;;  %1816 = vmatpush.msrb.mxu1 %v564_v15  ;;  %v612_v14 = vld [vmem:[%s6407_s1 + $0x1018] sm:$0xff]  ;;  %v629_v15 = vld [vmem:[%s6407_s1 + $0x10a0] sm:$0xff] }
 0x10b   :  { %1837 = vmatpush.msrb.mxu2 %v579_v16  ;;  %1856 = vmatpush.msrb.mxu3 %v596_v17  ;;  %v644_v16 = vld [vmem:[%s6407_s1 + $0x1118] sm:$0xff]  ;;  %v661_v17 = vld [vmem:[%s6407_s1 + $0x11a0] sm:$0xff] }
 0x10c   :  { %1798 = vmatpush.msrb.mxu0 %v546_v18  ;;  %1817 = vmatpush.msrb.mxu1 %v563_v19  ;;  %v611_v18 = vld [vmem:[%s6407_s1 + $0x1010] sm:$0xff]  ;;  %v628_v19 = vld [vmem:[%s6407_s1 + $0x1098] sm:$0xff] }
 0x10d   :  { %1838 = vmatpush.msrb.mxu2 %v578_v20  ;;  %1857 = vmatpush.msrb.mxu3 %v595_v21  ;;  %v643_v20 = vld [vmem:[%s6407_s1 + $0x1110] sm:$0xff]  ;;  %v660_v21 = vld [vmem:[%s6407_s1 + $0x1198] sm:$0xff] }
 0x10e   :  { %1799 = vmatpush.msrb.mxu0 %v545_v22  ;;  %1818 = vmatpush.msrb.mxu1 %v562_v23  ;;  %v610_v22 = vld [vmem:[%s6407_s1 + $0x1008] sm:$0xff]  ;;  %v627_v23 = vld [vmem:[%s6407_s1 + $0x1090] sm:$0xff] }
 0x10f   :  { %1839 = vmatpush.msrb.mxu2 %v577_v24  ;;  %1858 = vmatpush.msrb.mxu3 %v594_v25  ;;  %v642_v24 = vld [vmem:[%s6407_s1 + $0x1108] sm:$0xff]  ;;  %v659_v25 = vld [vmem:[%s6407_s1 + $0x1190] sm:$0xff] }
 0x110   :  { %1800 = vmatmul.f32.vlgmr.msrb.gmra.mxu0 %v55_v26  ;;  %1840 = vmatmul.f32.vlgmr.msrb.gmra.mxu2 %v57_v27  ;;  %v609_v26 = vld [vmem:[%s6407_s1 + $0x1000] sm:$0xff]  ;;  %v626_v27 = vld [vmem:[%s6407_s1 + $0x1088] sm:$0xff] }
 0x111   :  { %1864 = vmatpush.msra.mxu0 %v624_v28  ;;  %1904 = vmatpush.msra.mxu2 %v656_v29  ;;  %v641_v28 = vld [vmem:[%s6407_s1 + $0x1100] sm:$0xff]  ;;  %v658_v29 = vld [vmem:[%s6407_s1 + $0x1188] sm:$0xff] }
 0x112   :  { %1819 = vmatpush.msrb.mxu1 %v561_v30  ;;  %1859 = vmatpush.msrb.mxu3 %v593_v31  ;;  %v59_v30 = vld [vmem:[%s6406_s0 + $0x100] sm:$0xff]  ;;  %v61_v31 = vld [vmem:[%s6406_s0 + $0x110] sm:$0xff] }
 0x113   :  { %1820 = vmatmul.f32.vlgmr.msrb.gmra.mxu1 %v56_v32  ;;  %1860 = vmatmul.f32.vlgmr.msrb.gmra.mxu3 %v58_v33  ;;  %v688_v32 = vld [vmem:[%s6407_s1 + $0x1278] sm:$0xff] }
 0x114   :  { %1865 = vmatpush.msra.mxu0 %v623_v34  ;;  %1884 = vmatpush.msra.mxu1 %v640_v35  ;;  %v720_v33 = vld [vmem:[%s6407_s1 + $0x1378] sm:$0xff]  ;;  %v625_v34 = vld [vmem:[%s6407_s1 + $0x1080] sm:$0xff] }
 0x115   :  { %1905 = vmatpush.msra.mxu2 %v655_v36  ;;  %1924 = vmatpush.msra.mxu3 %v672_v37  ;;  %v657_v35 = vld [vmem:[%s6407_s1 + $0x1180] sm:$0xff]  ;;  %v60_v36 = vld [vmem:[%s6406_s0 + $0x108] sm:$0xff]  ;;  %v62_v37 = vld [vmem:[%s6406_s0 + $0x118] sm:$0xff] }
 0x116   :  { %1866 = vmatpush.msra.mxu0 %v622_v38  ;;  %1885 = vmatpush.msra.mxu1 %v639_v39  ;;  %v687_v38 = vld [vmem:[%s6407_s1 + $0x1270] sm:$0xff]  ;;  %v704_v39 = vld [vmem:[%s6407_s1 + $0x12f8] sm:$0xff] }
 0x117   :  { %1906 = vmatpush.msra.mxu2 %v654_v40  ;;  %1925 = vmatpush.msra.mxu3 %v671_v41  ;;  %v719_v40 = vld [vmem:[%s6407_s1 + $0x1370] sm:$0xff]  ;;  %v736_v41 = vld [vmem:[%s6407_s1 + $0x13f8] sm:$0xff] }
 0x118   :  { %1867 = vmatpush.msra.mxu0 %v621_v42  ;;  %1886 = vmatpush.msra.mxu1 %v638_v43  ;;  %v686_v42 = vld [vmem:[%s6407_s1 + $0x1268] sm:$0xff]  ;;  %v703_v43 = vld [vmem:[%s6407_s1 + $0x12f0] sm:$0xff] }
 0x119   :  { %1907 = vmatpush.msra.mxu2 %v653_v44  ;;  %1926 = vmatpush.msra.mxu3 %v670_v45  ;;  %v718_v44 = vld [vmem:[%s6407_s1 + $0x1368] sm:$0xff]  ;;  %v735_v45 = vld [vmem:[%s6407_s1 + $0x13f0] sm:$0xff] }
 0x11a   :  { %1868 = vmatpush.msra.mxu0 %v620_v46  ;;  %1887 = vmatpush.msra.mxu1 %v637_v47  ;;  %v685_v46 = vld [vmem:[%s6407_s1 + $0x1260] sm:$0xff]  ;;  %v702_v47 = vld [vmem:[%s6407_s1 + $0x12e8] sm:$0xff] }
 0x11b   :  { %1908 = vmatpush.msra.mxu2 %v652_v48  ;;  %1927 = vmatpush.msra.mxu3 %v669_v49  ;;  %v717_v48 = vld [vmem:[%s6407_s1 + $0x1360] sm:$0xff]  ;;  %v734_v49 = vld [vmem:[%s6407_s1 + $0x13e8] sm:$0xff] }
 0x11c   :  { %1869 = vmatpush.msra.mxu0 %v619_v50  ;;  %1888 = vmatpush.msra.mxu1 %v636_v51  ;;  %v684_v50 = vld [vmem:[%s6407_s1 + $0x1258] sm:$0xff]  ;;  %v701_v51 = vld [vmem:[%s6407_s1 + $0x12e0] sm:$0xff] }
 0x11d   :  { %1909 = vmatpush.msra.mxu2 %v651_v52  ;;  %1928 = vmatpush.msra.mxu3 %v668_v53  ;;  %v716_v52 = vld [vmem:[%s6407_s1 + $0x1358] sm:$0xff]  ;;  %v733_v53 = vld [vmem:[%s6407_s1 + $0x13e0] sm:$0xff] }
 0x11e   :  { %1870 = vmatpush.msra.mxu0 %v618_v54  ;;  %1889 = vmatpush.msra.mxu1 %v635_v55  ;;  %v683_v54 = vld [vmem:[%s6407_s1 + $0x1250] sm:$0xff]  ;;  %v700_v55 = vld [vmem:[%s6407_s1 + $0x12d8] sm:$0xff] }
 0x11f   :  { %1910 = vmatpush.msra.mxu2 %v650_v56  ;;  %1929 = vmatpush.msra.mxu3 %v667_v57  ;;  %v715_v56 = vld [vmem:[%s6407_s1 + $0x1350] sm:$0xff]  ;;  %v732_v57 = vld [vmem:[%s6407_s1 + $0x13d8] sm:$0xff] }
 0x120   :  { %1871 = vmatpush.msra.mxu0 %v617_v58  ;;  %1890 = vmatpush.msra.mxu1 %v634_v59  ;;  %v682_v58 = vld [vmem:[%s6407_s1 + $0x1248] sm:$0xff]  ;;  %v699_v59 = vld [vmem:[%s6407_s1 + $0x12d0] sm:$0xff] }
 0x121   :  { %1911 = vmatpush.msra.mxu2 %v649_v60  ;;  %1930 = vmatpush.msra.mxu3 %v666_v61  ;;  %v714_v60 = vld [vmem:[%s6407_s1 + $0x1348] sm:$0xff]  ;;  %v731_v61 = vld [vmem:[%s6407_s1 + $0x13d0] sm:$0xff] }
 0x122   :  { %1872 = vmatpush.msra.mxu0 %v616_v62  ;;  %1891 = vmatpush.msra.mxu1 %v633_v63  ;;  %v681_v62 = vld [vmem:[%s6407_s1 + $0x1240] sm:$0xff]  ;;  %v698_v63 = vld [vmem:[%s6407_s1 + $0x12c8] sm:$0xff] }
 0x123   :  { %1912 = vmatpush.msra.mxu2 %v648_v0  ;;  %1931 = vmatpush.msra.mxu3 %v665_v1  ;;  %v713_v0 = vld [vmem:[%s6407_s1 + $0x1340] sm:$0xff]  ;;  %v730_v1 = vld [vmem:[%s6407_s1 + $0x13c8] sm:$0xff] }
 0x124   :  { %1873 = vmatpush.msra.mxu0 %v615_v2  ;;  %1892 = vmatpush.msra.mxu1 %v632_v3  ;;  %v680_v2 = vld [vmem:[%s6407_s1 + $0x1238] sm:$0xff]  ;;  %v697_v3 = vld [vmem:[%s6407_s1 + $0x12c0] sm:$0xff] }
 0x125   :  { %1913 = vmatpush.msra.mxu2 %v647_v4  ;;  %1932 = vmatpush.msra.mxu3 %v664_v5  ;;  %v712_v4 = vld [vmem:[%s6407_s1 + $0x1338] sm:$0xff]  ;;  %v729_v5 = vld [vmem:[%s6407_s1 + $0x13c0] sm:$0xff] }
 0x126   :  { %1874 = vmatpush.msra.mxu0 %v614_v6  ;;  %1893 = vmatpush.msra.mxu1 %v631_v7  ;;  %v679_v6 = vld [vmem:[%s6407_s1 + $0x1230] sm:$0xff]  ;;  %v696_v7 = vld [vmem:[%s6407_s1 + $0x12b8] sm:$0xff] }
 0x127   :  { %1914 = vmatpush.msra.mxu2 %v646_v8  ;;  %1933 = vmatpush.msra.mxu3 %v663_v9  ;;  %v711_v8 = vld [vmem:[%s6407_s1 + $0x1330] sm:$0xff]  ;;  %v728_v9 = vld [vmem:[%s6407_s1 + $0x13b8] sm:$0xff] }
 0x128   :  { %1875 = vmatpush.msra.mxu0 %v613_v10  ;;  %1894 = vmatpush.msra.mxu1 %v630_v11  ;;  %v678_v10 = vld [vmem:[%s6407_s1 + $0x1228] sm:$0xff]  ;;  %v695_v11 = vld [vmem:[%s6407_s1 + $0x12b0] sm:$0xff] }
 0x129   :  { %1915 = vmatpush.msra.mxu2 %v645_v12  ;;  %1934 = vmatpush.msra.mxu3 %v662_v13  ;;  %v710_v12 = vld [vmem:[%s6407_s1 + $0x1328] sm:$0xff]  ;;  %v727_v13 = vld [vmem:[%s6407_s1 + $0x13b0] sm:$0xff] }
 0x12a   :  { %1876 = vmatpush.msra.mxu0 %v612_v14  ;;  %1895 = vmatpush.msra.mxu1 %v629_v15  ;;  %v677_v14 = vld [vmem:[%s6407_s1 + $0x1220] sm:$0xff]  ;;  %v694_v15 = vld [vmem:[%s6407_s1 + $0x12a8] sm:$0xff] }
 0x12b   :  { %1916 = vmatpush.msra.mxu2 %v644_v16  ;;  %1935 = vmatpush.msra.mxu3 %v661_v17  ;;  %v709_v16 = vld [vmem:[%s6407_s1 + $0x1320] sm:$0xff]  ;;  %v726_v17 = vld [vmem:[%s6407_s1 + $0x13a8] sm:$0xff] }
 0x12c   :  { %1877 = vmatpush.msra.mxu0 %v611_v18  ;;  %1896 = vmatpush.msra.mxu1 %v628_v19  ;;  %v676_v18 = vld [vmem:[%s6407_s1 + $0x1218] sm:$0xff]  ;;  %v693_v19 = vld [vmem:[%s6407_s1 + $0x12a0] sm:$0xff] }
 0x12d   :  { %1917 = vmatpush.msra.mxu2 %v643_v20  ;;  %1936 = vmatpush.msra.mxu3 %v660_v21  ;;  %v708_v20 = vld [vmem:[%s6407_s1 + $0x1318] sm:$0xff]  ;;  %v725_v21 = vld [vmem:[%s6407_s1 + $0x13a0] sm:$0xff] }
 0x12e   :  { %1878 = vmatpush.msra.mxu0 %v610_v22  ;;  %1897 = vmatpush.msra.mxu1 %v627_v23  ;;  %v675_v22 = vld [vmem:[%s6407_s1 + $0x1210] sm:$0xff]  ;;  %v692_v23 = vld [vmem:[%s6407_s1 + $0x1298] sm:$0xff] }
 0x12f   :  { %1918 = vmatpush.msra.mxu2 %v642_v24  ;;  %1937 = vmatpush.msra.mxu3 %v659_v25  ;;  %v707_v24 = vld [vmem:[%s6407_s1 + $0x1310] sm:$0xff]  ;;  %v724_v25 = vld [vmem:[%s6407_s1 + $0x1398] sm:$0xff] }
 0x130   :  { %1879 = vmatpush.msra.mxu0 %v609_v26  ;;  %1898 = vmatpush.msra.mxu1 %v626_v27  ;;  %v674_v26 = vld [vmem:[%s6407_s1 + $0x1208] sm:$0xff]  ;;  %v691_v27 = vld [vmem:[%s6407_s1 + $0x1290] sm:$0xff] }
 0x131   :  { %1919 = vmatpush.msra.mxu2 %v641_v28  ;;  %1938 = vmatpush.msra.mxu3 %v658_v29  ;;  %v706_v28 = vld [vmem:[%s6407_s1 + $0x1308] sm:$0xff]  ;;  %v723_v29 = vld [vmem:[%s6407_s1 + $0x1390] sm:$0xff] }
 0x132   :  { %1880 = vmatmul.f32.vlgmr.msra.gmra.mxu0 %v59_v30  ;;  %1920 = vmatmul.f32.vlgmr.msra.gmra.mxu2 %v61_v31  ;;  %v673_v30 = vld [vmem:[%s6407_s1 + $0x1200] sm:$0xff]  ;;  %v690_v31 = vld [vmem:[%s6407_s1 + $0x1288] sm:$0xff] }
 0x133   :  { %1944 = vmatpush.msrb.mxu0 %v688_v32  ;;  %1984 = vmatpush.msrb.mxu2 %v720_v33  ;;  %v705_v32 = vld [vmem:[%s6407_s1 + $0x1300] sm:$0xff]  ;;  %v722_v33 = vld [vmem:[%s6407_s1 + $0x1388] sm:$0xff] }
 0x134   :  { %1899 = vmatpush.msra.mxu1 %v625_v34  ;;  %1939 = vmatpush.msra.mxu3 %v657_v35  ;;  %v63_v34 = vld [vmem:[%s6406_s0 + $0x120] sm:$0xff]  ;;  %v65_v35 = vld [vmem:[%s6406_s0 + $0x130] sm:$0xff] }
 0x135   :  { %1900 = vmatmul.f32.vlgmr.msra.gmra.mxu1 %v60_v36  ;;  %1940 = vmatmul.f32.vlgmr.msra.gmra.mxu3 %v62_v37  ;;  %v752_v36 = vld [vmem:[%s6407_s1 + $0x1478] sm:$0xff] }
 0x136   :  { %1945 = vmatpush.msrb.mxu0 %v687_v38  ;;  %1964 = vmatpush.msrb.mxu1 %v704_v39  ;;  %v784_v37 = vld [vmem:[%s6407_s1 + $0x1578] sm:$0xff]  ;;  %v689_v38 = vld [vmem:[%s6407_s1 + $0x1280] sm:$0xff] }
 0x137   :  { %1985 = vmatpush.msrb.mxu2 %v719_v40  ;;  %2004 = vmatpush.msrb.mxu3 %v736_v41  ;;  %v721_v39 = vld [vmem:[%s6407_s1 + $0x1380] sm:$0xff]  ;;  %v64_v40 = vld [vmem:[%s6406_s0 + $0x128] sm:$0xff]  ;;  %v66_v41 = vld [vmem:[%s6406_s0 + $0x138] sm:$0xff] }
 0x138   :  { %1946 = vmatpush.msrb.mxu0 %v686_v42  ;;  %1965 = vmatpush.msrb.mxu1 %v703_v43  ;;  %v751_v42 = vld [vmem:[%s6407_s1 + $0x1470] sm:$0xff]  ;;  %v768_v43 = vld [vmem:[%s6407_s1 + $0x14f8] sm:$0xff] }
 0x139   :  { %1986 = vmatpush.msrb.mxu2 %v718_v44  ;;  %2005 = vmatpush.msrb.mxu3 %v735_v45  ;;  %v783_v44 = vld [vmem:[%s6407_s1 + $0x1570] sm:$0xff]  ;;  %v800_v45 = vld [vmem:[%s6407_s1 + $0x15f8] sm:$0xff] }
 0x13a   :  { %1947 = vmatpush.msrb.mxu0 %v685_v46  ;;  %1966 = vmatpush.msrb.mxu1 %v702_v47  ;;  %v750_v46 = vld [vmem:[%s6407_s1 + $0x1468] sm:$0xff]  ;;  %v767_v47 = vld [vmem:[%s6407_s1 + $0x14f0] sm:$0xff] }
 0x13b   :  { %1987 = vmatpush.msrb.mxu2 %v717_v48  ;;  %2006 = vmatpush.msrb.mxu3 %v734_v49  ;;  %v782_v48 = vld [vmem:[%s6407_s1 + $0x1568] sm:$0xff]  ;;  %v799_v49 = vld [vmem:[%s6407_s1 + $0x15f0] sm:$0xff] }
 0x13c   :  { %1948 = vmatpush.msrb.mxu0 %v684_v50  ;;  %1967 = vmatpush.msrb.mxu1 %v701_v51  ;;  %v749_v50 = vld [vmem:[%s6407_s1 + $0x1460] sm:$0xff]  ;;  %v766_v51 = vld [vmem:[%s6407_s1 + $0x14e8] sm:$0xff] }
 0x13d   :  { %1988 = vmatpush.msrb.mxu2 %v716_v52  ;;  %2007 = vmatpush.msrb.mxu3 %v733_v53  ;;  %v781_v52 = vld [vmem:[%s6407_s1 + $0x1560] sm:$0xff]  ;;  %v798_v53 = vld [vmem:[%s6407_s1 + $0x15e8] sm:$0xff] }
 0x13e   :  { %1949 = vmatpush.msrb.mxu0 %v683_v54  ;;  %1968 = vmatpush.msrb.mxu1 %v700_v55  ;;  %v748_v54 = vld [vmem:[%s6407_s1 + $0x1458] sm:$0xff]  ;;  %v765_v55 = vld [vmem:[%s6407_s1 + $0x14e0] sm:$0xff] }
 0x13f   :  { %1989 = vmatpush.msrb.mxu2 %v715_v56  ;;  %2008 = vmatpush.msrb.mxu3 %v732_v57  ;;  %v780_v56 = vld [vmem:[%s6407_s1 + $0x1558] sm:$0xff]  ;;  %v797_v57 = vld [vmem:[%s6407_s1 + $0x15e0] sm:$0xff] }
 0x140   :  { %1950 = vmatpush.msrb.mxu0 %v682_v58  ;;  %1969 = vmatpush.msrb.mxu1 %v699_v59  ;;  %v747_v58 = vld [vmem:[%s6407_s1 + $0x1450] sm:$0xff]  ;;  %v764_v59 = vld [vmem:[%s6407_s1 + $0x14d8] sm:$0xff] }
 0x141   :  { %1990 = vmatpush.msrb.mxu2 %v714_v60  ;;  %2009 = vmatpush.msrb.mxu3 %v731_v61  ;;  %v779_v60 = vld [vmem:[%s6407_s1 + $0x1550] sm:$0xff]  ;;  %v796_v61 = vld [vmem:[%s6407_s1 + $0x15d8] sm:$0xff] }
 0x142   :  { %1951 = vmatpush.msrb.mxu0 %v681_v62  ;;  %1970 = vmatpush.msrb.mxu1 %v698_v63  ;;  %v746_v62 = vld [vmem:[%s6407_s1 + $0x1448] sm:$0xff]  ;;  %v763_v63 = vld [vmem:[%s6407_s1 + $0x14d0] sm:$0xff] }
 0x143   :  { %1991 = vmatpush.msrb.mxu2 %v713_v0  ;;  %2010 = vmatpush.msrb.mxu3 %v730_v1  ;;  %v778_v0 = vld [vmem:[%s6407_s1 + $0x1548] sm:$0xff]  ;;  %v795_v1 = vld [vmem:[%s6407_s1 + $0x15d0] sm:$0xff] }
 0x144   :  { %1952 = vmatpush.msrb.mxu0 %v680_v2  ;;  %1971 = vmatpush.msrb.mxu1 %v697_v3  ;;  %v745_v2 = vld [vmem:[%s6407_s1 + $0x1440] sm:$0xff]  ;;  %v762_v3 = vld [vmem:[%s6407_s1 + $0x14c8] sm:$0xff] }
 0x145   :  { %1992 = vmatpush.msrb.mxu2 %v712_v4  ;;  %2011 = vmatpush.msrb.mxu3 %v729_v5  ;;  %v777_v4 = vld [vmem:[%s6407_s1 + $0x1540] sm:$0xff]  ;;  %v794_v5 = vld [vmem:[%s6407_s1 + $0x15c8] sm:$0xff] }
 0x146   :  { %1953 = vmatpush.msrb.mxu0 %v679_v6  ;;  %1972 = vmatpush.msrb.mxu1 %v696_v7  ;;  %v744_v6 = vld [vmem:[%s6407_s1 + $0x1438] sm:$0xff]  ;;  %v761_v7 = vld [vmem:[%s6407_s1 + $0x14c0] sm:$0xff] }
 0x147   :  { %1993 = vmatpush.msrb.mxu2 %v711_v8  ;;  %2012 = vmatpush.msrb.mxu3 %v728_v9  ;;  %v776_v8 = vld [vmem:[%s6407_s1 + $0x1538] sm:$0xff]  ;;  %v793_v9 = vld [vmem:[%s6407_s1 + $0x15c0] sm:$0xff] }
 0x148   :  { %1954 = vmatpush.msrb.mxu0 %v678_v10  ;;  %1973 = vmatpush.msrb.mxu1 %v695_v11  ;;  %v743_v10 = vld [vmem:[%s6407_s1 + $0x1430] sm:$0xff]  ;;  %v760_v11 = vld [vmem:[%s6407_s1 + $0x14b8] sm:$0xff] }
 0x149   :  { %1994 = vmatpush.msrb.mxu2 %v710_v12  ;;  %2013 = vmatpush.msrb.mxu3 %v727_v13  ;;  %v775_v12 = vld [vmem:[%s6407_s1 + $0x1530] sm:$0xff]  ;;  %v792_v13 = vld [vmem:[%s6407_s1 + $0x15b8] sm:$0xff] }
 0x14a   :  { %1955 = vmatpush.msrb.mxu0 %v677_v14  ;;  %1974 = vmatpush.msrb.mxu1 %v694_v15  ;;  %v742_v14 = vld [vmem:[%s6407_s1 + $0x1428] sm:$0xff]  ;;  %v759_v15 = vld [vmem:[%s6407_s1 + $0x14b0] sm:$0xff] }
 0x14b   :  { %1995 = vmatpush.msrb.mxu2 %v709_v16  ;;  %2014 = vmatpush.msrb.mxu3 %v726_v17  ;;  %v774_v16 = vld [vmem:[%s6407_s1 + $0x1528] sm:$0xff]  ;;  %v791_v17 = vld [vmem:[%s6407_s1 + $0x15b0] sm:$0xff] }
 0x14c   :  { %1956 = vmatpush.msrb.mxu0 %v676_v18  ;;  %1975 = vmatpush.msrb.mxu1 %v693_v19  ;;  %v741_v18 = vld [vmem:[%s6407_s1 + $0x1420] sm:$0xff]  ;;  %v758_v19 = vld [vmem:[%s6407_s1 + $0x14a8] sm:$0xff] }
 0x14d   :  { %1996 = vmatpush.msrb.mxu2 %v708_v20  ;;  %2015 = vmatpush.msrb.mxu3 %v725_v21  ;;  %v773_v20 = vld [vmem:[%s6407_s1 + $0x1520] sm:$0xff]  ;;  %v790_v21 = vld [vmem:[%s6407_s1 + $0x15a8] sm:$0xff] }
 0x14e   :  { %1957 = vmatpush.msrb.mxu0 %v675_v22  ;;  %1976 = vmatpush.msrb.mxu1 %v692_v23  ;;  %v740_v22 = vld [vmem:[%s6407_s1 + $0x1418] sm:$0xff]  ;;  %v757_v23 = vld [vmem:[%s6407_s1 + $0x14a0] sm:$0xff] }
 0x14f   :  { %1997 = vmatpush.msrb.mxu2 %v707_v24  ;;  %2016 = vmatpush.msrb.mxu3 %v724_v25  ;;  %v772_v24 = vld [vmem:[%s6407_s1 + $0x1518] sm:$0xff]  ;;  %v789_v25 = vld [vmem:[%s6407_s1 + $0x15a0] sm:$0xff] }
 0x150   :  { %1958 = vmatpush.msrb.mxu0 %v674_v26  ;;  %1977 = vmatpush.msrb.mxu1 %v691_v27  ;;  %v739_v26 = vld [vmem:[%s6407_s1 + $0x1410] sm:$0xff]  ;;  %v756_v27 = vld [vmem:[%s6407_s1 + $0x1498] sm:$0xff] }
 0x151   :  { %1998 = vmatpush.msrb.mxu2 %v706_v28  ;;  %2017 = vmatpush.msrb.mxu3 %v723_v29  ;;  %v771_v28 = vld [vmem:[%s6407_s1 + $0x1510] sm:$0xff]  ;;  %v788_v29 = vld [vmem:[%s6407_s1 + $0x1598] sm:$0xff] }
 0x152   :  { %1959 = vmatpush.msrb.mxu0 %v673_v30  ;;  %1978 = vmatpush.msrb.mxu1 %v690_v31  ;;  %v738_v30 = vld [vmem:[%s6407_s1 + $0x1408] sm:$0xff]  ;;  %v755_v31 = vld [vmem:[%s6407_s1 + $0x1490] sm:$0xff] }
 0x153   :  { %1999 = vmatpush.msrb.mxu2 %v705_v32  ;;  %2018 = vmatpush.msrb.mxu3 %v722_v33  ;;  %v770_v32 = vld [vmem:[%s6407_s1 + $0x1508] sm:$0xff]  ;;  %v787_v33 = vld [vmem:[%s6407_s1 + $0x1590] sm:$0xff] }
 0x154   :  { %1960 = vmatmul.f32.vlgmr.msrb.gmra.mxu0 %v63_v34  ;;  %2000 = vmatmul.f32.vlgmr.msrb.gmra.mxu2 %v65_v35  ;;  %v737_v34 = vld [vmem:[%s6407_s1 + $0x1400] sm:$0xff]  ;;  %v754_v35 = vld [vmem:[%s6407_s1 + $0x1488] sm:$0xff] }
 0x155   :  { %2024 = vmatpush.msra.mxu0 %v752_v36  ;;  %2064 = vmatpush.msra.mxu2 %v784_v37  ;;  %v769_v36 = vld [vmem:[%s6407_s1 + $0x1500] sm:$0xff]  ;;  %v786_v37 = vld [vmem:[%s6407_s1 + $0x1588] sm:$0xff] }
 0x156   :  { %1979 = vmatpush.msrb.mxu1 %v689_v38  ;;  %2019 = vmatpush.msrb.mxu3 %v721_v39  ;;  %v67_v38 = vld [vmem:[%s6406_s0 + $0x140] sm:$0xff]  ;;  %v69_v39 = vld [vmem:[%s6406_s0 + $0x150] sm:$0xff] }
 0x157   :  { %1980 = vmatmul.f32.vlgmr.msrb.gmra.mxu1 %v64_v40  ;;  %2020 = vmatmul.f32.vlgmr.msrb.gmra.mxu3 %v66_v41  ;;  %v816_v40 = vld [vmem:[%s6407_s1 + $0x1678] sm:$0xff] }
 0x158   :  { %2025 = vmatpush.msra.mxu0 %v751_v42  ;;  %2044 = vmatpush.msra.mxu1 %v768_v43  ;;  %v848_v41 = vld [vmem:[%s6407_s1 + $0x1778] sm:$0xff]  ;;  %v753_v42 = vld [vmem:[%s6407_s1 + $0x1480] sm:$0xff] }
 0x159   :  { %2065 = vmatpush.msra.mxu2 %v783_v44  ;;  %2084 = vmatpush.msra.mxu3 %v800_v45  ;;  %v785_v43 = vld [vmem:[%s6407_s1 + $0x1580] sm:$0xff]  ;;  %v68_v44 = vld [vmem:[%s6406_s0 + $0x148] sm:$0xff]  ;;  %v70_v45 = vld [vmem:[%s6406_s0 + $0x158] sm:$0xff] }
 0x15a   :  { %2026 = vmatpush.msra.mxu0 %v750_v46  ;;  %2045 = vmatpush.msra.mxu1 %v767_v47  ;;  %v815_v46 = vld [vmem:[%s6407_s1 + $0x1670] sm:$0xff]  ;;  %v832_v47 = vld [vmem:[%s6407_s1 + $0x16f8] sm:$0xff] }
 0x15b   :  { %2066 = vmatpush.msra.mxu2 %v782_v48  ;;  %2085 = vmatpush.msra.mxu3 %v799_v49  ;;  %v847_v48 = vld [vmem:[%s6407_s1 + $0x1770] sm:$0xff]  ;;  %v864_v49 = vld [vmem:[%s6407_s1 + $0x17f8] sm:$0xff] }
 0x15c   :  { %2027 = vmatpush.msra.mxu0 %v749_v50  ;;  %2046 = vmatpush.msra.mxu1 %v766_v51  ;;  %v814_v50 = vld [vmem:[%s6407_s1 + $0x1668] sm:$0xff]  ;;  %v831_v51 = vld [vmem:[%s6407_s1 + $0x16f0] sm:$0xff] }
 0x15d   :  { %2067 = vmatpush.msra.mxu2 %v781_v52  ;;  %2086 = vmatpush.msra.mxu3 %v798_v53  ;;  %v846_v52 = vld [vmem:[%s6407_s1 + $0x1768] sm:$0xff]  ;;  %v863_v53 = vld [vmem:[%s6407_s1 + $0x17f0] sm:$0xff] }
 0x15e   :  { %2028 = vmatpush.msra.mxu0 %v748_v54  ;;  %2047 = vmatpush.msra.mxu1 %v765_v55  ;;  %v813_v54 = vld [vmem:[%s6407_s1 + $0x1660] sm:$0xff]  ;;  %v830_v55 = vld [vmem:[%s6407_s1 + $0x16e8] sm:$0xff] }
 0x15f   :  { %2068 = vmatpush.msra.mxu2 %v780_v56  ;;  %2087 = vmatpush.msra.mxu3 %v797_v57  ;;  %v845_v56 = vld [vmem:[%s6407_s1 + $0x1760] sm:$0xff]  ;;  %v862_v57 = vld [vmem:[%s6407_s1 + $0x17e8] sm:$0xff] }
 0x160   :  { %2029 = vmatpush.msra.mxu0 %v747_v58  ;;  %2048 = vmatpush.msra.mxu1 %v764_v59  ;;  %v812_v58 = vld [vmem:[%s6407_s1 + $0x1658] sm:$0xff]  ;;  %v829_v59 = vld [vmem:[%s6407_s1 + $0x16e0] sm:$0xff] }
 0x161   :  { %2069 = vmatpush.msra.mxu2 %v779_v60  ;;  %2088 = vmatpush.msra.mxu3 %v796_v61  ;;  %v844_v60 = vld [vmem:[%s6407_s1 + $0x1758] sm:$0xff]  ;;  %v861_v61 = vld [vmem:[%s6407_s1 + $0x17e0] sm:$0xff] }
 0x162   :  { %2030 = vmatpush.msra.mxu0 %v746_v62  ;;  %2049 = vmatpush.msra.mxu1 %v763_v63  ;;  %v811_v62 = vld [vmem:[%s6407_s1 + $0x1650] sm:$0xff]  ;;  %v828_v63 = vld [vmem:[%s6407_s1 + $0x16d8] sm:$0xff] }
 0x163   :  { %2070 = vmatpush.msra.mxu2 %v778_v0  ;;  %2089 = vmatpush.msra.mxu3 %v795_v1  ;;  %v843_v0 = vld [vmem:[%s6407_s1 + $0x1750] sm:$0xff]  ;;  %v860_v1 = vld [vmem:[%s6407_s1 + $0x17d8] sm:$0xff] }
 0x164   :  { %2031 = vmatpush.msra.mxu0 %v745_v2  ;;  %2050 = vmatpush.msra.mxu1 %v762_v3  ;;  %v810_v2 = vld [vmem:[%s6407_s1 + $0x1648] sm:$0xff]  ;;  %v827_v3 = vld [vmem:[%s6407_s1 + $0x16d0] sm:$0xff] }
 0x165   :  { %2071 = vmatpush.msra.mxu2 %v777_v4  ;;  %2090 = vmatpush.msra.mxu3 %v794_v5  ;;  %v842_v4 = vld [vmem:[%s6407_s1 + $0x1748] sm:$0xff]  ;;  %v859_v5 = vld [vmem:[%s6407_s1 + $0x17d0] sm:$0xff] }
 0x166   :  { %2032 = vmatpush.msra.mxu0 %v744_v6  ;;  %2051 = vmatpush.msra.mxu1 %v761_v7  ;;  %v809_v6 = vld [vmem:[%s6407_s1 + $0x1640] sm:$0xff]  ;;  %v826_v7 = vld [vmem:[%s6407_s1 + $0x16c8] sm:$0xff] }
 0x167   :  { %2072 = vmatpush.msra.mxu2 %v776_v8  ;;  %2091 = vmatpush.msra.mxu3 %v793_v9  ;;  %v841_v8 = vld [vmem:[%s6407_s1 + $0x1740] sm:$0xff]  ;;  %v858_v9 = vld [vmem:[%s6407_s1 + $0x17c8] sm:$0xff] }
 0x168   :  { %2033 = vmatpush.msra.mxu0 %v743_v10  ;;  %2052 = vmatpush.msra.mxu1 %v760_v11  ;;  %v808_v10 = vld [vmem:[%s6407_s1 + $0x1638] sm:$0xff]  ;;  %v825_v11 = vld [vmem:[%s6407_s1 + $0x16c0] sm:$0xff] }
 0x169   :  { %2073 = vmatpush.msra.mxu2 %v775_v12  ;;  %2092 = vmatpush.msra.mxu3 %v792_v13  ;;  %v840_v12 = vld [vmem:[%s6407_s1 + $0x1738] sm:$0xff]  ;;  %v857_v13 = vld [vmem:[%s6407_s1 + $0x17c0] sm:$0xff] }
 0x16a   :  { %2034 = vmatpush.msra.mxu0 %v742_v14  ;;  %2053 = vmatpush.msra.mxu1 %v759_v15  ;;  %v807_v14 = vld [vmem:[%s6407_s1 + $0x1630] sm:$0xff]  ;;  %v824_v15 = vld [vmem:[%s6407_s1 + $0x16b8] sm:$0xff] }
 0x16b   :  { %2074 = vmatpush.msra.mxu2 %v774_v16  ;;  %2093 = vmatpush.msra.mxu3 %v791_v17  ;;  %v839_v16 = vld [vmem:[%s6407_s1 + $0x1730] sm:$0xff]  ;;  %v856_v17 = vld [vmem:[%s6407_s1 + $0x17b8] sm:$0xff] }
 0x16c   :  { %2035 = vmatpush.msra.mxu0 %v741_v18  ;;  %2054 = vmatpush.msra.mxu1 %v758_v19  ;;  %v806_v18 = vld [vmem:[%s6407_s1 + $0x1628] sm:$0xff]  ;;  %v823_v19 = vld [vmem:[%s6407_s1 + $0x16b0] sm:$0xff] }
 0x16d   :  { %2075 = vmatpush.msra.mxu2 %v773_v20  ;;  %2094 = vmatpush.msra.mxu3 %v790_v21  ;;  %v838_v20 = vld [vmem:[%s6407_s1 + $0x1728] sm:$0xff]  ;;  %v855_v21 = vld [vmem:[%s6407_s1 + $0x17b0] sm:$0xff] }
 0x16e   :  { %2036 = vmatpush.msra.mxu0 %v740_v22  ;;  %2055 = vmatpush.msra.mxu1 %v757_v23  ;;  %v805_v22 = vld [vmem:[%s6407_s1 + $0x1620] sm:$0xff]  ;;  %v822_v23 = vld [vmem:[%s6407_s1 + $0x16a8] sm:$0xff] }
 0x16f   :  { %2076 = vmatpush.msra.mxu2 %v772_v24  ;;  %2095 = vmatpush.msra.mxu3 %v789_v25  ;;  %v837_v24 = vld [vmem:[%s6407_s1 + $0x1720] sm:$0xff]  ;;  %v854_v25 = vld [vmem:[%s6407_s1 + $0x17a8] sm:$0xff] }
 0x170   :  { %2037 = vmatpush.msra.mxu0 %v739_v26  ;;  %2056 = vmatpush.msra.mxu1 %v756_v27  ;;  %v804_v26 = vld [vmem:[%s6407_s1 + $0x1618] sm:$0xff]  ;;  %v821_v27 = vld [vmem:[%s6407_s1 + $0x16a0] sm:$0xff] }
 0x171   :  { %2077 = vmatpush.msra.mxu2 %v771_v28  ;;  %2096 = vmatpush.msra.mxu3 %v788_v29  ;;  %v836_v28 = vld [vmem:[%s6407_s1 + $0x1718] sm:$0xff]  ;;  %v853_v29 = vld [vmem:[%s6407_s1 + $0x17a0] sm:$0xff] }
 0x172   :  { %2038 = vmatpush.msra.mxu0 %v738_v30  ;;  %2057 = vmatpush.msra.mxu1 %v755_v31  ;;  %v803_v30 = vld [vmem:[%s6407_s1 + $0x1610] sm:$0xff]  ;;  %v820_v31 = vld [vmem:[%s6407_s1 + $0x1698] sm:$0xff] }
 0x173   :  { %2078 = vmatpush.msra.mxu2 %v770_v32  ;;  %2097 = vmatpush.msra.mxu3 %v787_v33  ;;  %v835_v32 = vld [vmem:[%s6407_s1 + $0x1710] sm:$0xff]  ;;  %v852_v33 = vld [vmem:[%s6407_s1 + $0x1798] sm:$0xff] }
 0x174   :  { %2039 = vmatpush.msra.mxu0 %v737_v34  ;;  %2058 = vmatpush.msra.mxu1 %v754_v35  ;;  %v802_v34 = vld [vmem:[%s6407_s1 + $0x1608] sm:$0xff]  ;;  %v819_v35 = vld [vmem:[%s6407_s1 + $0x1690] sm:$0xff] }
 0x175   :  { %2079 = vmatpush.msra.mxu2 %v769_v36  ;;  %2098 = vmatpush.msra.mxu3 %v786_v37  ;;  %v834_v36 = vld [vmem:[%s6407_s1 + $0x1708] sm:$0xff]  ;;  %v851_v37 = vld [vmem:[%s6407_s1 + $0x1790] sm:$0xff] }
 0x176   :  { %2040 = vmatmul.f32.vlgmr.msra.gmra.mxu0 %v67_v38  ;;  %2080 = vmatmul.f32.vlgmr.msra.gmra.mxu2 %v69_v39  ;;  %v801_v38 = vld [vmem:[%s6407_s1 + $0x1600] sm:$0xff]  ;;  %v818_v39 = vld [vmem:[%s6407_s1 + $0x1688] sm:$0xff] }
 0x177   :  { %2104 = vmatpush.msrb.mxu0 %v816_v40  ;;  %2144 = vmatpush.msrb.mxu2 %v848_v41  ;;  %v833_v40 = vld [vmem:[%s6407_s1 + $0x1700] sm:$0xff]  ;;  %v850_v41 = vld [vmem:[%s6407_s1 + $0x1788] sm:$0xff] }
 0x178   :  { %2059 = vmatpush.msra.mxu1 %v753_v42  ;;  %2099 = vmatpush.msra.mxu3 %v785_v43  ;;  %v71_v42 = vld [vmem:[%s6406_s0 + $0x160] sm:$0xff]  ;;  %v73_v43 = vld [vmem:[%s6406_s0 + $0x170] sm:$0xff] }
 0x179   :  { %2060 = vmatmul.f32.vlgmr.msra.gmra.mxu1 %v68_v44  ;;  %2100 = vmatmul.f32.vlgmr.msra.gmra.mxu3 %v70_v45  ;;  %v880_v44 = vld [vmem:[%s6407_s1 + $0x1878] sm:$0xff] }
 0x17a   :  { %2105 = vmatpush.msrb.mxu0 %v815_v46  ;;  %2124 = vmatpush.msrb.mxu1 %v832_v47  ;;  %v912_v45 = vld [vmem:[%s6407_s1 + $0x1978] sm:$0xff]  ;;  %v817_v46 = vld [vmem:[%s6407_s1 + $0x1680] sm:$0xff] }
 0x17b   :  { %2145 = vmatpush.msrb.mxu2 %v847_v48  ;;  %2164 = vmatpush.msrb.mxu3 %v864_v49  ;;  %v849_v47 = vld [vmem:[%s6407_s1 + $0x1780] sm:$0xff]  ;;  %v72_v48 = vld [vmem:[%s6406_s0 + $0x168] sm:$0xff]  ;;  %v74_v49 = vld [vmem:[%s6406_s0 + $0x178] sm:$0xff] }
 0x17c   :  { %2106 = vmatpush.msrb.mxu0 %v814_v50  ;;  %2125 = vmatpush.msrb.mxu1 %v831_v51  ;;  %v879_v50 = vld [vmem:[%s6407_s1 + $0x1870] sm:$0xff]  ;;  %v896_v51 = vld [vmem:[%s6407_s1 + $0x18f8] sm:$0xff] }
 0x17d   :  { %2146 = vmatpush.msrb.mxu2 %v846_v52  ;;  %2165 = vmatpush.msrb.mxu3 %v863_v53  ;;  %v911_v52 = vld [vmem:[%s6407_s1 + $0x1970] sm:$0xff]  ;;  %v928_v53 = vld [vmem:[%s6407_s1 + $0x19f8] sm:$0xff] }
 0x17e   :  { %2107 = vmatpush.msrb.mxu0 %v813_v54  ;;  %2126 = vmatpush.msrb.mxu1 %v830_v55  ;;  %v878_v54 = vld [vmem:[%s6407_s1 + $0x1868] sm:$0xff]  ;;  %v895_v55 = vld [vmem:[%s6407_s1 + $0x18f0] sm:$0xff] }
 0x17f   :  { %2147 = vmatpush.msrb.mxu2 %v845_v56  ;;  %2166 = vmatpush.msrb.mxu3 %v862_v57  ;;  %v910_v56 = vld [vmem:[%s6407_s1 + $0x1968] sm:$0xff]  ;;  %v927_v57 = vld [vmem:[%s6407_s1 + $0x19f0] sm:$0xff] }
 0x180   :  { %2108 = vmatpush.msrb.mxu0 %v812_v58  ;;  %2127 = vmatpush.msrb.mxu1 %v829_v59  ;;  %v877_v58 = vld [vmem:[%s6407_s1 + $0x1860] sm:$0xff]  ;;  %v894_v59 = vld [vmem:[%s6407_s1 + $0x18e8] sm:$0xff] }
 0x181   :  { %2148 = vmatpush.msrb.mxu2 %v844_v60  ;;  %2167 = vmatpush.msrb.mxu3 %v861_v61  ;;  %v909_v60 = vld [vmem:[%s6407_s1 + $0x1960] sm:$0xff]  ;;  %v926_v61 = vld [vmem:[%s6407_s1 + $0x19e8] sm:$0xff] }
 0x182   :  { %2109 = vmatpush.msrb.mxu0 %v811_v62  ;;  %2128 = vmatpush.msrb.mxu1 %v828_v63  ;;  %v876_v62 = vld [vmem:[%s6407_s1 + $0x1858] sm:$0xff]  ;;  %v893_v63 = vld [vmem:[%s6407_s1 + $0x18e0] sm:$0xff] }
 0x183   :  { %2149 = vmatpush.msrb.mxu2 %v843_v0  ;;  %2168 = vmatpush.msrb.mxu3 %v860_v1  ;;  %v908_v0 = vld [vmem:[%s6407_s1 + $0x1958] sm:$0xff]  ;;  %v925_v1 = vld [vmem:[%s6407_s1 + $0x19e0] sm:$0xff] }
 0x184   :  { %2110 = vmatpush.msrb.mxu0 %v810_v2  ;;  %2129 = vmatpush.msrb.mxu1 %v827_v3  ;;  %v875_v2 = vld [vmem:[%s6407_s1 + $0x1850] sm:$0xff]  ;;  %v892_v3 = vld [vmem:[%s6407_s1 + $0x18d8] sm:$0xff] }
 0x185   :  { %2150 = vmatpush.msrb.mxu2 %v842_v4  ;;  %2169 = vmatpush.msrb.mxu3 %v859_v5  ;;  %v907_v4 = vld [vmem:[%s6407_s1 + $0x1950] sm:$0xff]  ;;  %v924_v5 = vld [vmem:[%s6407_s1 + $0x19d8] sm:$0xff] }
 0x186   :  { %2111 = vmatpush.msrb.mxu0 %v809_v6  ;;  %2130 = vmatpush.msrb.mxu1 %v826_v7  ;;  %v874_v6 = vld [vmem:[%s6407_s1 + $0x1848] sm:$0xff]  ;;  %v891_v7 = vld [vmem:[%s6407_s1 + $0x18d0] sm:$0xff] }
 0x187   :  { %2151 = vmatpush.msrb.mxu2 %v841_v8  ;;  %2170 = vmatpush.msrb.mxu3 %v858_v9  ;;  %v906_v8 = vld [vmem:[%s6407_s1 + $0x1948] sm:$0xff]  ;;  %v923_v9 = vld [vmem:[%s6407_s1 + $0x19d0] sm:$0xff] }
 0x188   :  { %2112 = vmatpush.msrb.mxu0 %v808_v10  ;;  %2131 = vmatpush.msrb.mxu1 %v825_v11  ;;  %v873_v10 = vld [vmem:[%s6407_s1 + $0x1840] sm:$0xff]  ;;  %v890_v11 = vld [vmem:[%s6407_s1 + $0x18c8] sm:$0xff] }
 0x189   :  { %2152 = vmatpush.msrb.mxu2 %v840_v12  ;;  %2171 = vmatpush.msrb.mxu3 %v857_v13  ;;  %v905_v12 = vld [vmem:[%s6407_s1 + $0x1940] sm:$0xff]  ;;  %v922_v13 = vld [vmem:[%s6407_s1 + $0x19c8] sm:$0xff] }
 0x18a   :  { %2113 = vmatpush.msrb.mxu0 %v807_v14  ;;  %2132 = vmatpush.msrb.mxu1 %v824_v15  ;;  %v872_v14 = vld [vmem:[%s6407_s1 + $0x1838] sm:$0xff]  ;;  %v889_v15 = vld [vmem:[%s6407_s1 + $0x18c0] sm:$0xff] }
 0x18b   :  { %2153 = vmatpush.msrb.mxu2 %v839_v16  ;;  %2172 = vmatpush.msrb.mxu3 %v856_v17  ;;  %v904_v16 = vld [vmem:[%s6407_s1 + $0x1938] sm:$0xff]  ;;  %v921_v17 = vld [vmem:[%s6407_s1 + $0x19c0] sm:$0xff] }
 0x18c   :  { %2114 = vmatpush.msrb.mxu0 %v806_v18  ;;  %2133 = vmatpush.msrb.mxu1 %v823_v19  ;;  %v871_v18 = vld [vmem:[%s6407_s1 + $0x1830] sm:$0xff]  ;;  %v888_v19 = vld [vmem:[%s6407_s1 + $0x18b8] sm:$0xff] }
 0x18d   :  { %2154 = vmatpush.msrb.mxu2 %v838_v20  ;;  %2173 = vmatpush.msrb.mxu3 %v855_v21  ;;  %v903_v20 = vld [vmem:[%s6407_s1 + $0x1930] sm:$0xff]  ;;  %v920_v21 = vld [vmem:[%s6407_s1 + $0x19b8] sm:$0xff] }
 0x18e   :  { %2115 = vmatpush.msrb.mxu0 %v805_v22  ;;  %2134 = vmatpush.msrb.mxu1 %v822_v23  ;;  %v870_v22 = vld [vmem:[%s6407_s1 + $0x1828] sm:$0xff]  ;;  %v887_v23 = vld [vmem:[%s6407_s1 + $0x18b0] sm:$0xff] }
 0x18f   :  { %2155 = vmatpush.msrb.mxu2 %v837_v24  ;;  %2174 = vmatpush.msrb.mxu3 %v854_v25  ;;  %v902_v24 = vld [vmem:[%s6407_s1 + $0x1928] sm:$0xff]  ;;  %v919_v25 = vld [vmem:[%s6407_s1 + $0x19b0] sm:$0xff] }
 0x190   :  { %2116 = vmatpush.msrb.mxu0 %v804_v26  ;;  %2135 = vmatpush.msrb.mxu1 %v821_v27  ;;  %v869_v26 = vld [vmem:[%s6407_s1 + $0x1820] sm:$0xff]  ;;  %v886_v27 = vld [vmem:[%s6407_s1 + $0x18a8] sm:$0xff] }
 0x191   :  { %2156 = vmatpush.msrb.mxu2 %v836_v28  ;;  %2175 = vmatpush.msrb.mxu3 %v853_v29  ;;  %v901_v28 = vld [vmem:[%s6407_s1 + $0x1920] sm:$0xff]  ;;  %v918_v29 = vld [vmem:[%s6407_s1 + $0x19a8] sm:$0xff] }
 0x192   :  { %2117 = vmatpush.msrb.mxu0 %v803_v30  ;;  %2136 = vmatpush.msrb.mxu1 %v820_v31  ;;  %v868_v30 = vld [vmem:[%s6407_s1 + $0x1818] sm:$0xff]  ;;  %v885_v31 = vld [vmem:[%s6407_s1 + $0x18a0] sm:$0xff] }
 0x193   :  { %2157 = vmatpush.msrb.mxu2 %v835_v32  ;;  %2176 = vmatpush.msrb.mxu3 %v852_v33  ;;  %v900_v32 = vld [vmem:[%s6407_s1 + $0x1918] sm:$0xff]  ;;  %v917_v33 = vld [vmem:[%s6407_s1 + $0x19a0] sm:$0xff] }
 0x194   :  { %2118 = vmatpush.msrb.mxu0 %v802_v34  ;;  %2137 = vmatpush.msrb.mxu1 %v819_v35  ;;  %v867_v34 = vld [vmem:[%s6407_s1 + $0x1810] sm:$0xff]  ;;  %v884_v35 = vld [vmem:[%s6407_s1 + $0x1898] sm:$0xff] }
 0x195   :  { %2158 = vmatpush.msrb.mxu2 %v834_v36  ;;  %2177 = vmatpush.msrb.mxu3 %v851_v37  ;;  %v899_v36 = vld [vmem:[%s6407_s1 + $0x1910] sm:$0xff]  ;;  %v916_v37 = vld [vmem:[%s6407_s1 + $0x1998] sm:$0xff] }
 0x196   :  { %2119 = vmatpush.msrb.mxu0 %v801_v38  ;;  %2138 = vmatpush.msrb.mxu1 %v818_v39  ;;  %v866_v38 = vld [vmem:[%s6407_s1 + $0x1808] sm:$0xff]  ;;  %v883_v39 = vld [vmem:[%s6407_s1 + $0x1890] sm:$0xff] }
 0x197   :  { %2159 = vmatpush.msrb.mxu2 %v833_v40  ;;  %2178 = vmatpush.msrb.mxu3 %v850_v41  ;;  %v898_v40 = vld [vmem:[%s6407_s1 + $0x1908] sm:$0xff]  ;;  %v915_v41 = vld [vmem:[%s6407_s1 + $0x1990] sm:$0xff] }
 0x198   :  { %2120 = vmatmul.f32.vlgmr.msrb.gmra.mxu0 %v71_v42  ;;  %2160 = vmatmul.f32.vlgmr.msrb.gmra.mxu2 %v73_v43  ;;  %v865_v42 = vld [vmem:[%s6407_s1 + $0x1800] sm:$0xff]  ;;  %v882_v43 = vld [vmem:[%s6407_s1 + $0x1888] sm:$0xff] }
 0x199   :  { %2184 = vmatpush.msra.mxu0 %v880_v44  ;;  %2224 = vmatpush.msra.mxu2 %v912_v45  ;;  %v897_v44 = vld [vmem:[%s6407_s1 + $0x1900] sm:$0xff]  ;;  %v914_v45 = vld [vmem:[%s6407_s1 + $0x1988] sm:$0xff] }
 0x19a   :  { %2139 = vmatpush.msrb.mxu1 %v817_v46  ;;  %2179 = vmatpush.msrb.mxu3 %v849_v47  ;;  %v75_v46 = vld [vmem:[%s6406_s0 + $0x180] sm:$0xff]  ;;  %v77_v47 = vld [vmem:[%s6406_s0 + $0x190] sm:$0xff] }
 0x19b   :  { %2140 = vmatmul.f32.vlgmr.msrb.gmra.mxu1 %v72_v48  ;;  %2180 = vmatmul.f32.vlgmr.msrb.gmra.mxu3 %v74_v49  ;;  %v944_v48 = vld [vmem:[%s6407_s1 + $0x1a78] sm:$0xff] }
 0x19c   :  { %2185 = vmatpush.msra.mxu0 %v879_v50  ;;  %2204 = vmatpush.msra.mxu1 %v896_v51  ;;  %v976_v49 = vld [vmem:[%s6407_s1 + $0x1b78] sm:$0xff]  ;;  %v881_v50 = vld [vmem:[%s6407_s1 + $0x1880] sm:$0xff] }
 0x19d   :  { %2225 = vmatpush.msra.mxu2 %v911_v52  ;;  %2244 = vmatpush.msra.mxu3 %v928_v53  ;;  %v913_v51 = vld [vmem:[%s6407_s1 + $0x1980] sm:$0xff]  ;;  %v76_v52 = vld [vmem:[%s6406_s0 + $0x188] sm:$0xff]  ;;  %v78_v53 = vld [vmem:[%s6406_s0 + $0x198] sm:$0xff] }
 0x19e   :  { %2186 = vmatpush.msra.mxu0 %v878_v54  ;;  %2205 = vmatpush.msra.mxu1 %v895_v55  ;;  %v943_v54 = vld [vmem:[%s6407_s1 + $0x1a70] sm:$0xff]  ;;  %v960_v55 = vld [vmem:[%s6407_s1 + $0x1af8] sm:$0xff] }
 0x19f   :  { %2226 = vmatpush.msra.mxu2 %v910_v56  ;;  %2245 = vmatpush.msra.mxu3 %v927_v57  ;;  %v975_v56 = vld [vmem:[%s6407_s1 + $0x1b70] sm:$0xff]  ;;  %v992_v57 = vld [vmem:[%s6407_s1 + $0x1bf8] sm:$0xff] }
 0x1a0   :  { %2187 = vmatpush.msra.mxu0 %v877_v58  ;;  %2206 = vmatpush.msra.mxu1 %v894_v59  ;;  %v942_v58 = vld [vmem:[%s6407_s1 + $0x1a68] sm:$0xff]  ;;  %v959_v59 = vld [vmem:[%s6407_s1 + $0x1af0] sm:$0xff] }
 0x1a1   :  { %2227 = vmatpush.msra.mxu2 %v909_v60  ;;  %2246 = vmatpush.msra.mxu3 %v926_v61  ;;  %v974_v60 = vld [vmem:[%s6407_s1 + $0x1b68] sm:$0xff]  ;;  %v991_v61 = vld [vmem:[%s6407_s1 + $0x1bf0] sm:$0xff] }
 0x1a2   :  { %2188 = vmatpush.msra.mxu0 %v876_v62  ;;  %2207 = vmatpush.msra.mxu1 %v893_v63  ;;  %v941_v62 = vld [vmem:[%s6407_s1 + $0x1a60] sm:$0xff]  ;;  %v958_v63 = vld [vmem:[%s6407_s1 + $0x1ae8] sm:$0xff] }
 0x1a3   :  { %2228 = vmatpush.msra.mxu2 %v908_v0  ;;  %2247 = vmatpush.msra.mxu3 %v925_v1  ;;  %v973_v0 = vld [vmem:[%s6407_s1 + $0x1b60] sm:$0xff]  ;;  %v990_v1 = vld [vmem:[%s6407_s1 + $0x1be8] sm:$0xff] }
 0x1a4   :  { %2189 = vmatpush.msra.mxu0 %v875_v2  ;;  %2208 = vmatpush.msra.mxu1 %v892_v3  ;;  %v940_v2 = vld [vmem:[%s6407_s1 + $0x1a58] sm:$0xff]  ;;  %v957_v3 = vld [vmem:[%s6407_s1 + $0x1ae0] sm:$0xff] }
 0x1a5   :  { %2229 = vmatpush.msra.mxu2 %v907_v4  ;;  %2248 = vmatpush.msra.mxu3 %v924_v5  ;;  %v972_v4 = vld [vmem:[%s6407_s1 + $0x1b58] sm:$0xff]  ;;  %v989_v5 = vld [vmem:[%s6407_s1 + $0x1be0] sm:$0xff] }
 0x1a6   :  { %2190 = vmatpush.msra.mxu0 %v874_v6  ;;  %2209 = vmatpush.msra.mxu1 %v891_v7  ;;  %v939_v6 = vld [vmem:[%s6407_s1 + $0x1a50] sm:$0xff]  ;;  %v956_v7 = vld [vmem:[%s6407_s1 + $0x1ad8] sm:$0xff] }
 0x1a7   :  { %2230 = vmatpush.msra.mxu2 %v906_v8  ;;  %2249 = vmatpush.msra.mxu3 %v923_v9  ;;  %v971_v8 = vld [vmem:[%s6407_s1 + $0x1b50] sm:$0xff]  ;;  %v988_v9 = vld [vmem:[%s6407_s1 + $0x1bd8] sm:$0xff] }
 0x1a8   :  { %2191 = vmatpush.msra.mxu0 %v873_v10  ;;  %2210 = vmatpush.msra.mxu1 %v890_v11  ;;  %v938_v10 = vld [vmem:[%s6407_s1 + $0x1a48] sm:$0xff]  ;;  %v955_v11 = vld [vmem:[%s6407_s1 + $0x1ad0] sm:$0xff] }
 0x1a9   :  { %2231 = vmatpush.msra.mxu2 %v905_v12  ;;  %2250 = vmatpush.msra.mxu3 %v922_v13  ;;  %v970_v12 = vld [vmem:[%s6407_s1 + $0x1b48] sm:$0xff]  ;;  %v987_v13 = vld [vmem:[%s6407_s1 + $0x1bd0] sm:$0xff] }
 0x1aa   :  { %2192 = vmatpush.msra.mxu0 %v872_v14  ;;  %2211 = vmatpush.msra.mxu1 %v889_v15  ;;  %v937_v14 = vld [vmem:[%s6407_s1 + $0x1a40] sm:$0xff]  ;;  %v954_v15 = vld [vmem:[%s6407_s1 + $0x1ac8] sm:$0xff] }
 0x1ab   :  { %2232 = vmatpush.msra.mxu2 %v904_v16  ;;  %2251 = vmatpush.msra.mxu3 %v921_v17  ;;  %v969_v16 = vld [vmem:[%s6407_s1 + $0x1b40] sm:$0xff]  ;;  %v986_v17 = vld [vmem:[%s6407_s1 + $0x1bc8] sm:$0xff] }
 0x1ac   :  { %2193 = vmatpush.msra.mxu0 %v871_v18  ;;  %2212 = vmatpush.msra.mxu1 %v888_v19  ;;  %v936_v18 = vld [vmem:[%s6407_s1 + $0x1a38] sm:$0xff]  ;;  %v953_v19 = vld [vmem:[%s6407_s1 + $0x1ac0] sm:$0xff] }
 0x1ad   :  { %2233 = vmatpush.msra.mxu2 %v903_v20  ;;  %2252 = vmatpush.msra.mxu3 %v920_v21  ;;  %v968_v20 = vld [vmem:[%s6407_s1 + $0x1b38] sm:$0xff]  ;;  %v985_v21 = vld [vmem:[%s6407_s1 + $0x1bc0] sm:$0xff] }
 0x1ae   :  { %2194 = vmatpush.msra.mxu0 %v870_v22  ;;  %2213 = vmatpush.msra.mxu1 %v887_v23  ;;  %v935_v22 = vld [vmem:[%s6407_s1 + $0x1a30] sm:$0xff]  ;;  %v952_v23 = vld [vmem:[%s6407_s1 + $0x1ab8] sm:$0xff] }
 0x1af   :  { %2234 = vmatpush.msra.mxu2 %v902_v24  ;;  %2253 = vmatpush.msra.mxu3 %v919_v25  ;;  %v967_v24 = vld [vmem:[%s6407_s1 + $0x1b30] sm:$0xff]  ;;  %v984_v25 = vld [vmem:[%s6407_s1 + $0x1bb8] sm:$0xff] }
 0x1b0   :  { %2195 = vmatpush.msra.mxu0 %v869_v26  ;;  %2214 = vmatpush.msra.mxu1 %v886_v27  ;;  %v934_v26 = vld [vmem:[%s6407_s1 + $0x1a28] sm:$0xff]  ;;  %v951_v27 = vld [vmem:[%s6407_s1 + $0x1ab0] sm:$0xff] }
 0x1b1   :  { %2235 = vmatpush.msra.mxu2 %v901_v28  ;;  %2254 = vmatpush.msra.mxu3 %v918_v29  ;;  %v966_v28 = vld [vmem:[%s6407_s1 + $0x1b28] sm:$0xff]  ;;  %v983_v29 = vld [vmem:[%s6407_s1 + $0x1bb0] sm:$0xff] }
 0x1b2   :  { %2196 = vmatpush.msra.mxu0 %v868_v30  ;;  %2215 = vmatpush.msra.mxu1 %v885_v31  ;;  %v933_v30 = vld [vmem:[%s6407_s1 + $0x1a20] sm:$0xff]  ;;  %v950_v31 = vld [vmem:[%s6407_s1 + $0x1aa8] sm:$0xff] }
 0x1b3   :  { %2236 = vmatpush.msra.mxu2 %v900_v32  ;;  %2255 = vmatpush.msra.mxu3 %v917_v33  ;;  %v965_v32 = vld [vmem:[%s6407_s1 + $0x1b20] sm:$0xff]  ;;  %v982_v33 = vld [vmem:[%s6407_s1 + $0x1ba8] sm:$0xff] }
 0x1b4   :  { %2197 = vmatpush.msra.mxu0 %v867_v34  ;;  %2216 = vmatpush.msra.mxu1 %v884_v35  ;;  %v932_v34 = vld [vmem:[%s6407_s1 + $0x1a18] sm:$0xff]  ;;  %v949_v35 = vld [vmem:[%s6407_s1 + $0x1aa0] sm:$0xff] }
 0x1b5   :  { %2237 = vmatpush.msra.mxu2 %v899_v36  ;;  %2256 = vmatpush.msra.mxu3 %v916_v37  ;;  %v964_v36 = vld [vmem:[%s6407_s1 + $0x1b18] sm:$0xff]  ;;  %v981_v37 = vld [vmem:[%s6407_s1 + $0x1ba0] sm:$0xff] }
 0x1b6   :  { %2198 = vmatpush.msra.mxu0 %v866_v38  ;;  %2217 = vmatpush.msra.mxu1 %v883_v39  ;;  %v931_v38 = vld [vmem:[%s6407_s1 + $0x1a10] sm:$0xff]  ;;  %v948_v39 = vld [vmem:[%s6407_s1 + $0x1a98] sm:$0xff] }
 0x1b7   :  { %2238 = vmatpush.msra.mxu2 %v898_v40  ;;  %2257 = vmatpush.msra.mxu3 %v915_v41  ;;  %v963_v40 = vld [vmem:[%s6407_s1 + $0x1b10] sm:$0xff]  ;;  %v980_v41 = vld [vmem:[%s6407_s1 + $0x1b98] sm:$0xff] }
 0x1b8   :  { %2199 = vmatpush.msra.mxu0 %v865_v42  ;;  %2218 = vmatpush.msra.mxu1 %v882_v43  ;;  %v930_v42 = vld [vmem:[%s6407_s1 + $0x1a08] sm:$0xff]  ;;  %v947_v43 = vld [vmem:[%s6407_s1 + $0x1a90] sm:$0xff] }
 0x1b9   :  { %2239 = vmatpush.msra.mxu2 %v897_v44  ;;  %2258 = vmatpush.msra.mxu3 %v914_v45  ;;  %v962_v44 = vld [vmem:[%s6407_s1 + $0x1b08] sm:$0xff]  ;;  %v979_v45 = vld [vmem:[%s6407_s1 + $0x1b90] sm:$0xff] }
 0x1ba   :  { %2200 = vmatmul.f32.vlgmr.msra.gmra.mxu0 %v75_v46  ;;  %2240 = vmatmul.f32.vlgmr.msra.gmra.mxu2 %v77_v47  ;;  %v929_v46 = vld [vmem:[%s6407_s1 + $0x1a00] sm:$0xff]  ;;  %v946_v47 = vld [vmem:[%s6407_s1 + $0x1a88] sm:$0xff] }
 0x1bb   :  { %2264 = vmatpush.msrb.mxu0 %v944_v48  ;;  %2304 = vmatpush.msrb.mxu2 %v976_v49  ;;  %v961_v48 = vld [vmem:[%s6407_s1 + $0x1b00] sm:$0xff]  ;;  %v978_v49 = vld [vmem:[%s6407_s1 + $0x1b88] sm:$0xff] }
 0x1bc   :  { %2219 = vmatpush.msra.mxu1 %v881_v50  ;;  %2259 = vmatpush.msra.mxu3 %v913_v51  ;;  %v79_v50 = vld [vmem:[%s6406_s0 + $0x1a0] sm:$0xff]  ;;  %v81_v51 = vld [vmem:[%s6406_s0 + $0x1b0] sm:$0xff] }
 0x1bd   :  { %2220 = vmatmul.f32.vlgmr.msra.gmra.mxu1 %v76_v52  ;;  %2260 = vmatmul.f32.vlgmr.msra.gmra.mxu3 %v78_v53  ;;  %v1008_v52 = vld [vmem:[%s6407_s1 + $0x1c78] sm:$0xff] }
 0x1be   :  { %2265 = vmatpush.msrb.mxu0 %v943_v54  ;;  %2284 = vmatpush.msrb.mxu1 %v960_v55  ;;  %v1040_v53 = vld [vmem:[%s6407_s1 + $0x1d78] sm:$0xff]  ;;  %v945_v54 = vld [vmem:[%s6407_s1 + $0x1a80] sm:$0xff] }
 0x1bf   :  { %2305 = vmatpush.msrb.mxu2 %v975_v56  ;;  %2324 = vmatpush.msrb.mxu3 %v992_v57  ;;  %v977_v55 = vld [vmem:[%s6407_s1 + $0x1b80] sm:$0xff]  ;;  %v80_v56 = vld [vmem:[%s6406_s0 + $0x1a8] sm:$0xff]  ;;  %v82_v57 = vld [vmem:[%s6406_s0 + $0x1b8] sm:$0xff] }
 0x1c0   :  { %2266 = vmatpush.msrb.mxu0 %v942_v58  ;;  %2285 = vmatpush.msrb.mxu1 %v959_v59  ;;  %v1007_v58 = vld [vmem:[%s6407_s1 + $0x1c70] sm:$0xff]  ;;  %v1024_v59 = vld [vmem:[%s6407_s1 + $0x1cf8] sm:$0xff] }
 0x1c1   :  { %2306 = vmatpush.msrb.mxu2 %v974_v60  ;;  %2325 = vmatpush.msrb.mxu3 %v991_v61  ;;  %v1039_v60 = vld [vmem:[%s6407_s1 + $0x1d70] sm:$0xff]  ;;  %v1056_v61 = vld [vmem:[%s6407_s1 + $0x1df8] sm:$0xff] }
 0x1c2   :  { %2267 = vmatpush.msrb.mxu0 %v941_v62  ;;  %2286 = vmatpush.msrb.mxu1 %v958_v63  ;;  %v1006_v62 = vld [vmem:[%s6407_s1 + $0x1c68] sm:$0xff]  ;;  %v1023_v63 = vld [vmem:[%s6407_s1 + $0x1cf0] sm:$0xff] }
 0x1c3   :  { %2307 = vmatpush.msrb.mxu2 %v973_v0  ;;  %2326 = vmatpush.msrb.mxu3 %v990_v1  ;;  %v1038_v0 = vld [vmem:[%s6407_s1 + $0x1d68] sm:$0xff]  ;;  %v1055_v1 = vld [vmem:[%s6407_s1 + $0x1df0] sm:$0xff] }
 0x1c4   :  { %2268 = vmatpush.msrb.mxu0 %v940_v2  ;;  %2287 = vmatpush.msrb.mxu1 %v957_v3  ;;  %v1005_v2 = vld [vmem:[%s6407_s1 + $0x1c60] sm:$0xff]  ;;  %v1022_v3 = vld [vmem:[%s6407_s1 + $0x1ce8] sm:$0xff] }
 0x1c5   :  { %2308 = vmatpush.msrb.mxu2 %v972_v4  ;;  %2327 = vmatpush.msrb.mxu3 %v989_v5  ;;  %v1037_v4 = vld [vmem:[%s6407_s1 + $0x1d60] sm:$0xff]  ;;  %v1054_v5 = vld [vmem:[%s6407_s1 + $0x1de8] sm:$0xff] }
 0x1c6   :  { %2269 = vmatpush.msrb.mxu0 %v939_v6  ;;  %2288 = vmatpush.msrb.mxu1 %v956_v7  ;;  %v1004_v6 = vld [vmem:[%s6407_s1 + $0x1c58] sm:$0xff]  ;;  %v1021_v7 = vld [vmem:[%s6407_s1 + $0x1ce0] sm:$0xff] }
 0x1c7   :  { %2309 = vmatpush.msrb.mxu2 %v971_v8  ;;  %2328 = vmatpush.msrb.mxu3 %v988_v9  ;;  %v1036_v8 = vld [vmem:[%s6407_s1 + $0x1d58] sm:$0xff]  ;;  %v1053_v9 = vld [vmem:[%s6407_s1 + $0x1de0] sm:$0xff] }
 0x1c8   :  { %2270 = vmatpush.msrb.mxu0 %v938_v10  ;;  %2289 = vmatpush.msrb.mxu1 %v955_v11  ;;  %v1003_v10 = vld [vmem:[%s6407_s1 + $0x1c50] sm:$0xff]  ;;  %v1020_v11 = vld [vmem:[%s6407_s1 + $0x1cd8] sm:$0xff] }
 0x1c9   :  { %2310 = vmatpush.msrb.mxu2 %v970_v12  ;;  %2329 = vmatpush.msrb.mxu3 %v987_v13  ;;  %v1035_v12 = vld [vmem:[%s6407_s1 + $0x1d50] sm:$0xff]  ;;  %v1052_v13 = vld [vmem:[%s6407_s1 + $0x1dd8] sm:$0xff] }
 0x1ca   :  { %2271 = vmatpush.msrb.mxu0 %v937_v14  ;;  %2290 = vmatpush.msrb.mxu1 %v954_v15  ;;  %v1002_v14 = vld [vmem:[%s6407_s1 + $0x1c48] sm:$0xff]  ;;  %v1019_v15 = vld [vmem:[%s6407_s1 + $0x1cd0] sm:$0xff] }
 0x1cb   :  { %2311 = vmatpush.msrb.mxu2 %v969_v16  ;;  %2330 = vmatpush.msrb.mxu3 %v986_v17  ;;  %v1034_v16 = vld [vmem:[%s6407_s1 + $0x1d48] sm:$0xff]  ;;  %v1051_v17 = vld [vmem:[%s6407_s1 + $0x1dd0] sm:$0xff] }
 0x1cc   :  { %2272 = vmatpush.msrb.mxu0 %v936_v18  ;;  %2291 = vmatpush.msrb.mxu1 %v953_v19  ;;  %v1001_v18 = vld [vmem:[%s6407_s1 + $0x1c40] sm:$0xff]  ;;  %v1018_v19 = vld [vmem:[%s6407_s1 + $0x1cc8] sm:$0xff] }
 0x1cd   :  { %2312 = vmatpush.msrb.mxu2 %v968_v20  ;;  %2331 = vmatpush.msrb.mxu3 %v985_v21  ;;  %v1033_v20 = vld [vmem:[%s6407_s1 + $0x1d40] sm:$0xff]  ;;  %v1050_v21 = vld [vmem:[%s6407_s1 + $0x1dc8] sm:$0xff] }
 0x1ce   :  { %2273 = vmatpush.msrb.mxu0 %v935_v22  ;;  %2292 = vmatpush.msrb.mxu1 %v952_v23  ;;  %v1000_v22 = vld [vmem:[%s6407_s1 + $0x1c38] sm:$0xff]  ;;  %v1017_v23 = vld [vmem:[%s6407_s1 + $0x1cc0] sm:$0xff] }
 0x1cf   :  { %2313 = vmatpush.msrb.mxu2 %v967_v24  ;;  %2332 = vmatpush.msrb.mxu3 %v984_v25  ;;  %v1032_v24 = vld [vmem:[%s6407_s1 + $0x1d38] sm:$0xff]  ;;  %v1049_v25 = vld [vmem:[%s6407_s1 + $0x1dc0] sm:$0xff] }
 0x1d0   :  { %2274 = vmatpush.msrb.mxu0 %v934_v26  ;;  %2293 = vmatpush.msrb.mxu1 %v951_v27  ;;  %v999_v26 = vld [vmem:[%s6407_s1 + $0x1c30] sm:$0xff]  ;;  %v1016_v27 = vld [vmem:[%s6407_s1 + $0x1cb8] sm:$0xff] }
 0x1d1   :  { %2314 = vmatpush.msrb.mxu2 %v966_v28  ;;  %2333 = vmatpush.msrb.mxu3 %v983_v29  ;;  %v1031_v28 = vld [vmem:[%s6407_s1 + $0x1d30] sm:$0xff]  ;;  %v1048_v29 = vld [vmem:[%s6407_s1 + $0x1db8] sm:$0xff] }
 0x1d2   :  { %2275 = vmatpush.msrb.mxu0 %v933_v30  ;;  %2294 = vmatpush.msrb.mxu1 %v950_v31  ;;  %v998_v30 = vld [vmem:[%s6407_s1 + $0x1c28] sm:$0xff]  ;;  %v1015_v31 = vld [vmem:[%s6407_s1 + $0x1cb0] sm:$0xff] }
 0x1d3   :  { %2315 = vmatpush.msrb.mxu2 %v965_v32  ;;  %2334 = vmatpush.msrb.mxu3 %v982_v33  ;;  %v1030_v32 = vld [vmem:[%s6407_s1 + $0x1d28] sm:$0xff]  ;;  %v1047_v33 = vld [vmem:[%s6407_s1 + $0x1db0] sm:$0xff] }
 0x1d4   :  { %2276 = vmatpush.msrb.mxu0 %v932_v34  ;;  %2295 = vmatpush.msrb.mxu1 %v949_v35  ;;  %v997_v34 = vld [vmem:[%s6407_s1 + $0x1c20] sm:$0xff]  ;;  %v1014_v35 = vld [vmem:[%s6407_s1 + $0x1ca8] sm:$0xff] }
 0x1d5   :  { %2316 = vmatpush.msrb.mxu2 %v964_v36  ;;  %2335 = vmatpush.msrb.mxu3 %v981_v37  ;;  %v1029_v36 = vld [vmem:[%s6407_s1 + $0x1d20] sm:$0xff]  ;;  %v1046_v37 = vld [vmem:[%s6407_s1 + $0x1da8] sm:$0xff] }
 0x1d6   :  { %2277 = vmatpush.msrb.mxu0 %v931_v38  ;;  %2296 = vmatpush.msrb.mxu1 %v948_v39  ;;  %v996_v38 = vld [vmem:[%s6407_s1 + $0x1c18] sm:$0xff]  ;;  %v1013_v39 = vld [vmem:[%s6407_s1 + $0x1ca0] sm:$0xff] }
 0x1d7   :  { %2317 = vmatpush.msrb.mxu2 %v963_v40  ;;  %2336 = vmatpush.msrb.mxu3 %v980_v41  ;;  %v1028_v40 = vld [vmem:[%s6407_s1 + $0x1d18] sm:$0xff]  ;;  %v1045_v41 = vld [vmem:[%s6407_s1 + $0x1da0] sm:$0xff] }
 0x1d8   :  { %2278 = vmatpush.msrb.mxu0 %v930_v42  ;;  %2297 = vmatpush.msrb.mxu1 %v947_v43  ;;  %v995_v42 = vld [vmem:[%s6407_s1 + $0x1c10] sm:$0xff]  ;;  %v1012_v43 = vld [vmem:[%s6407_s1 + $0x1c98] sm:$0xff] }
 0x1d9   :  { %2318 = vmatpush.msrb.mxu2 %v962_v44  ;;  %2337 = vmatpush.msrb.mxu3 %v979_v45  ;;  %v1027_v44 = vld [vmem:[%s6407_s1 + $0x1d10] sm:$0xff]  ;;  %v1044_v45 = vld [vmem:[%s6407_s1 + $0x1d98] sm:$0xff] }
 0x1da   :  { %2279 = vmatpush.msrb.mxu0 %v929_v46  ;;  %2298 = vmatpush.msrb.mxu1 %v946_v47  ;;  %v994_v46 = vld [vmem:[%s6407_s1 + $0x1c08] sm:$0xff]  ;;  %v1011_v47 = vld [vmem:[%s6407_s1 + $0x1c90] sm:$0xff] }
 0x1db   :  { %2319 = vmatpush.msrb.mxu2 %v961_v48  ;;  %2338 = vmatpush.msrb.mxu3 %v978_v49  ;;  %v1026_v48 = vld [vmem:[%s6407_s1 + $0x1d08] sm:$0xff]  ;;  %v1043_v49 = vld [vmem:[%s6407_s1 + $0x1d90] sm:$0xff] }
 0x1dc   :  { %2280 = vmatmul.f32.vlgmr.msrb.gmra.mxu0 %v79_v50  ;;  %2320 = vmatmul.f32.vlgmr.msrb.gmra.mxu2 %v81_v51  ;;  %v993_v50 = vld [vmem:[%s6407_s1 + $0x1c00] sm:$0xff]  ;;  %v1010_v51 = vld [vmem:[%s6407_s1 + $0x1c88] sm:$0xff] }
 0x1dd   :  { %2344 = vmatpush.msra.mxu0 %v1008_v52  ;;  %2384 = vmatpush.msra.mxu2 %v1040_v53  ;;  %v1025_v52 = vld [vmem:[%s6407_s1 + $0x1d00] sm:$0xff]  ;;  %v1042_v53 = vld [vmem:[%s6407_s1 + $0x1d88] sm:$0xff] }
 0x1de   :  { %2299 = vmatpush.msrb.mxu1 %v945_v54  ;;  %2339 = vmatpush.msrb.mxu3 %v977_v55  ;;  %v83_v54 = vld [vmem:[%s6406_s0 + $0x1c0] sm:$0xff]  ;;  %v85_v55 = vld [vmem:[%s6406_s0 + $0x1d0] sm:$0xff] }
 0x1df   :  { %2300 = vmatmul.f32.vlgmr.msrb.gmra.mxu1 %v80_v56  ;;  %2340 = vmatmul.f32.vlgmr.msrb.gmra.mxu3 %v82_v57  ;;  %v1072_v56 = vld [vmem:[%s6407_s1 + $0x1e78] sm:$0xff] }
 0x1e0   :  { %2345 = vmatpush.msra.mxu0 %v1007_v58  ;;  %2364 = vmatpush.msra.mxu1 %v1024_v59  ;;  %v1104_v57 = vld [vmem:[%s6407_s1 + $0x1f78] sm:$0xff]  ;;  %v1009_v58 = vld [vmem:[%s6407_s1 + $0x1c80] sm:$0xff] }
 0x1e1   :  { %2385 = vmatpush.msra.mxu2 %v1039_v60  ;;  %2404 = vmatpush.msra.mxu3 %v1056_v61  ;;  %v1041_v59 = vld [vmem:[%s6407_s1 + $0x1d80] sm:$0xff]  ;;  %v84_v60 = vld [vmem:[%s6406_s0 + $0x1c8] sm:$0xff]  ;;  %v86_v61 = vld [vmem:[%s6406_s0 + $0x1d8] sm:$0xff] }
 0x1e2   :  { %2346 = vmatpush.msra.mxu0 %v1006_v62  ;;  %2365 = vmatpush.msra.mxu1 %v1023_v63  ;;  %v1071_v62 = vld [vmem:[%s6407_s1 + $0x1e70] sm:$0xff]  ;;  %v1088_v63 = vld [vmem:[%s6407_s1 + $0x1ef8] sm:$0xff] }
 0x1e3   :  { %2386 = vmatpush.msra.mxu2 %v1038_v0  ;;  %2405 = vmatpush.msra.mxu3 %v1055_v1  ;;  %v1103_v0 = vld [vmem:[%s6407_s1 + $0x1f70] sm:$0xff]  ;;  %v1120_v1 = vld [vmem:[%s6407_s1 + $0x1ff8] sm:$0xff] }
 0x1e4   :  { %2347 = vmatpush.msra.mxu0 %v1005_v2  ;;  %2366 = vmatpush.msra.mxu1 %v1022_v3  ;;  %v1070_v2 = vld [vmem:[%s6407_s1 + $0x1e68] sm:$0xff]  ;;  %v1087_v3 = vld [vmem:[%s6407_s1 + $0x1ef0] sm:$0xff] }
 0x1e5   :  { %2387 = vmatpush.msra.mxu2 %v1037_v4  ;;  %2406 = vmatpush.msra.mxu3 %v1054_v5  ;;  %v1102_v4 = vld [vmem:[%s6407_s1 + $0x1f68] sm:$0xff]  ;;  %v1119_v5 = vld [vmem:[%s6407_s1 + $0x1ff0] sm:$0xff] }
 0x1e6   :  { %2348 = vmatpush.msra.mxu0 %v1004_v6  ;;  %2367 = vmatpush.msra.mxu1 %v1021_v7  ;;  %v1069_v6 = vld [vmem:[%s6407_s1 + $0x1e60] sm:$0xff]  ;;  %v1086_v7 = vld [vmem:[%s6407_s1 + $0x1ee8] sm:$0xff] }
 0x1e7   :  { %2388 = vmatpush.msra.mxu2 %v1036_v8  ;;  %2407 = vmatpush.msra.mxu3 %v1053_v9  ;;  %v1101_v8 = vld [vmem:[%s6407_s1 + $0x1f60] sm:$0xff]  ;;  %v1118_v9 = vld [vmem:[%s6407_s1 + $0x1fe8] sm:$0xff] }
 0x1e8   :  { %2349 = vmatpush.msra.mxu0 %v1003_v10  ;;  %2368 = vmatpush.msra.mxu1 %v1020_v11  ;;  %v1068_v10 = vld [vmem:[%s6407_s1 + $0x1e58] sm:$0xff]  ;;  %v1085_v11 = vld [vmem:[%s6407_s1 + $0x1ee0] sm:$0xff] }
 0x1e9   :  { %2389 = vmatpush.msra.mxu2 %v1035_v12  ;;  %2408 = vmatpush.msra.mxu3 %v1052_v13  ;;  %v1100_v12 = vld [vmem:[%s6407_s1 + $0x1f58] sm:$0xff]  ;;  %v1117_v13 = vld [vmem:[%s6407_s1 + $0x1fe0] sm:$0xff] }
 0x1ea   :  { %2350 = vmatpush.msra.mxu0 %v1002_v14  ;;  %2369 = vmatpush.msra.mxu1 %v1019_v15  ;;  %v1067_v14 = vld [vmem:[%s6407_s1 + $0x1e50] sm:$0xff]  ;;  %v1084_v15 = vld [vmem:[%s6407_s1 + $0x1ed8] sm:$0xff] }
 0x1eb   :  { %2390 = vmatpush.msra.mxu2 %v1034_v16  ;;  %2409 = vmatpush.msra.mxu3 %v1051_v17  ;;  %v1099_v16 = vld [vmem:[%s6407_s1 + $0x1f50] sm:$0xff]  ;;  %v1116_v17 = vld [vmem:[%s6407_s1 + $0x1fd8] sm:$0xff] }
 0x1ec   :  { %2351 = vmatpush.msra.mxu0 %v1001_v18  ;;  %2370 = vmatpush.msra.mxu1 %v1018_v19  ;;  %v1066_v18 = vld [vmem:[%s6407_s1 + $0x1e48] sm:$0xff]  ;;  %v1083_v19 = vld [vmem:[%s6407_s1 + $0x1ed0] sm:$0xff] }
 0x1ed   :  { %2391 = vmatpush.msra.mxu2 %v1033_v20  ;;  %2410 = vmatpush.msra.mxu3 %v1050_v21  ;;  %v2721_v20 = vld [vmem:[%s6408_s2] ss:$0 sm:$0xff]  ;;  %v1098_v21 = vld [vmem:[%s6407_s1 + $0x1f48] sm:$0xff] }
 0x1ee   :  { %2352 = vmatpush.msra.mxu0 %v1000_v22  ;;  %2371 = vmatpush.msra.mxu1 %v1017_v23  ;;  %v1115_v22 = vld [vmem:[%s6407_s1 + $0x1fd0] sm:$0xff]  ;;  %v1241_v23 = vpop.f32.mrf.mxu0 }
 0x1ef   :  { %2392 = vmatpush.msra.mxu2 %v1032_v24  ;;  %2411 = vmatpush.msra.mxu3 %v1049_v25  ;;  %v1065_v24 = vld [vmem:[%s6407_s1 + $0x1e40] sm:$0xff]  ;;  %v1082_v25 = vld [vmem:[%s6407_s1 + $0x1ec8] sm:$0xff] }
 0x1f0   :  { %2353 = vmatpush.msra.mxu0 %v999_v26  ;;  %2372 = vmatpush.msra.mxu1 %v1016_v27  ;;  %v1097_v26 = vld [vmem:[%s6407_s1 + $0x1f40] sm:$0xff]  ;;  %v1114_v27 = vld [vmem:[%s6407_s1 + $0x1fc8] sm:$0xff] }
 0x1f1   :  { %2393 = vmatpush.msra.mxu2 %v1031_v28  ;;  %2412 = vmatpush.msra.mxu3 %v1048_v29  ;;  %v1064_v28 = vld [vmem:[%s6407_s1 + $0x1e38] sm:$0xff]  ;;  %v1081_v29 = vld [vmem:[%s6407_s1 + $0x1ec0] sm:$0xff] }
 0x1f2   :  { %2354 = vmatpush.msra.mxu0 %v998_v30  ;;  %2373 = vmatpush.msra.mxu1 %v1015_v31  ;;  %v1242_v30 = vadd.f32 %v2721_v20, %v1241_v23  ;;  %v1096_v31 = vld [vmem:[%s6407_s1 + $0x1f38] sm:$0xff]  ;;  %v1134_v20 = vld [vmem:[%s6407_s1 + $0x2068] sm:$0xff]  ;;  %v1183_v23 = vld [vmem:[%s6407_s1 + $0x21f0] sm:$0xff] }
 0x1f3   :  { %2394 = vmatpush.msra.mxu2 %v1030_v32  ;;  %2413 = vmatpush.msra.mxu3 %v1047_v33  ;;  %v1113_v32 = vld [vmem:[%s6407_s1 + $0x1fc0] sm:$0xff]  ;;  %v1261_v33 = vpop.f32.mrf.mxu1 }
 0x1f4   :  { %2355 = vmatpush.msra.mxu0 %v997_v34  ;;  %2374 = vmatpush.msra.mxu1 %v1014_v35  ;;  %v1063_v34 = vld [vmem:[%s6407_s1 + $0x1e30] sm:$0xff]  ;;  %v1080_v35 = vld [vmem:[%s6407_s1 + $0x1eb8] sm:$0xff] }
 0x1f5   :  { %2395 = vmatpush.msra.mxu2 %v1029_v36  ;;  %2414 = vmatpush.msra.mxu3 %v1046_v37  ;;  %v1095_v36 = vld [vmem:[%s6407_s1 + $0x1f30] sm:$0xff]  ;;  %v1112_v37 = vld [vmem:[%s6407_s1 + $0x1fb8] sm:$0xff] }
 0x1f6   :  { %2356 = vmatpush.msra.mxu0 %v996_v38  ;;  %2375 = vmatpush.msra.mxu1 %v1013_v39  ;;  %v1062_v38 = vld [vmem:[%s6407_s1 + $0x1e28] sm:$0xff]  ;;  %v1079_v39 = vld [vmem:[%s6407_s1 + $0x1eb0] sm:$0xff] }
 0x1f7   :  { %2396 = vmatpush.msra.mxu2 %v1028_v40  ;;  %2415 = vmatpush.msra.mxu3 %v1045_v41  ;;  %v1262_v40 = vadd.f32 %v1261_v33, %v1242_v30  ;;  %v1094_v41 = vld [vmem:[%s6407_s1 + $0x1f28] sm:$0xff]  ;;  %v1132_v30 = vld [vmem:[%s6407_s1 + $0x2058] sm:$0xff]  ;;  %v1181_v33 = vld [vmem:[%s6407_s1 + $0x21e0] sm:$0xff] }
 0x1f8   :  { %2357 = vmatpush.msra.mxu0 %v995_v42  ;;  %2376 = vmatpush.msra.mxu1 %v1012_v43  ;;  %v1111_v42 = vld [vmem:[%s6407_s1 + $0x1fb0] sm:$0xff]  ;;  %v1281_v43 = vpop.f32.mrf.mxu2 }
 0x1f9   :  { %2397 = vmatpush.msra.mxu2 %v1027_v44  ;;  %2416 = vmatpush.msra.mxu3 %v1044_v45  ;;  %v1061_v44 = vld [vmem:[%s6407_s1 + $0x1e20] sm:$0xff]  ;;  %v1078_v45 = vld [vmem:[%s6407_s1 + $0x1ea8] sm:$0xff] }
 0x1fa   :  { %2358 = vmatpush.msra.mxu0 %v994_v46  ;;  %2377 = vmatpush.msra.mxu1 %v1011_v47  ;;  %v1093_v46 = vld [vmem:[%s6407_s1 + $0x1f20] sm:$0xff]  ;;  %v1110_v47 = vld [vmem:[%s6407_s1 + $0x1fa8] sm:$0xff] }
 0x1fb   :  { %2398 = vmatpush.msra.mxu2 %v1026_v48  ;;  %2417 = vmatpush.msra.mxu3 %v1043_v49  ;;  %v1060_v48 = vld [vmem:[%s6407_s1 + $0x1e18] sm:$0xff]  ;;  %v1077_v49 = vld [vmem:[%s6407_s1 + $0x1ea0] sm:$0xff] }
 0x1fc   :  { %2359 = vmatpush.msra.mxu0 %v993_v50  ;;  %2378 = vmatpush.msra.mxu1 %v1010_v51  ;;  %v1282_v50 = vadd.f32 %v1281_v43, %v1262_v40  ;;  %v1092_v51 = vld [vmem:[%s6407_s1 + $0x1f18] sm:$0xff]  ;;  %v1130_v40 = vld [vmem:[%s6407_s1 + $0x2048] sm:$0xff] }
 0x1fd   :  { %2399 = vmatpush.msra.mxu2 %v1025_v52  ;;  %2418 = vmatpush.msra.mxu3 %v1042_v53  ;;  %v1109_v52 = vld [vmem:[%s6407_s1 + $0x1fa0] sm:$0xff]  ;;  %v1301_v53 = vpop.f32.mrf.mxu3  ;;  %v1162_v43 = vld [vmem:[%s6407_s1 + $0x2148] sm:$0xff] }
 0x1fe   :  { %2360 = vmatmul.f32.vlgmr.msra.gmra.mxu0 %v83_v54  ;;  %2400 = vmatmul.f32.vlgmr.msra.gmra.mxu2 %v85_v55  ;;  %v1059_v54 = vld [vmem:[%s6407_s1 + $0x1e10] sm:$0xff]  ;;  %v1076_v55 = vld [vmem:[%s6407_s1 + $0x1e98] sm:$0xff] }
 0x1ff   :  { %2424 = vmatpush.msrb.mxu0 %v1072_v56  ;;  %2464 = vmatpush.msrb.mxu2 %v1104_v57  ;;  %v1091_v56 = vld [vmem:[%s6407_s1 + $0x1f10] sm:$0xff]  ;;  %v1108_v57 = vld [vmem:[%s6407_s1 + $0x1f98] sm:$0xff] }
 0x200   :  { %2379 = vmatpush.msra.mxu1 %v1009_v58  ;;  %2419 = vmatpush.msra.mxu3 %v1041_v59  ;;  %v1058_v58 = vld [vmem:[%s6407_s1 + $0x1e08] sm:$0xff]  ;;  %v1075_v59 = vld [vmem:[%s6407_s1 + $0x1e90] sm:$0xff] }
 0x201   :  { %2380 = vmatmul.f32.vlgmr.msra.gmra.mxu1 %v84_v60  ;;  %2420 = vmatmul.f32.vlgmr.msra.gmra.mxu3 %v86_v61  ;;  %v1302_v60 = vadd.f32 %v1301_v53, %v1282_v50  ;;  %v1090_v61 = vld [vmem:[%s6407_s1 + $0x1f08] sm:$0xff] }
 0x202   :  { %2425 = vmatpush.msrb.mxu0 %v1071_v62  ;;  %2444 = vmatpush.msrb.mxu1 %v1088_v63  ;;  %v1107_v62 = vld [vmem:[%s6407_s1 + $0x1f90] sm:$0xff]  ;;  %v1321_v63 = vpop.f32.mrf.mxu0 }
 0x203   :  { %2465 = vmatpush.msrb.mxu2 %v1103_v0  ;;  %2484 = vmatpush.msrb.mxu3 %v1120_v1  ;;  %v1057_v0 = vld [vmem:[%s6407_s1 + $0x1e00] sm:$0xff]  ;;  %v1074_v1 = vld [vmem:[%s6407_s1 + $0x1e88] sm:$0xff] }
 0x204   :  { %2426 = vmatpush.msrb.mxu0 %v1070_v2  ;;  %2445 = vmatpush.msrb.mxu1 %v1087_v3  ;;  %v1089_v2 = vld [vmem:[%s6407_s1 + $0x1f00] sm:$0xff]  ;;  %v1106_v3 = vld [vmem:[%s6407_s1 + $0x1f88] sm:$0xff] }
 0x205   :  { %2466 = vmatpush.msrb.mxu2 %v1102_v4  ;;  %2485 = vmatpush.msrb.mxu3 %v1119_v5  ;;  %v87_v4 = vld [vmem:[%s6406_s0 + $0x1e0] sm:$0xff]  ;;  %v89_v5 = vld [vmem:[%s6406_s0 + $0x1f0] sm:$0xff] }
 0x206   :  { %2427 = vmatpush.msrb.mxu0 %v1069_v6  ;;  %2446 = vmatpush.msrb.mxu1 %v1086_v7  ;;  %v1322_v6 = vadd.f32 %v1321_v63, %v1302_v60  ;;  %v1136_v7 = vld [vmem:[%s6407_s1 + $0x2078] sm:$0xff]  ;;  %v1143_v63 = vld [vmem:[%s6407_s1 + $0x20b0] sm:$0xff] }
 0x207   :  { %2467 = vmatpush.msrb.mxu2 %v1101_v8  ;;  %2486 = vmatpush.msrb.mxu3 %v1118_v9  ;;  %v1168_v8 = vld [vmem:[%s6407_s1 + $0x2178] sm:$0xff]  ;;  %v1341_v9 = vpop.f32.mrf.mxu1 }
 0x208   :  { %2428 = vmatpush.msrb.mxu0 %v1068_v10  ;;  %2447 = vmatpush.msrb.mxu1 %v1085_v11  ;;  %v1073_v10 = vld [vmem:[%s6407_s1 + $0x1e80] sm:$0xff]  ;;  %v1176_v60 = vld [vmem:[%s6407_s1 + $0x21b8] sm:$0xff] }
 0x209   :  { %2468 = vmatpush.msrb.mxu2 %v1100_v12  ;;  %2487 = vmatpush.msrb.mxu3 %v1117_v13  ;;  %v1105_v11 = vld [vmem:[%s6407_s1 + $0x1f80] sm:$0xff]  ;;  %v88_v12 = vld [vmem:[%s6406_s0 + $0x1e8] sm:$0xff]  ;;  %v90_v13 = vld [vmem:[%s6406_s0 + $0x1f8] sm:$0xff] }
 0x20a   :  { %2429 = vmatpush.msrb.mxu0 %v1067_v14  ;;  %2448 = vmatpush.msrb.mxu1 %v1084_v15  ;;  %v1135_v14 = vld [vmem:[%s6407_s1 + $0x2070] sm:$0xff]  ;;  %v1152_v15 = vld [vmem:[%s6407_s1 + $0x20f8] sm:$0xff] }
 0x20b   :  { %2469 = vmatpush.msrb.mxu2 %v1099_v16  ;;  %2488 = vmatpush.msrb.mxu3 %v1116_v17  ;;  %v1342_v16 = vadd.f32 %v1341_v9, %v1322_v6  ;;  %v1167_v17 = vld [vmem:[%s6407_s1 + $0x2170] sm:$0xff]  ;;  %v1157_v6 = vld [vmem:[%s6407_s1 + $0x2120] sm:$0xff] }
 0x20c   :  { %2430 = vmatpush.msrb.mxu0 %v1066_v18  ;;  %2449 = vmatpush.msrb.mxu1 %v1083_v19  ;;  %v1184_v18 = vld [vmem:[%s6407_s1 + $0x21f8] sm:$0xff]  ;;  %v1361_v19 = vpop.f32.mrf.mxu2  ;;  %v1141_v9 = vld [vmem:[%s6407_s1 + $0x20a0] sm:$0xff] }
 0x20d   :  { %2470 = vmatpush.msrb.mxu2 %v1098_v21  ;;  %2489 = vmatpush.msrb.mxu3 %v1115_v22  ;;  %v1151_v21 = vld [vmem:[%s6407_s1 + $0x20f0] sm:$0xff]  ;;  %v1166_v22 = vld [vmem:[%s6407_s1 + $0x2168] sm:$0xff] }
 0x20e   :  { %2431 = vmatpush.msrb.mxu0 %v1065_v24  ;;  %2450 = vmatpush.msrb.mxu1 %v1082_v25  ;;  %v1133_v24 = vld [vmem:[%s6407_s1 + $0x2060] sm:$0xff]  ;;  %v1150_v25 = vld [vmem:[%s6407_s1 + $0x20e8] sm:$0xff] }
 0x20f   :  { %2471 = vmatpush.msrb.mxu2 %v1097_v26  ;;  %2490 = vmatpush.msrb.mxu3 %v1114_v27  ;;  %v1362_v26 = vadd.f32 %v1361_v19, %v1342_v16  ;;  %v1165_v27 = vld [vmem:[%s6407_s1 + $0x2160] sm:$0xff]  ;;  %v1155_v16 = vld [vmem:[%s6407_s1 + $0x2110] sm:$0xff]  ;;  %v1122_v19 = vld [vmem:[%s6407_s1 + $0x2008] sm:$0xff] }
 0x210   :  { %2432 = vmatpush.msrb.mxu0 %v1064_v28  ;;  %2451 = vmatpush.msrb.mxu1 %v1081_v29  ;;  %v1182_v28 = vld [vmem:[%s6407_s1 + $0x21e8] sm:$0xff]  ;;  %v1381_v29 = vpop.f32.mrf.mxu3 }
 0x211   :  { %2472 = vmatpush.msrb.mxu2 %v1096_v31  ;;  %2491 = vmatpush.msrb.mxu3 %v1113_v32  ;;  %v1149_v31 = vld [vmem:[%s6407_s1 + $0x20e0] sm:$0xff]  ;;  %v1164_v32 = vld [vmem:[%s6407_s1 + $0x2158] sm:$0xff] }
 0x212   :  { %2433 = vmatpush.msrb.mxu0 %v1063_v34  ;;  %2452 = vmatpush.msrb.mxu1 %v1080_v35  ;;  %v1401_v34 = vpop.f32.mrf.mxu0  ;;  %v1131_v35 = vld [vmem:[%s6407_s1 + $0x2050] sm:$0xff] }
 0x213   :  { %2473 = vmatpush.msrb.mxu2 %v1095_v36  ;;  %2492 = vmatpush.msrb.mxu3 %v1112_v37  ;;  %v1148_v36 = vld [vmem:[%s6407_s1 + $0x20d8] sm:$0xff]  ;;  %v1382_v37 = vadd.f32 %v1381_v29, %v1362_v26 }
 0x214   :  { %2434 = vmatpush.msrb.mxu0 %v1062_v38  ;;  %2453 = vmatpush.msrb.mxu1 %v1079_v39  ;;  %v1163_v38 = vld [vmem:[%s6407_s1 + $0x2150] sm:$0xff]  ;;  %v1180_v39 = vld [vmem:[%s6407_s1 + $0x21d8] sm:$0xff]  ;;  %v1441_v50 = vpop.f32.mrf.mxu2 }
 0x215   :  { %2474 = vmatpush.msrb.mxu2 %v1094_v41  ;;  %2493 = vmatpush.msrb.mxu3 %v1111_v42  ;;  %v1147_v41 = vld [vmem:[%s6407_s1 + $0x20d0] sm:$0xff]  ;;  %v1402_v42 = vadd.f32 %v1401_v34, %v1382_v37 }
 0x216   :  { %2435 = vmatpush.msrb.mxu0 %v1061_v44  ;;  %2454 = vmatpush.msrb.mxu1 %v1078_v45  ;;  %v1179_v44 = vld [vmem:[%s6407_s1 + $0x21d0] sm:$0xff]  ;;  %v1421_v45 = vpop.f32.mrf.mxu1 }
 0x217   :  { %2475 = vmatpush.msrb.mxu2 %v1093_v46  ;;  %2494 = vmatpush.msrb.mxu3 %v1110_v47  ;;  %v1129_v46 = vld [vmem:[%s6407_s1 + $0x2040] sm:$0xff]  ;;  %v1146_v47 = vld [vmem:[%s6407_s1 + $0x20c8] sm:$0xff]  ;;  %v1422_v53 = vadd.f32 %v1421_v45, %v1402_v42 }
 0x218   :  { %2436 = vmatpush.msrb.mxu0 %v1060_v48  ;;  %2455 = vmatpush.msrb.mxu1 %v1077_v49  ;;  %v1161_v48 = vld [vmem:[%s6407_s1 + $0x2140] sm:$0xff]  ;;  %v1178_v49 = vld [vmem:[%s6407_s1 + $0x21c8] sm:$0xff] }
 0x219   :  { %2476 = vmatpush.msrb.mxu2 %v1092_v51  ;;  %2495 = vmatpush.msrb.mxu3 %v1109_v52  ;;  %v1128_v51 = vld [vmem:[%s6407_s1 + $0x2038] sm:$0xff]  ;;  %v1145_v52 = vld [vmem:[%s6407_s1 + $0x20c0] sm:$0xff]  ;;  %v1198_v42 = vld [vmem:[%s6407_s1 + $0x2268] sm:$0xff] }
 0x21a   :  { %2437 = vmatpush.msrb.mxu0 %v1059_v54  ;;  %2456 = vmatpush.msrb.mxu1 %v1076_v55  ;;  %v1160_v54 = vld [vmem:[%s6407_s1 + $0x2138] sm:$0xff]  ;;  %v1177_v55 = vld [vmem:[%s6407_s1 + $0x21c0] sm:$0xff] }
 0x21b   :  { %2477 = vmatpush.msrb.mxu2 %v1091_v56  ;;  %2496 = vmatpush.msrb.mxu3 %v1108_v57  ;;  %v1127_v56 = vld [vmem:[%s6407_s1 + $0x2030] sm:$0xff]  ;;  %v1144_v57 = vld [vmem:[%s6407_s1 + $0x20b8] sm:$0xff]  ;;  %v1197_v45 = vld [vmem:[%s6407_s1 + $0x2260] sm:$0xff] }
 0x21c   :  { %2438 = vmatpush.msrb.mxu0 %v1058_v58  ;;  %2457 = vmatpush.msrb.mxu1 %v1075_v59  ;;  %v1442_v58 = vadd.f32 %v1441_v50, %v1422_v53  ;;  %v1159_v59 = vld [vmem:[%s6407_s1 + $0x2130] sm:$0xff]  ;;  %v1208_v50 = vld [vmem:[%s6407_s1 + $0x22b8] sm:$0xff] }
 0x21d   :  { %2478 = vmatpush.msrb.mxu2 %v1090_v61  ;;  %2497 = vmatpush.msrb.mxu3 %v1107_v62  ;;  %v1461_v61 = vpop.f32.mrf.mxu3  ;;  %v1126_v62 = vld [vmem:[%s6407_s1 + $0x2028] sm:$0xff] }
 0x21e   :  { %2439 = vmatpush.msrb.mxu0 %v1057_v0  ;;  %2458 = vmatpush.msrb.mxu1 %v1074_v1  ;;  %v1158_v0 = vld [vmem:[%s6407_s1 + $0x2128] sm:$0xff]  ;;  %v1175_v1 = vld [vmem:[%s6407_s1 + $0x21b0] sm:$0xff] }
 0x21f   :  { %2479 = vmatpush.msrb.mxu2 %v1089_v2  ;;  %2498 = vmatpush.msrb.mxu3 %v1106_v3  ;;  %v1481_v2 = vpop.f32.mrf.mxu0  ;;  %v1125_v3 = vld [vmem:[%s6407_s1 + $0x2020] sm:$0xff] }
 0x220   :  { %2440 = vmatmul.f32.vlgmr.msrb.gmra.mxu0 %v87_v4  ;;  %2480 = vmatmul.f32.vlgmr.msrb.gmra.mxu2 %v89_v5  ;;  %v1142_v4 = vld [vmem:[%s6407_s1 + $0x20a8] sm:$0xff]  ;;  %v1462_v5 = vadd.f32 %v1461_v61, %v1442_v58 }
 0x221   :  { %2504 = vmatpush.msra.mxu0 %v1136_v7  ;;  %2544 = vmatpush.msra.mxu2 %v1168_v8  ;;  %v1174_v7 = vld [vmem:[%s6407_s1 + $0x21a8] sm:$0xff]  ;;  %v1124_v8 = vld [vmem:[%s6407_s1 + $0x2018] sm:$0xff] }
 0x222   :  { %2459 = vmatpush.msrb.mxu1 %v1073_v10  ;;  %2499 = vmatpush.msrb.mxu3 %v1105_v11  ;;  %v1482_v10 = vadd.f32 %v1481_v2, %v1462_v5  ;;  %v1156_v11 = vld [vmem:[%s6407_s1 + $0x2118] sm:$0xff]  ;;  %v1190_v5 = vld [vmem:[%s6407_s1 + $0x2228] sm:$0xff] }
 0x223   :  { %2460 = vmatmul.f32.vlgmr.msrb.gmra.mxu1 %v88_v12  ;;  %2500 = vmatmul.f32.vlgmr.msrb.gmra.mxu3 %v90_v13  ;;  %v1173_v12 = vld [vmem:[%s6407_s1 + $0x21a0] sm:$0xff]  ;;  %v1501_v13 = vpop.f32.mrf.mxu1 }
 0x224   :  { %2505 = vmatpush.msra.mxu0 %v1135_v14  ;;  %2524 = vmatpush.msra.mxu1 %v1152_v15  ;;  %v1123_v14 = vld [vmem:[%s6407_s1 + $0x2010] sm:$0xff]  ;;  %v1140_v15 = vld [vmem:[%s6407_s1 + $0x2098] sm:$0xff] }
 0x225   :  { %2545 = vmatpush.msra.mxu2 %v1167_v17  ;;  %2564 = vmatpush.msra.mxu3 %v1184_v18  ;;  %v1172_v17 = vld [vmem:[%s6407_s1 + $0x2198] sm:$0xff]  ;;  %v1521_v18 = vpop.f32.mrf.mxu2  ;;  %v1541_v29 = vpop.f32.mrf.mxu3 }
 0x226   :  { %2506 = vmatpush.msra.mxu0 %v1134_v20  ;;  %2525 = vmatpush.msra.mxu1 %v1151_v21  ;;  %v1139_v20 = vld [vmem:[%s6407_s1 + $0x2090] sm:$0xff]  ;;  %v1502_v21 = vadd.f32 %v1501_v13, %v1482_v10  ;;  %v1201_v10 = vld [vmem:[%s6407_s1 + $0x2280] sm:$0xff] }
 0x227   :  { %2546 = vmatpush.msra.mxu2 %v1166_v22  ;;  %2565 = vmatpush.msra.mxu3 %v1183_v23  ;;  %v1154_v22 = vld [vmem:[%s6407_s1 + $0x2108] sm:$0xff]  ;;  %v1171_v23 = vld [vmem:[%s6407_s1 + $0x2190] sm:$0xff]  ;;  %v1561_v34 = vpop.f32.mrf.mxu0 }
 0x228   :  { %2507 = vmatpush.msra.mxu0 %v1133_v24  ;;  %2526 = vmatpush.msra.mxu1 %v1150_v25  ;;  %v1121_v24 = vld [vmem:[%s6407_s1 + $0x2000] sm:$0xff]  ;;  %v1138_v25 = vld [vmem:[%s6407_s1 + $0x2088] sm:$0xff]  ;;  %v1522_v26 = vadd.f32 %v1521_v18, %v1502_v21 }
 0x229   :  { %2547 = vmatpush.msra.mxu2 %v1165_v27  ;;  %2566 = vmatpush.msra.mxu3 %v1182_v28  ;;  %v1153_v27 = vld [vmem:[%s6407_s1 + $0x2100] sm:$0xff]  ;;  %v1170_v28 = vld [vmem:[%s6407_s1 + $0x2188] sm:$0xff] }
 0x22a   :  { %2508 = vmatpush.msra.mxu0 %v1132_v30  ;;  %2527 = vmatpush.msra.mxu1 %v1149_v31  ;;  %v91_v30 = vld [vmem:[%s6406_s0 + $0x200] sm:$0xff]  ;;  %v93_v31 = vld [vmem:[%s6406_s0 + $0x210] sm:$0xff]  ;;  %v1542_v37 = vadd.f32 %v1541_v29, %v1522_v26 }
 0x22b   :  { %2548 = vmatpush.msra.mxu2 %v1164_v32  ;;  %2567 = vmatpush.msra.mxu3 %v1181_v33  ;;  %v1200_v32 = vld [vmem:[%s6407_s1 + $0x2278] sm:$0xff]  ;;  %v1137_v33 = vld [vmem:[%s6407_s1 + $0x2080] sm:$0xff] }
 0x22c   :  { %2509 = vmatpush.msra.mxu0 %v1131_v35  ;;  %2528 = vmatpush.msra.mxu1 %v1148_v36  ;;  %v1169_v35 = vld [vmem:[%s6407_s1 + $0x2180] sm:$0xff]  ;;  %v92_v36 = vld [vmem:[%s6406_s0 + $0x208] sm:$0xff] }
 0x22d   :  { %2549 = vmatpush.msra.mxu2 %v1163_v38  ;;  %2568 = vmatpush.msra.mxu3 %v1180_v39  ;;  %v94_v38 = vld [vmem:[%s6406_s0 + $0x218] sm:$0xff]  ;;  %v1199_v39 = vld [vmem:[%s6407_s1 + $0x2270] sm:$0xff]  ;;  %v1621_v53 = vpop.f32.mrf.mxu3  ;;  %v95_v21 = vld [vmem:[%s6406_s0 + $0x220] sm:$0xff] }
 0x22e   :  { %2510 = vmatpush.msra.mxu0 %v1130_v40  ;;  %2529 = vmatpush.msra.mxu1 %v1147_v41  ;;  %v1211_v40 = vld [vmem:[%s6407_s1 + $0x22d0] sm:$0x7f]  ;;  %v1562_v41 = vadd.f32 %v1561_v34, %v1542_v37 }
 0x22f   :  { %2550 = vmatpush.msra.mxu2 %v1162_v43  ;;  %2569 = vmatpush.msra.mxu3 %v1179_v44  ;;  %v1581_v43 = vpop.f32.mrf.mxu1  ;;  %v1210_v44 = vld [vmem:[%s6407_s1 + $0x22c8] sm:$0xff] }
 0x230   :  { %2511 = vmatpush.msra.mxu0 %v1129_v46  ;;  %2530 = vmatpush.msra.mxu1 %v1146_v47  ;;  %v1601_v46 = vpop.f32.mrf.mxu2  ;;  %v1209_v47 = vld [vmem:[%s6407_s1 + $0x22c0] sm:$0xff] }
 0x231   :  { %2551 = vmatpush.msra.mxu2 %v1161_v48  ;;  %2570 = vmatpush.msra.mxu3 %v1178_v49  ;;  %v1582_v48 = vadd.f32 %v1581_v43, %v1562_v41  ;;  %v1196_v49 = vld [vmem:[%s6407_s1 + $0x2258] sm:$0xff] }
 0x232   :  { %2512 = vmatpush.msra.mxu0 %v1128_v51  ;;  %2531 = vmatpush.msra.mxu1 %v1145_v52  ;;  %v1195_v52 = vld [vmem:[%s6407_s1 + $0x2250] sm:$0xff] }
 0x233   :  { %2552 = vmatpush.msra.mxu2 %v1160_v54  ;;  %2571 = vmatpush.msra.mxu3 %v1177_v55  ;;  %v1602_v51 = vadd.f32 %v1601_v46, %v1582_v48  ;;  %v1207_v54 = vld [vmem:[%s6407_s1 + $0x22b0] sm:$0xff]  ;;  %v1194_v55 = vld [vmem:[%s6407_s1 + $0x2248] sm:$0xff] }
 0x234   :  { %2513 = vmatpush.msra.mxu0 %v1127_v56  ;;  %2532 = vmatpush.msra.mxu1 %v1144_v57  ;;  %v1641_v56 = vpop.f32.mrf.mxu0  ;;  %v1206_v57 = vld [vmem:[%s6407_s1 + $0x22a8] sm:$0xff] }
 0x235   :  { %2553 = vmatpush.msra.mxu2 %v1159_v59  ;;  %2572 = vmatpush.msra.mxu3 %v1176_v60  ;;  %v1622_v58 = vadd.f32 %v1621_v53, %v1602_v51  ;;  %v1193_v59 = vld [vmem:[%s6407_s1 + $0x2240] sm:$0xff] }
 0x236   :  { %2514 = vmatpush.msra.mxu0 %v1126_v62  ;;  %2533 = vmatpush.msra.mxu1 %v1143_v63  ;;  %v1205_v60 = vld [vmem:[%s6407_s1 + $0x22a0] sm:$0xff]  ;;  %v1192_v62 = vld [vmem:[%s6407_s1 + $0x2238] sm:$0xff] }
 0x237   :  { %2554 = vmatpush.msra.mxu2 %v1158_v0  ;;  %2573 = vmatpush.msra.mxu3 %v1175_v1  ;;  %v1642_v61 = vadd.f32 %v1641_v56, %v1622_v58  ;;  %v1661_v63 = vpop.f32.mrf.mxu1  ;;  %v1204_v0 = vld [vmem:[%s6407_s1 + $0x2298] sm:$0xff]  ;;  %v1191_v1 = vld [vmem:[%s6407_s1 + $0x2230] sm:$0xff] }
 0x238   :  { %2515 = vmatpush.msra.mxu0 %v1125_v3  ;;  %2534 = vmatpush.msra.mxu1 %v1142_v4  ;;  %v1681_v2 = vpop.f32.mrf.mxu2  ;;  %v1203_v3 = vld [vmem:[%s6407_s1 + $0x2290] sm:$0xff] }
 0x239   :  { %2555 = vmatpush.msra.mxu2 %v1157_v6  ;;  %2574 = vmatpush.msra.mxu3 %v1174_v7  ;;  %v1662_v4 = vadd.f32 %v1661_v63, %v1642_v61  ;;  %v1202_v6 = vld [vmem:[%s6407_s1 + $0x2288] sm:$0xff] }
 0x23a   :  { %2516 = vmatpush.msra.mxu0 %v1124_v8  ;;  %2535 = vmatpush.msra.mxu1 %v1141_v9  ;;  %v1189_v8 = vld [vmem:[%s6407_s1 + $0x2220] sm:$0xff]  ;;  %v1701_v9 = vpop.f32.mrf.mxu3 }
 0x23b   :  { %2556 = vmatpush.msra.mxu2 %v1156_v11  ;;  %2575 = vmatpush.msra.mxu3 %v1173_v12  ;;  %v1682_v7 = vadd.f32 %v1681_v2, %v1662_v4  ;;  %v1188_v11 = vld [vmem:[%s6407_s1 + $0x2218] sm:$0xff]  ;;  %v96_v12 = vld [vmem:[%s6406_s0 + $0x228] sm:$0xff] }
 0x23c   :  { %2517 = vmatpush.msra.mxu0 %v1123_v14  ;;  %2536 = vmatpush.msra.mxu1 %v1140_v15  ;;  %v1721_v13 = vpop.f32.mrf.mxu0  ;;  %v1187_v15 = vld [vmem:[%s6407_s1 + $0x2210] sm:$0xff] }
 0x23d   :  { %2557 = vmatpush.msra.mxu2 %v1155_v16  ;;  %2576 = vmatpush.msra.mxu3 %v1172_v17  ;;  %v1702_v14 = vadd.f32 %v1701_v9, %v1682_v7  ;;  %v1186_v17 = vld [vmem:[%s6407_s1 + $0x2208] sm:$0xff]  ;;  %v2632_v7 = vld [vmem:[%s6409_s3 + $0x38] sm:$0xff] }
 0x23e   :  { %2518 = vmatpush.msra.mxu0 %v1122_v19  ;;  %2537 = vmatpush.msra.mxu1 %v1139_v20  ;;  %v1185_v19 = vld [vmem:[%s6407_s1 + $0x2200] sm:$0xff] }
 0x23f   :  { %2558 = vmatpush.msra.mxu2 %v1154_v22  ;;  %2577 = vmatpush.msra.mxu3 %v1171_v23  ;;  %v1722_v16 = vadd.f32 %v1721_v13, %v1702_v14  ;;  %v1741_v18 = vpop.f32.mrf.mxu1  ;;  %v2629_v13 = vld [vmem:[%s6409_s3 + $0x20] sm:$0xff] }
 0x240   :  { %2519 = vmatpush.msra.mxu0 %v1121_v24  ;;  %2538 = vmatpush.msra.mxu1 %v1138_v25  ;;  %v1761_v20 = vpop.f32.mrf.mxu2 }
 0x241   :  { %2559 = vmatpush.msra.mxu2 %v1153_v27  ;;  %2578 = vmatpush.msra.mxu3 %v1170_v28  ;;  %v1742_v22 = vadd.f32 %v1741_v18, %v1722_v16 }
 0x242   :  { %2520 = vmatmul.f32.vlgmr.msra.gmra.mxu0 %v91_v30  ;;  %2560 = vmatmul.f32.vlgmr.msra.gmra.mxu2 %v93_v31  ;;  %v1781_v24 = vpop.f32.mrf.mxu3 }
 0x243   :  { %2584 = vmatpush.msrb.mxu0 %v1200_v32  ;;  %2539 = vmatpush.msra.mxu1 %v1137_v33  ;;  %v1762_v23 = vadd.f32 %v1761_v20, %v1742_v22 }
 0x244   :  { %2579 = vmatpush.msra.mxu3 %v1169_v35  ;;  %2540 = vmatmul.f32.vlgmr.msra.gmra.mxu1 %v92_v36  ;;  %v1801_v25 = vpop.f32.mrf.mxu0 }
 0x245   :  { %2580 = vmatmul.f32.vlgmr.msra.gmra.mxu3 %v94_v38  ;;  %2585 = vmatpush.msrb.mxu0 %v1199_v39  ;;  %v1782_v26 = vadd.f32 %v1781_v24, %v1762_v23 }
 0x246   :  { %2716 = vmatpush.msk.msrb.mxu1 %vm1220_vm0, %v1211_v40  ;;  %2649 = vmatpush.msrb.mxu2 %v2632_v7 }
 0x247   :  { %2586 = vmatpush.msrb.mxu0 %v1198_v42  ;;  %v1802_v27 = vadd.f32 %v1801_v25, %v1782_v26  ;;  %v1821_v28 = vpop.f32.mrf.mxu1  ;;  %v2628_v25 = vld [vmem:[%s6409_s3 + $0x18] sm:$0xff] }
 0x248   :  { %2610 = vmatpush.msrb.mxu1 %v1210_v44  ;;  %v1841_v29 = vpop.f32.mrf.mxu2 }
 0x249   :  { %2587 = vmatpush.msrb.mxu0 %v1197_v45  ;;  %v1822_v30 = vadd.f32 %v1821_v28, %v1802_v27  ;;  %v2627_v28 = vld [vmem:[%s6409_s3 + $0x10] sm:$0xff] }
 0x24a   :  { %2611 = vmatpush.msrb.mxu1 %v1209_v47  ;;  %v1861_v32 = vpop.f32.mrf.mxu3 }
 0x24b   :  { %2588 = vmatpush.msrb.mxu0 %v1196_v49  ;;  %v1842_v31 = vadd.f32 %v1841_v29, %v1822_v30  ;;  %v2626_v30 = vld [vmem:[%s6409_s3 + $0x8] sm:$0xff] }
 0x24c   :  { %2612 = vmatpush.msrb.mxu1 %v1208_v50  ;;  %v1881_v33 = vpop.f32.mrf.mxu0 }
 0x24d   :  { %2589 = vmatpush.msrb.mxu0 %v1195_v52  ;;  %v1862_v34 = vadd.f32 %v1861_v32, %v1842_v31  ;;  %v2625_v32 = vld [vmem:[%s6409_s3] sm:$0xff] }
 0x24e   :  { %2613 = vmatpush.msrb.mxu1 %v1207_v54 }
 0x24f   :  { %2590 = vmatpush.msrb.mxu0 %v1194_v55  ;;  %v1882_v35 = vadd.f32 %v1881_v33, %v1862_v34  ;;  %v1901_v36 = vpop.f32.mrf.mxu1 }
 0x250   :  { %2614 = vmatpush.msrb.mxu1 %v1206_v57  ;;  %v1921_v37 = vpop.f32.mrf.mxu2 }
 0x251   :  { %2591 = vmatpush.msrb.mxu0 %v1193_v59  ;;  %v1902_v38 = vadd.f32 %v1901_v36, %v1882_v35  ;;  %v2669_v35 = vld [vmem:[%s6411_s5 + $0x38] sm:$0xff]  ;;  %v2668_v36 = vld [vmem:[%s6411_s5 + $0x30] sm:$0xff] }
 0x252   :  { %2615 = vmatpush.msrb.mxu1 %v1205_v60  ;;  %v1941_v40 = vpop.f32.mrf.mxu3  ;;  %2685 = vmatpush.msrb.mxu3 %v2669_v35 }
 0x253   :  { %2592 = vmatpush.msrb.mxu0 %v1192_v62  ;;  %v1922_v39 = vadd.f32 %v1921_v37, %v1902_v38  ;;  %v2667_v38 = vld [vmem:[%s6411_s5 + $0x28] sm:$0xff] }
 0x254   :  { %2616 = vmatpush.msrb.mxu1 %v1204_v0  ;;  %v1961_v41 = vpop.f32.mrf.mxu0  ;;  %2686 = vmatpush.msrb.mxu3 %v2668_v36 }
 0x255   :  { %2593 = vmatpush.msrb.mxu0 %v1191_v1  ;;  %v1942_v42 = vadd.f32 %v1941_v40, %v1922_v39  ;;  %v2666_v40 = vld [vmem:[%s6411_s5 + $0x20] sm:$0xff] }
 0x256   :  { %2617 = vmatpush.msrb.mxu1 %v1203_v3  ;;  %2687 = vmatpush.msrb.mxu3 %v2667_v38 }
 0x257   :  { %2594 = vmatpush.msrb.mxu0 %v1190_v5  ;;  %v1962_v43 = vadd.f32 %v1961_v41, %v1942_v42  ;;  %v1981_v44 = vpop.f32.mrf.mxu1 }
 0x258   :  { %2618 = vmatpush.msrb.mxu1 %v1202_v6  ;;  %v2001_v45 = vpop.f32.mrf.mxu2  ;;  %2688 = vmatpush.msrb.mxu3 %v2666_v40 }
 0x259   :  { %2595 = vmatpush.msrb.mxu0 %v1189_v8  ;;  %v1982_v46 = vadd.f32 %v1981_v44, %v1962_v43  ;;  %v2631_v8 = vld [vmem:[%s6409_s3 + $0x30] sm:$0xff]  ;;  %v2665_v43 = vld [vmem:[%s6411_s5 + $0x18] sm:$0xff] }
 0x25a   :  { %2619 = vmatpush.msrb.mxu1 %v1201_v10  ;;  %v2021_v48 = vpop.f32.mrf.mxu3  ;;  %2650 = vmatpush.msrb.mxu2 %v2631_v8 }
 0x25b   :  { %2596 = vmatpush.msrb.mxu0 %v1188_v11  ;;  %2717 = vmatmul.msk.f32.vlgmr.msrb.gmra.mxu1 %vm1216_vm1, %v96_v12  ;;  %v2002_v47 = vadd.f32 %v2001_v45, %v1982_v46  ;;  %v2630_v11 = vld [vmem:[%s6409_s3 + $0x28] sm:$0xff] }
 0x25c   :  { %v2041_v49 = vpop.f32.mrf.mxu0  ;;  %2651 = vmatpush.msrb.mxu2 %v2630_v11  ;;  %2689 = vmatpush.msrb.mxu3 %v2665_v43 }
 0x25d   :  { %2597 = vmatpush.msrb.mxu0 %v1187_v15  ;;  %v2022_v50 = vadd.f32 %v2021_v48, %v2002_v47 }
 0x25e   :  { %2652 = vmatpush.msrb.mxu2 %v2629_v13 }
 0x25f   :  { %2598 = vmatpush.msrb.mxu0 %v1186_v17  ;;  %v2042_v51 = vadd.f32 %v2041_v49, %v2022_v50  ;;  %v2061_v52 = vpop.f32.mrf.mxu1 }
 0x260   :  { %v2081_v53 = vpop.f32.mrf.mxu2  ;;  %2653 = vmatpush.msrb.mxu2 %v2628_v25 }
 0x261   :  { %2599 = vmatpush.msrb.mxu0 %v1185_v19  ;;  %v2062_v54 = vadd.f32 %v2061_v52, %v2042_v51 }
 0x262   :  { %2600 = vmatmul.f32.vlgmr.msrb.gmra.mxu0 %v95_v21  ;;  %v2101_v56 = vpop.f32.mrf.mxu3  ;;  %2654 = vmatpush.msrb.mxu2 %v2627_v28 }
 0x263   :  { %v2082_v55 = vadd.f32 %v2081_v53, %v2062_v54 }
 0x264   :  { %v2121_v57 = vpop.f32.mrf.mxu0  ;;  %2655 = vmatpush.msrb.mxu2 %v2626_v30 }
 0x265   :  { %v2102_v58 = vadd.f32 %v2101_v56, %v2082_v55 }
 0x266   :  { %2656 = vmatpush.msrb.mxu2 %v2625_v32 }
 0x267   :  { %v2122_v59 = vadd.f32 %v2121_v57, %v2102_v58  ;;  %v2141_v60 = vpop.f32.mrf.mxu1 }
 0x268   :  { %v2161_v61 = vpop.f32.mrf.mxu2 }
 0x269   :  { %v2142_v62 = vadd.f32 %v2141_v60, %v2122_v59  ;;  %v2664_v60 = vld [vmem:[%s6411_s5 + $0x10] sm:$0xff] }
 0x26a   :  { %v2181_v0 = vpop.f32.mrf.mxu3  ;;  %2690 = vmatpush.msrb.mxu3 %v2664_v60 }
 0x26b   :  { %v2162_v63 = vadd.f32 %v2161_v61, %v2142_v62  ;;  %v2663_v61 = vld [vmem:[%s6411_s5 + $0x8] sm:$0xff]  ;;  %v2662_v62 = vld [vmem:[%s6411_s5] sm:$0xff]  ;;  %s2707_s5 = sshll.u32 %s6413_s7, 4  ;;  %s2708_s5 = int_to_ptr.hbm [resolvable:$true] %s2707_s5 }
 0x26c   :  { %v2201_v1 = vpop.f32.mrf.mxu0  ;;  %2691 = vmatpush.msrb.mxu3 %v2663_v61 }
 0x26d   :  { %v2182_v2 = vadd.f32 %v2181_v0, %v2162_v63  ;;  %v2722_v63 = vld [vmem:[%s6410_s4] ss:$0 sm:$0xff] }
 0x26e   :  { %2692 = vmatpush.msrb.mxu3 %v2662_v62 }
 0x26f   :  { %v2202_v3 = vadd.f32 %v2201_v1, %v2182_v2  ;;  %v2221_v4 = vpop.f32.mrf.mxu1 }
 0x270   :  { %v2241_v5 = vpop.f32.mrf.mxu2 }
 0x271   :  { %v2222_v6 = vadd.f32 %v2221_v4, %v2202_v3  ;;  %v2723_v3 = vld [vmem:[%s6412_s6] ss:$0 sm:$0xff] }
 0x272   :  { %v2261_v10 = vpop.f32.mrf.mxu3 }
 0x273   :  { %v2242_v9 = vadd.f32 %v2241_v5, %v2222_v6 }
 0x274   :  { %v2281_v12 = vpop.f32.mrf.mxu0 }
 0x275   :  { %v2262_v14 = vadd.f32 %v2261_v10, %v2242_v9 }
 0x277   :  { %v2282_v15 = vadd.f32 %v2281_v12, %v2262_v14  ;;  %v2301_v16 = vpop.f32.mrf.mxu1 }
 0x278   :  { %v2321_v17 = vpop.f32.mrf.mxu2 }
 0x279   :  { %v2302_v18 = vadd.f32 %v2301_v16, %v2282_v15 }
 0x27a   :  { %v2341_v20 = vpop.f32.mrf.mxu3 }
 0x27b   :  { %v2322_v19 = vadd.f32 %v2321_v17, %v2302_v18 }
 0x27c   :  { %v2361_v21 = vpop.f32.mrf.mxu0 }
 0x27d   :  { %v2342_v22 = vadd.f32 %v2341_v20, %v2322_v19 }
 0x27f   :  { %v2362_v23 = vadd.f32 %v2361_v21, %v2342_v22  ;;  %v2381_v24 = vpop.f32.mrf.mxu1 }
 0x281   :  { %v2401_v26 = vpop.f32.mrf.mxu2  ;;  %v2382_v27 = vadd.f32 %v2381_v24, %v2362_v23 }
 0x283   :  { %v2402_v29 = vadd.f32 %v2401_v26, %v2382_v27 }
 0x284   :  { %v2421_v31 = vpop.f32.mrf.mxu3 }
 0x285   :  { %v2422_v34 = vadd.f32 %v2421_v31, %v2402_v29 }
 0x29d   :  { %v2441_v33 = vpop.f32.mrf.mxu0 }
 0x29e   :  { %v2442_v37 = vadd.f32 %v2441_v33, %v2422_v34 }
 0x2a0   :  { %v2461_v39 = vpop.f32.mrf.mxu1 }
 0x2a1   :  { %v2462_v42 = vadd.f32 %v2461_v39, %v2442_v37 }
 0x2a3   :  { %v2481_v41 = vpop.f32.mrf.mxu2 }
 0x2a4   :  { %v2482_v44 = vadd.f32 %v2481_v41, %v2462_v42 }
 0x2a6   :  { %v2501_v45 = vpop.f32.mrf.mxu3 }
 0x2a7   :  { %v2502_v47 = vadd.f32 %v2501_v45, %v2482_v44 }
 0x2bf   :  { %v2521_v46 = vpop.f32.mrf.mxu0 }
 0x2c0   :  { %v2522_v48 = vadd.f32 %v2521_v46, %v2502_v47 }
 0x2c1   :  { %v2541_v49 = vpop.f32.mrf.mxu1 }
 0x2c2   :  { %v2542_v51 = vadd.f32 %v2541_v49, %v2522_v48 }
 0x2c5   :  { %v2561_v50 = vpop.f32.mrf.mxu2 }
 0x2c6   :  { %v2562_v52 = vadd.f32 %v2561_v50, %v2542_v51 }
 0x2c8   :  { %v2581_v53 = vpop.f32.mrf.mxu3 }
 0x2c9   :  { %v2582_v54 = vadd.f32 %v2581_v53, %v2562_v52 }
 0x2d8   :  { %v2621_v56 = vpop.f32.mrf.mxu1 }
 0x2df   :  { %v2601_v55 = vpop.f32.mrf.mxu0 }
 0x2e0   :  { %v2602_v57 = vadd.f32 %v2601_v55, %v2582_v54 }
 0x2e2   :  { %v2622_v58 = vadd.f32 %v2621_v56, %v2602_v57 }
 0x2e4   :  { %v2624_v59 = vmax.f32 %v2622_v58, 0.0 }
 0x2e6   :  { %2718 = vmatmul.msk.f32.vlgmr.msrb.gmra.mxu2 %vm2637_vm2, %v2624_v59 }
 0x369   :  { %v2658_v0 = vpop.f32.mrf.mxu2 }
 0x36a   :  { %v2659_v1 = vadd.f32 %v2722_v63, %v2658_v0 }
 0x36c   :  { %v2661_v2 = vmax.f32 %v2659_v1, 0.0 }
 0x36e   :  { %2719 = vmatmul.msk.f32.vlgmr.msrb.gmra.mxu3 %vm2637_vm2, %v2661_v2 }
 0x3f1   :  { %v2694_v4 = vpop.f32.mrf.mxu3 }
 0x3f2   :  { %v2695_v5 = vadd.f32 %v2723_v3, %v2694_v4 }
 0x3f4   :  { %v2697_v6 = vmax.f32 %v2695_v5, 0.0 }
 0x3f6   :  { %2699 = vst.msk [vmem:[#allocation2] sm:$0xff] %vm2698_vm3, %v2697_v6 }
 0x3f7   :  { %2710 = dma.vmem_to_hbm [thread:$0]  %s2706_s23, 128, %s2708_s5, [#allocation3]  }
 0x3f8   :  { %2748 = dma.done.wait [#allocation3], 128  }
 0x3f9   :  { %2749 = vsyncadd [#allocation3], 4294967168 }
 0x3fa   :  { %2715 = vsyncpa [#allocation3], 1 }

</bundles_post_ra>
